<compile_context>
chip_gen: v5e
topology: v5e:2x2
jax: 0.10.0
libtpu: 0.0.40
codegen_flags: <defaults>
</compile_context>

<pallas_src>
import functools

import jax
import jax.numpy as jnp
from jax.experimental import pallas as pl
from jax.experimental.pallas import tpu as pltpu


# ---------------------------------------------------------------------------
# Parameter setup (glue, plain JAX)
# ---------------------------------------------------------------------------
def spectral_normalize(w_oihw, n_iters=30):
    """Spectral normalization of a conv weight (O, I, kH, kW).

    PyTorch's nn.utils.spectral_norm divides by the largest singular value of
    weight.reshape(O, -1) (power iteration). Here: converged, deterministic.
    """
    O = w_oihw.shape[0]
    w_mat = w_oihw.reshape(O, -1)
    u = jnp.ones((O,), dtype=w_mat.dtype) / jnp.sqrt(jnp.float32(O))

    def body(_, u):
        v = w_mat.T @ u
        v = v / (jnp.linalg.norm(v) + 1e-12)
        u = w_mat @ v
        u = u / (jnp.linalg.norm(u) + 1e-12)
        return u

    u = jax.lax.fori_loop(0, n_iters, body, u)
    v = w_mat.T @ u
    v = v / (jnp.linalg.norm(v) + 1e-12)
    sigma = u @ (w_mat @ v)
    return w_oihw / sigma


def make_params(key, ch_in, ch_out):
    """Deterministic Kaiming-uniform-ish init; returns OIHW spectral-normed weights."""
    k1, k2 = jax.random.split(key)
    bound1 = 1.0 / jnp.sqrt(jnp.float32(ch_in * 9))
    bound2 = 1.0 / jnp.sqrt(jnp.float32(ch_out * 9))
    w1 = jax.random.uniform(k1, (ch_out, ch_in, 3, 3), jnp.float32, -bound1, bound1)
    w2 = jax.random.uniform(k2, (ch_out, ch_out, 3, 3), jnp.float32, -bound2, bound2)
    return spectral_normalize(w1), spectral_normalize(w2)


# ---------------------------------------------------------------------------
# Fused Pallas kernel: conv3x3+IN+ReLU -> conv3x3+IN+ReLU  (one batch element)
# ---------------------------------------------------------------------------
def fused_conv_block2_kernel(x_ref, w1_ref, w2_ref, o_ref, xp1_ref, xp2_ref,
                             *, H, W, matmul_dtype, eps=1e-5):
    # x_ref : (1, H, W, Cin)        input tile (NHWC) for one batch element
    # w1_ref: (9*Cin, Cmid)         im2col weights, column = tap*Cin + c
    # w2_ref: (Cout, 9*Cmid)        im2col weights, column = tap*Cmid + c
    # o_ref : (1, Cout, H*W)        lane-dense channel-major output
    # xp1_ref/xp2_ref: VMEM scratch (H+2, W+2, C) zero-padded planes
    Cin = x_ref.shape[-1]
    Cmid = w1_ref.shape[-1]
    Cout = w2_ref.shape[0]
    HW = H * W

    # ---------------- stage 1: in-kernel zero padding ----------------
    xp1_ref[...] = jnp.zeros_like(xp1_ref)
    xp1_ref[1:H + 1, 1:W + 1, :] = x_ref[0]

    # ---------------- stage 1: im2col -> single MXU matmul (K = 9*Cin) -------
    taps = []
    for dy in range(3):
        for dx in range(3):
            taps.append(xp1_ref[dy:dy + H, dx:dx + W, :].reshape(HW, Cin))
    p1 = jnp.concatenate(taps, axis=1)                        # (HW, 9*Cin)
    y1 = jnp.dot(p1.astype(matmul_dtype), w1_ref[...].astype(matmul_dtype),
                 preferred_element_type=jnp.float32)          # (HW, Cmid)

    # InstanceNorm2d (affine=False, biased var, eps inside rsqrt) + ReLU, f32
    mean1 = jnp.mean(y1, axis=0, keepdims=True)
    c1 = y1 - mean1
    var1 = jnp.mean(c1 * c1, axis=0, keepdims=True)
    y1 = jnp.maximum(c1 * jax.lax.rsqrt(var1 + eps), 0.0)     # (HW, Cmid)

    # ---------------- stage 2: pad the intermediate in VMEM (no HBM) ---------
    xp2_ref[...] = jnp.zeros_like(xp2_ref)
    xp2_ref[1:H + 1, 1:W + 1, :] = y1.reshape(H, W, Cmid)

    taps = []
    for dy in range(3):
        for dx in range(3):
            taps.append(xp2_ref[dy:dy + H, dx:dx + W, :].reshape(HW, Cmid))
    p2 = jnp.concatenate(taps, axis=1)                        # (HW, 9*Cmid)

    # Compute the stage-2 result directly channel-major: (Cout, HW) =
    # w2 @ p2^T via dot_general contracting dim 1 of both operands (MXU
    # handles the transposed RHS natively) -> lane-dense store (HW >= 128).
    y2 = jax.lax.dot_general(
        w2_ref[...].astype(matmul_dtype), p2.astype(matmul_dtype),
        dimension_numbers=(((1,), (1,)), ((), ())),
        preferred_element_type=jnp.float32)                   # (Cout, HW)

    mean2 = jnp.mean(y2, axis=1, keepdims=True)
    c2 = y2 - mean2
    var2 = jnp.mean(c2 * c2, axis=1, keepdims=True)
    y2 = jnp.maximum(c2 * jax.lax.rsqrt(var2 + eps), 0.0)     # (Cout, HW)

    o_ref[...] = y2.reshape(1, Cout, HW).astype(o_ref.dtype)


# ---------------------------------------------------------------------------
# Wrapper: PyTorch-style NCHW in / NCHW out, OIHW weights
# ---------------------------------------------------------------------------
def conv_block2_forward(x_nchw, w1_oihw, w2_oihw, *,
                        matmul_dtype=jnp.float32, interpret=False):
    N, Cin, H, W = x_nchw.shape
    Cmid = w1_oihw.shape[0]
    Cout = w2_oihw.shape[0]

    # im2col weight packing (tap-major, channel-minor columns)
    w1m = jnp.transpose(w1_oihw, (2, 3, 1, 0)).reshape(9 * Cin, Cmid)   # (9Cin, Cmid)
    w2m = jnp.transpose(w2_oihw, (0, 2, 3, 1)).reshape(Cout, 9 * Cmid)  # (Cout, 9Cmid)

    # Input side only: NCHW -> NHWC (tiny). Output needs NO transpose: the
    # kernel emits channel-major (Cout, H*W); reshape below is free.
    x_nhwc = jnp.transpose(x_nchw, (0, 2, 3, 1))

    kernel = functools.partial(fused_conv_block2_kernel,
                               H=H, W=W, matmul_dtype=matmul_dtype)
    out = pl.pallas_call(
        kernel,
        out_shape=jax.ShapeDtypeStruct((N, Cout, H * W), jnp.float32),
        grid_spec=pltpu.PrefetchScalarGridSpec(
            num_scalar_prefetch=0,
            grid=(N,),
            in_specs=[
                pl.BlockSpec((1, H, W, Cin), lambda n: (n, 0, 0, 0)),
                pl.BlockSpec((9 * Cin, Cmid), lambda n: (0, 0)),
                pl.BlockSpec((Cout, 9 * Cmid), lambda n: (0, 0)),
            ],
            out_specs=pl.BlockSpec((1, Cout, H * W), lambda n: (n, 0, 0)),
            scratch_shapes=[
                pltpu.VMEM((H + 2, W + 2, Cin), jnp.float32),
                pltpu.VMEM((H + 2, W + 2, Cmid), jnp.float32),
            ],
        ),
        compiler_params=pltpu.CompilerParams(
            dimension_semantics=("parallel",)),
        interpret=interpret,
    )(x_nhwc, w1m, w2m)

    return out.reshape(N, Cout, H, W)


# ---------------------------------------------------------------------------
# Pure-JAX reference (sanity check)
# ---------------------------------------------------------------------------
def _ref_stage(x_nchw, w_oihw):
    y = jax.lax.conv_general_dilated(
        x_nchw, w_oihw, window_strides=(1, 1), padding=((1, 1), (1, 1)),
        dimension_numbers=("NCHW", "OIHW", "NCHW"))
    mean = jnp.mean(y, axis=(2, 3), keepdims=True)
    var = jnp.mean((y - mean) ** 2, axis=(2, 3), keepdims=True)
    return jnp.maximum((y - mean) * jax.lax.rsqrt(var + 1e-5), 0.0)


def conv_block2_ref(x_nchw, w1_oihw, w2_oihw):
    return _ref_stage(_ref_stage(x_nchw, w1_oihw), w2_oihw)


if __name__ == "__main__":
    ch_in, ch_out = 4, 8
    N, H, W = 2, 16, 16

    key = jax.random.PRNGKey(0)
    kx, kw = jax.random.split(key)
    x = jax.random.normal(kx, (N, ch_in, H, W), dtype=jnp.float32)
    w1, w2 = make_params(kw, ch_in, ch_out)

    fwd = jax.jit(conv_block2_forward)
    out = jax.block_until_ready(fwd(x, w1, w2))

    ref = conv_block2_ref(x, w1, w2)
    assert out.shape == (N, ch_out, H, W)
    assert jnp.allclose(out, ref, atol=1e-4, rtol=1e-4), "mismatch vs reference"

    print("KERNEL_OK")
</pallas_src>

<mosaic_0001>
module attributes {stable_mosaic.version = 11 : i64} {
  func.func @fused_conv_block2_kernel(%arg0: i32, %arg1: memref<1x16x16x4xf32, #tpu.memory_space<vmem>>, %arg2: memref<36x8xf32, #tpu.memory_space<vmem>>, %arg3: memref<8x72xf32, #tpu.memory_space<vmem>>, %arg4: memref<1x8x256xf32, #tpu.memory_space<vmem>>, %arg5: memref<18x18x4xf32, #tpu.memory_space<vmem>>, %arg6: memref<18x18x8xf32, #tpu.memory_space<vmem>>) attributes {dimension_semantics = [#tpu.dimension_semantics<parallel>], iteration_bounds = array<i64: 2>, scalar_prefetch = 0 : i64, scratch_operands = 2 : i64, tpu.core_type = #tpu.core_type<tc>, window_params = [{transform_indices = @transform_0, window_bounds = array<i64: 1, 16, 16, 4>}, {pipeline_mode = #tpu.pipeline_mode<synchronous>, transform_indices = @transform_1, window_bounds = array<i64: 36, 8>}, {pipeline_mode = #tpu.pipeline_mode<synchronous>, transform_indices = @transform_2, window_bounds = array<i64: 8, 72>}, {transform_indices = @transform_3, window_bounds = array<i64: 1, 8, 256>}]} {
    %cst = arith.constant 0.000000e+00 : f32
    %0 = vector.broadcast %cst : f32 to vector<18x18x4xf32>
    %c0 = arith.constant 0 : index
    %c0_0 = arith.constant 0 : index
    %c0_1 = arith.constant 0 : index
    %1 = vector.load %arg5[%c0, %c0_0, %c0_1] : memref<18x18x4xf32, #tpu.memory_space<vmem>>, vector<18x18x4xf32>
    tpu.vector_store %arg5[%c0, %c0_0, %c0_1], %0 {strides = array<i32>} : memref<18x18x4xf32, #tpu.memory_space<vmem>>, vector<18x18x4xf32>,
    %c0_2 = arith.constant 0 : index
    %c0_3 = arith.constant 0 : index
    %c0_4 = arith.constant 0 : index
    %c0_5 = arith.constant 0 : index
    %2 = vector.load %arg1[%c0_2, %c0_3, %c0_4, %c0_5] : memref<1x16x16x4xf32, #tpu.memory_space<vmem>>, vector<1x16x16x4xf32>
    %3 = vector.shape_cast %2 : vector<1x16x16x4xf32> to vector<16x16x4xf32>
    %c1 = arith.constant 1 : index
    %c1_6 = arith.constant 1 : index
    %c0_7 = arith.constant 0 : index
    %4 = vector.load %arg5[%c1, %c1_6, %c0_7] : memref<18x18x4xf32, #tpu.memory_space<vmem>>, vector<16x16x4xf32>
    tpu.vector_store %arg5[%c1, %c1_6, %c0_7], %3 {strides = array<i32>} : memref<18x18x4xf32, #tpu.memory_space<vmem>>, vector<16x16x4xf32>,
    %c0_8 = arith.constant 0 : index
    %c0_9 = arith.constant 0 : index
    %c0_10 = arith.constant 0 : index
    %5 = vector.load %arg5[%c0_8, %c0_9, %c0_10] : memref<18x18x4xf32, #tpu.memory_space<vmem>>, vector<16x16x4xf32>
    %6 = vector.shape_cast %5 : vector<16x16x4xf32> to vector<256x4xf32>
    %c0_11 = arith.constant 0 : index
    %c1_12 = arith.constant 1 : index
    %c0_13 = arith.constant 0 : index
    %7 = vector.load %arg5[%c0_11, %c1_12, %c0_13] : memref<18x18x4xf32, #tpu.memory_space<vmem>>, vector<16x16x4xf32>
    %8 = vector.shape_cast %7 : vector<16x16x4xf32> to vector<256x4xf32>
    %c0_14 = arith.constant 0 : index
    %c2 = arith.constant 2 : index
    %c0_15 = arith.constant 0 : index
    %9 = vector.load %arg5[%c0_14, %c2, %c0_15] : memref<18x18x4xf32, #tpu.memory_space<vmem>>, vector<16x16x4xf32>
    %10 = vector.shape_cast %9 : vector<16x16x4xf32> to vector<256x4xf32>
    %c1_16 = arith.constant 1 : index
    %c0_17 = arith.constant 0 : index
    %c0_18 = arith.constant 0 : index
    %11 = vector.load %arg5[%c1_16, %c0_17, %c0_18] : memref<18x18x4xf32, #tpu.memory_space<vmem>>, vector<16x16x4xf32>
    %12 = vector.shape_cast %11 : vector<16x16x4xf32> to vector<256x4xf32>
    %c1_19 = arith.constant 1 : index
    %c1_20 = arith.constant 1 : index
    %c0_21 = arith.constant 0 : index
    %13 = vector.load %arg5[%c1_19, %c1_20, %c0_21] : memref<18x18x4xf32, #tpu.memory_space<vmem>>, vector<16x16x4xf32>
    %14 = vector.shape_cast %13 : vector<16x16x4xf32> to vector<256x4xf32>
    %c1_22 = arith.constant 1 : index
    %c2_23 = arith.constant 2 : index
    %c0_24 = arith.constant 0 : index
    %15 = vector.load %arg5[%c1_22, %c2_23, %c0_24] : memref<18x18x4xf32, #tpu.memory_space<vmem>>, vector<16x16x4xf32>
    %16 = vector.shape_cast %15 : vector<16x16x4xf32> to vector<256x4xf32>
    %c2_25 = arith.constant 2 : index
    %c0_26 = arith.constant 0 : index
    %c0_27 = arith.constant 0 : index
    %17 = vector.load %arg5[%c2_25, %c0_26, %c0_27] : memref<18x18x4xf32, #tpu.memory_space<vmem>>, vector<16x16x4xf32>
    %18 = vector.shape_cast %17 : vector<16x16x4xf32> to vector<256x4xf32>
    %c2_28 = arith.constant 2 : index
    %c1_29 = arith.constant 1 : index
    %c0_30 = arith.constant 0 : index
    %19 = vector.load %arg5[%c2_28, %c1_29, %c0_30] : memref<18x18x4xf32, #tpu.memory_space<vmem>>, vector<16x16x4xf32>
    %20 = vector.shape_cast %19 : vector<16x16x4xf32> to vector<256x4xf32>
    %c2_31 = arith.constant 2 : index
    %c2_32 = arith.constant 2 : index
    %c0_33 = arith.constant 0 : index
    %21 = vector.load %arg5[%c2_31, %c2_32, %c0_33] : memref<18x18x4xf32, #tpu.memory_space<vmem>>, vector<16x16x4xf32>
    %22 = vector.shape_cast %21 : vector<16x16x4xf32> to vector<256x4xf32>
    %23 = tpu.concatenate %6, %8, %10, %12, %14, %16, %18, %20, %22 in 1 : vector<256x4xf32>, vector<256x4xf32>, vector<256x4xf32>, vector<256x4xf32>, vector<256x4xf32>, vector<256x4xf32>, vector<256x4xf32>, vector<256x4xf32>, vector<256x4xf32> -> vector<256x36xf32>
    %c0_34 = arith.constant 0 : index
    %c0_35 = arith.constant 0 : index
    %24 = vector.load %arg2[%c0_34, %c0_35] : memref<36x8xf32, #tpu.memory_space<vmem>>, vector<36x8xf32>
    %cst_36 = arith.constant dense<0.000000e+00> : vector<256x8xf32>
    %25 = tpu.matmul %23, %24, %cst_36 {dimension_numbers = #tpu.dot_dimension_numbers<[1], [0], [0], [1], [0, 0, 1, 1], [], []>} : vector<256x36xf32>, vector<36x8xf32>, vector<256x8xf32> -> vector<256x8xf32>
    %cst_37 = arith.constant dense<0.000000e+00> : vector<8xf32>
    %26 = vector.multi_reduction <add>, %25, %cst_37 [0] : vector<256x8xf32> to vector<8xf32>
    %27 = vector.shape_cast %26 : vector<8xf32> to vector<1x8xf32>
    %cst_38 = arith.constant 2.560000e+02 : f32
    %28 = vector.broadcast %cst_38 : f32 to vector<1x8xf32>
    %29 = arith.divf %27, %28 : vector<1x8xf32>
    %30 = vector.broadcast %29 : vector<1x8xf32> to vector<256x8xf32>
    %31 = arith.subf %25, %30 : vector<256x8xf32>
    %32 = arith.mulf %31, %31 : vector<256x8xf32>
    %cst_39 = arith.constant dense<0.000000e+00> : vector<8xf32>
    %33 = vector.multi_reduction <add>, %32, %cst_39 [0] : vector<256x8xf32> to vector<8xf32>
    %34 = vector.shape_cast %33 : vector<8xf32> to vector<1x8xf32>
    %cst_40 = arith.constant 2.560000e+02 : f32
    %35 = vector.broadcast %cst_40 : f32 to vector<1x8xf32>
    %36 = arith.divf %34, %35 : vector<1x8xf32>
    %cst_41 = arith.constant 9.99999974E-6 : f32
    %37 = vector.broadcast %cst_41 : f32 to vector<1x8xf32>
    %38 = arith.addf %36, %37 : vector<1x8xf32>
    %39 = math.rsqrt %38 : vector<1x8xf32>
    %40 = vector.broadcast %39 : vector<1x8xf32> to vector<256x8xf32>
    %41 = arith.mulf %31, %40 : vector<256x8xf32>
    %cst_42 = arith.constant 0.000000e+00 : f32
    %42 = vector.broadcast %cst_42 : f32 to vector<256x8xf32>
    %43 = arith.maximumf %41, %42 : vector<256x8xf32>
    %cst_43 = arith.constant 0.000000e+00 : f32
    %44 = vector.broadcast %cst_43 : f32 to vector<18x18x8xf32>
    %c0_44 = arith.constant 0 : index
    %c0_45 = arith.constant 0 : index
    %c0_46 = arith.constant 0 : index
    %45 = vector.load %arg6[%c0_44, %c0_45, %c0_46] : memref<18x18x8xf32, #tpu.memory_space<vmem>>, vector<18x18x8xf32>
    tpu.vector_store %arg6[%c0_44, %c0_45, %c0_46], %44 {strides = array<i32>} : memref<18x18x8xf32, #tpu.memory_space<vmem>>, vector<18x18x8xf32>,
    %46 = vector.shape_cast %43 : vector<256x8xf32> to vector<16x16x8xf32>
    %c1_47 = arith.constant 1 : index
    %c1_48 = arith.constant 1 : index
    %c0_49 = arith.constant 0 : index
    %47 = vector.load %arg6[%c1_47, %c1_48, %c0_49] : memref<18x18x8xf32, #tpu.memory_space<vmem>>, vector<16x16x8xf32>
    tpu.vector_store %arg6[%c1_47, %c1_48, %c0_49], %46 {strides = array<i32>} : memref<18x18x8xf32, #tpu.memory_space<vmem>>, vector<16x16x8xf32>,
    %c0_50 = arith.constant 0 : index
    %c0_51 = arith.constant 0 : index
    %c0_52 = arith.constant 0 : index
    %48 = vector.load %arg6[%c0_50, %c0_51, %c0_52] : memref<18x18x8xf32, #tpu.memory_space<vmem>>, vector<16x16x8xf32>
    %49 = vector.shape_cast %48 : vector<16x16x8xf32> to vector<256x8xf32>
    %c0_53 = arith.constant 0 : index
    %c1_54 = arith.constant 1 : index
    %c0_55 = arith.constant 0 : index
    %50 = vector.load %arg6[%c0_53, %c1_54, %c0_55] : memref<18x18x8xf32, #tpu.memory_space<vmem>>, vector<16x16x8xf32>
    %51 = vector.shape_cast %50 : vector<16x16x8xf32> to vector<256x8xf32>
    %c0_56 = arith.constant 0 : index
    %c2_57 = arith.constant 2 : index
    %c0_58 = arith.constant 0 : index
    %52 = vector.load %arg6[%c0_56, %c2_57, %c0_58] : memref<18x18x8xf32, #tpu.memory_space<vmem>>, vector<16x16x8xf32>
    %53 = vector.shape_cast %52 : vector<16x16x8xf32> to vector<256x8xf32>
    %c1_59 = arith.constant 1 : index
    %c0_60 = arith.constant 0 : index
    %c0_61 = arith.constant 0 : index
    %54 = vector.load %arg6[%c1_59, %c0_60, %c0_61] : memref<18x18x8xf32, #tpu.memory_space<vmem>>, vector<16x16x8xf32>
    %55 = vector.shape_cast %54 : vector<16x16x8xf32> to vector<256x8xf32>
    %c1_62 = arith.constant 1 : index
    %c1_63 = arith.constant 1 : index
    %c0_64 = arith.constant 0 : index
    %56 = vector.load %arg6[%c1_62, %c1_63, %c0_64] : memref<18x18x8xf32, #tpu.memory_space<vmem>>, vector<16x16x8xf32>
    %57 = vector.shape_cast %56 : vector<16x16x8xf32> to vector<256x8xf32>
    %c1_65 = arith.constant 1 : index
    %c2_66 = arith.constant 2 : index
    %c0_67 = arith.constant 0 : index
    %58 = vector.load %arg6[%c1_65, %c2_66, %c0_67] : memref<18x18x8xf32, #tpu.memory_space<vmem>>, vector<16x16x8xf32>
    %59 = vector.shape_cast %58 : vector<16x16x8xf32> to vector<256x8xf32>
    %c2_68 = arith.constant 2 : index
    %c0_69 = arith.constant 0 : index
    %c0_70 = arith.constant 0 : index
    %60 = vector.load %arg6[%c2_68, %c0_69, %c0_70] : memref<18x18x8xf32, #tpu.memory_space<vmem>>, vector<16x16x8xf32>
    %61 = vector.shape_cast %60 : vector<16x16x8xf32> to vector<256x8xf32>
    %c2_71 = arith.constant 2 : index
    %c1_72 = arith.constant 1 : index
    %c0_73 = arith.constant 0 : index
    %62 = vector.load %arg6[%c2_71, %c1_72, %c0_73] : memref<18x18x8xf32, #tpu.memory_space<vmem>>, vector<16x16x8xf32>
    %63 = vector.shape_cast %62 : vector<16x16x8xf32> to vector<256x8xf32>
    %c2_74 = arith.constant 2 : index
    %c2_75 = arith.constant 2 : index
    %c0_76 = arith.constant 0 : index
    %64 = vector.load %arg6[%c2_74, %c2_75, %c0_76] : memref<18x18x8xf32, #tpu.memory_space<vmem>>, vector<16x16x8xf32>
    %65 = vector.shape_cast %64 : vector<16x16x8xf32> to vector<256x8xf32>
    %66 = tpu.concatenate %49, %51, %53, %55, %57, %59, %61, %63, %65 in 1 : vector<256x8xf32>, vector<256x8xf32>, vector<256x8xf32>, vector<256x8xf32>, vector<256x8xf32>, vector<256x8xf32>, vector<256x8xf32>, vector<256x8xf32>, vector<256x8xf32> -> vector<256x72xf32>
    %c0_77 = arith.constant 0 : index
    %c0_78 = arith.constant 0 : index
    %67 = vector.load %arg3[%c0_77, %c0_78] : memref<8x72xf32, #tpu.memory_space<vmem>>, vector<8x72xf32>
    %cst_79 = arith.constant dense<0.000000e+00> : vector<8x256xf32>
    %68 = tpu.matmul %67, %66, %cst_79 {dimension_numbers = #tpu.dot_dimension_numbers<[1], [1], [0], [0], [0, 0, 1, 0], [], []>} : vector<8x72xf32>, vector<256x72xf32>, vector<8x256xf32> -> vector<8x256xf32>
    %cst_80 = arith.constant dense<0.000000e+00> : vector<8xf32>
    %69 = vector.multi_reduction <add>, %68, %cst_80 [1] : vector<8x256xf32> to vector<8xf32>
    %70 = vector.shape_cast %69 : vector<8xf32> to vector<8x1xf32>
    %cst_81 = arith.constant 2.560000e+02 : f32
    %71 = vector.broadcast %cst_81 : f32 to vector<8x1xf32>
    %72 = arith.divf %70, %71 : vector<8x1xf32>
    %73 = vector.broadcast %72 : vector<8x1xf32> to vector<8x256xf32>
    %74 = arith.subf %68, %73 : vector<8x256xf32>
    %75 = arith.mulf %74, %74 : vector<8x256xf32>
    %cst_82 = arith.constant dense<0.000000e+00> : vector<8xf32>
    %76 = vector.multi_reduction <add>, %75, %cst_82 [1] : vector<8x256xf32> to vector<8xf32>
    %77 = vector.shape_cast %76 : vector<8xf32> to vector<8x1xf32>
    %cst_83 = arith.constant 2.560000e+02 : f32
    %78 = vector.broadcast %cst_83 : f32 to vector<8x1xf32>
    %79 = arith.divf %77, %78 : vector<8x1xf32>
    %cst_84 = arith.constant 9.99999974E-6 : f32
    %80 = vector.broadcast %cst_84 : f32 to vector<8x1xf32>
    %81 = arith.addf %79, %80 : vector<8x1xf32>
    %82 = math.rsqrt %81 : vector<8x1xf32>
    %83 = vector.broadcast %82 : vector<8x1xf32> to vector<8x256xf32>
    %84 = arith.mulf %74, %83 : vector<8x256xf32>
    %cst_85 = arith.constant 0.000000e+00 : f32
    %85 = vector.broadcast %cst_85 : f32 to vector<8x256xf32>
    %86 = arith.maximumf %84, %85 : vector<8x256xf32>
    %87 = vector.shape_cast %86 : vector<8x256xf32> to vector<1x8x256xf32>
    %c0_86 = arith.constant 0 : index
    %c0_87 = arith.constant 0 : index
    %c0_88 = arith.constant 0 : index
    %88 = vector.load %arg4[%c0_86, %c0_87, %c0_88] : memref<1x8x256xf32, #tpu.memory_space<vmem>>, vector<1x8x256xf32>
    tpu.vector_store %arg4[%c0_86, %c0_87, %c0_88], %87 {strides = array<i32>} : memref<1x8x256xf32, #tpu.memory_space<vmem>>, vector<1x8x256xf32>,
    return
  }
  func.func @transform_0(%arg0: i32) -> (i32, i32, i32, i32) {
    %c0_i32 = arith.constant 0 : i32
    %c0_i32_0 = arith.constant 0 : i32
    %c0_i32_1 = arith.constant 0 : i32
    %c0_i32_2 = arith.constant 0 : i32
    return %arg0, %c0_i32, %c0_i32_0, %c0_i32_1 : i32, i32, i32, i32
  }
  func.func @transform_1(%arg0: i32) -> (i32, i32) {
    %c0_i32 = arith.constant 0 : i32
    %c0_i32_0 = arith.constant 0 : i32
    %c0_i32_1 = arith.constant 0 : i32
    return %c0_i32, %c0_i32_0 : i32, i32
  }
  func.func @transform_2(%arg0: i32) -> (i32, i32) {
    %c0_i32 = arith.constant 0 : i32
    %c0_i32_0 = arith.constant 0 : i32
    %c0_i32_1 = arith.constant 0 : i32
    return %c0_i32, %c0_i32_0 : i32, i32
  }
  func.func @transform_3(%arg0: i32) -> (i32, i32, i32) {
    %c0_i32 = arith.constant 0 : i32
    %c0_i32_0 = arith.constant 0 : i32
    %c0_i32_1 = arith.constant 0 : i32
    return %arg0, %c0_i32, %c0_i32_0 : i32, i32, i32
  }
}

</mosaic_0001>

<bundles_post_ra>
// kernel: conv_block2_forward.1
= control target key start
LH: loop header
LB: loop body
LE: loop exit
PB: predicated region body
PF: predicated region fallthrough
CT: control target
= control target key end

     0   :  { %s4457_s12 = smov 0   ;;  %s8164_s0 = inlined_call_operand.vmem [shape: f32[2,16,16,4], index: 0, kind: input, shape index: {}]   ;;  %s8165_s1 = inlined_call_operand.vmem [shape: f32[36,8], index: 1, kind: input, shape index: {}]   ;;  %s8166_s2 = inlined_call_operand.vmem [shape: f32[8,72], index: 2, kind: input, shape index: {}]   ;;  %s8167_s3 = inlined_call_operand.vmem [shape: f32[2,8,256], index: 3, kind: output, shape index: {}]  }
   0x1 LB: > { %s4259_s13 = sadd.s32 4294967295, %s4421_s12   ;;  %p4263_p0 = scmp.ge.s32.totalorder %s4421_s12, 1  ;;  %s4421_s12 = sphi %s4457_s12, %s13_s12  }
   0x2   : > { %p137_p1 = scmp.lt.s32.totalorder %s4421_s12, 3 }
   0x4   : > { %p138_p2 = pnand %p4263_p0, %p137_p1 }
   0x6   : > { %141 = sbr.rel (%p138_p2) target bundleno = 2364 (0x93c), region = 32 }
   0xb   : > { %vm171_vm0 = vcmask 31744   ;;  %v8168_v0 = vmov 0.0   ;;  %s4424_s14 = smov 4   ;;  %p161_p3 = scmp.lt.s32.totalorder %s4259_s13, 1  ;;  %vm174_vm1 = vcmask 25600   ;;  %vm1637_vm2 = vcmask 64512  }
   0xc   : > { %172 = vst.msk [vmem:[#allocation2] sm:$0xff] %vm171_vm0, %v8168_v0  ;;  %s4425_s19 = smov 8   ;;  %s4426_s20 = smov 12   ;;  %vm1970_vm3 = vcmask 1043456   ;;  %vm1670_vm4 = vcmask 97280   ;;  %vm1736_vm5 = vcmask 162816  }
   0xd   : > { %173 = vst.msk [vmem:[#allocation2 + $0x8] sm:$0xff] %vm171_vm0, %v8168_v0  ;;  %s8779_s13 = smov (!%p161_p3, %s4259_s13), 1  ;;  %s4427_s21 = smov 16   ;;  %vm1703_vm6 = vcmask 130048   ;;  %vm1769_vm7 = vcmask 195584   ;;  %vm1835_vm8 = vcmask 261120  }
   0xe   : > { %176 = vst.msk [vmem:[#allocation2 + $0x18] sm:$0xff] %vm171_vm0, %v8168_v0  ;;  %s4337_s15 = sshll.u32 %s8779_s13, 8  ;;  %s4428_s22 = smov 20   ;;  %vm1802_vm9 = vcmask 228352   ;;  %vm1873_vm10 = vcmask 293888   ;;  %vm2375_vm11 = vcmask 58368  }
   0xf   : > { %177 = vst.msk [vmem:[#allocation2 + $0x20] sm:$0xff] %vm171_vm0, %v8168_v0  ;;  %s4538_s18 = scalar_lea.vmem %s8164_s0, %s4337_s15  ;;  %s4429_s23 = smov 24  }
  0x10   : > { %179 = vst.msk [vmem:[#allocation2 + $0x30] sm:$0xff] %vm171_vm0, %v8168_v0  ;;  %v229_v2 = vld [vmem:[%s4538_s18 + $0x10] sm:$0xff]  ;;  %v227_v3 = vld [vmem:[%s4538_s18] sm:$0xff]  ;;  %v230_v7 = vld [vmem:[%s4538_s18 + $0x18] sm:$0xff]  ;;  %s4430_s24 = smov 28   ;;  %s4431_s25 = smov 32  }
  0x11   : > { %180 = vst.msk [vmem:[#allocation2 + $0x38] sm:$0xff] %vm171_vm0, %v8168_v0  ;;  %v228_v8 = vld [vmem:[%s4538_s18 + $0x8] sm:$0xff]  ;;  %v231_v9 = vld [vmem:[%s4538_s18 + $0x20] sm:$0xff]  ;;  %v233_v10 = vld [vmem:[%s4538_s18 + $0x30] sm:$0xff]  ;;  %s4433_s9 = smov 40   ;;  %s4434_s10 = smov 48  }
  0x12   : > { %182 = vst.msk [vmem:[#allocation2 + $0x48] sm:$0xff] %vm171_vm0, %v8168_v0  ;;  %v232_v11 = vld [vmem:[%s4538_s18 + $0x28] sm:$0xff]  ;;  %v234_v12 = vld [vmem:[%s4538_s18 + $0x38] sm:$0xff]  ;;  %v235_v14 = vld [vmem:[%s4538_s18 + $0x40] sm:$0xff]  ;;  %s4435_s11 = smov 56   ;;  %s4338_s17 = sshll.u32 %s8779_s13, 4 }
  0x13   : > { %183 = vst.msk [vmem:[#allocation2 + $0x50] sm:$0xff] %vm171_vm0, %v8168_v0  ;;  %v236_v13 = vld [vmem:[%s4538_s18 + $0x48] sm:$0xff]  ;;  %v237_v15 = vld [vmem:[%s4538_s18 + $0x50] sm:$0xff]  ;;  %v239_v16 = vld [vmem:[%s4538_s18 + $0x60] sm:$0xff] }
  0x14   : > { %v324_v1 = vld [vmem:[#allocation2 + $0x1] sm:$0xff]  ;;  %185 = vst.msk [vmem:[#allocation2 + $0x60] sm:$0xff] %vm171_vm0, %v8168_v0  ;;  %v238_v18 = vld [vmem:[%s4538_s18 + $0x58] sm:$0xff]  ;;  %v241_v23 = vld [vmem:[%s4538_s18 + $0x70] sm:$0xff] }
  0x15   : > { %613 = vrot.lane.b32.xlu0 %v324_v1, %s4424_s14  ;;  %186 = vst.msk [vmem:[#allocation2 + $0x68] sm:$0xff] %vm171_vm0, %v8168_v0  ;;  %v240_v20 = vld [vmem:[%s4538_s18 + $0x68] sm:$0xff]  ;;  %v242_v22 = vld [vmem:[%s4538_s18 + $0x78] sm:$0xff]  ;;  %v243_v24 = vld [vmem:[%s4538_s18 + $0x80] sm:$0xff] }
  0x16   : > { %188 = vst.msk [vmem:[#allocation2 + $0x78] sm:$0xff] %vm171_vm0, %v8168_v0  ;;  %v245_v25 = vld [vmem:[%s4538_s18 + $0x90] sm:$0xff]  ;;  %v244_v27 = vld [vmem:[%s4538_s18 + $0x88] sm:$0xff]  ;;  %v246_v29 = vld [vmem:[%s4538_s18 + $0x98] sm:$0xff] }
  0x17   : > { %189 = vst.msk [vmem:[#allocation2 + $0x80] sm:$0xff] %vm171_vm0, %v8168_v0  ;;  %v248_v31 = vld [vmem:[%s4538_s18 + $0xa8] sm:$0xff]  ;;  %v247_v32 = vld [vmem:[%s4538_s18 + $0xa0] sm:$0xff]  ;;  %v249_v33 = vld [vmem:[%s4538_s18 + $0xb0] sm:$0xff] }
  0x18   : > { %191 = vst.msk [vmem:[#allocation2 + $0x90] sm:$0xff] %vm171_vm0, %v8168_v0  ;;  %v251_v37 = vld [vmem:[%s4538_s18 + $0xc0] sm:$0xff]  ;;  %v250_v38 = vld [vmem:[%s4538_s18 + $0xb8] sm:$0xff]  ;;  %v252_v39 = vld [vmem:[%s4538_s18 + $0xc8] sm:$0xff] }
  0x19   : > { %192 = vst.msk [vmem:[#allocation2 + $0x98] sm:$0xff] %vm171_vm0, %v8168_v0  ;;  %v254_v43 = vld [vmem:[%s4538_s18 + $0xd8] sm:$0xff]  ;;  %v253_v44 = vld [vmem:[%s4538_s18 + $0xd0] sm:$0xff]  ;;  %v255_v45 = vld [vmem:[%s4538_s18 + $0xe0] sm:$0xff] }
  0x1a   : > { %194 = vst.msk [vmem:[#allocation2 + $0xa8] sm:$0xff] %vm171_vm0, %v8168_v0  ;;  %v256_v49 = vld [vmem:[%s4538_s18 + $0xe8] sm:$0xff] }
  0x1b   : > { %195 = vst.msk [vmem:[#allocation2 + $0xb0] sm:$0xff] %vm171_vm0, %v8168_v0  ;;  %v356_v62 = vld [vmem:[#allocation2 + $0x2] sm:$0xff] }
  0x1c   : > { %197 = vst.msk [vmem:[#allocation2 + $0xc0] sm:$0xff] %vm171_vm0, %v8168_v0 }
  0x1d   : > { %198 = vst.msk [vmem:[#allocation2 + $0xc8] sm:$0xff] %vm171_vm0, %v8168_v0 }
  0x1e   : > { %200 = vst.msk [vmem:[#allocation2 + $0xd8] sm:$0xff] %vm171_vm0, %v8168_v0 }
  0x1f   : > { %201 = vst.msk [vmem:[#allocation2 + $0xe0] sm:$0xff] %vm171_vm0, %v8168_v0 }
  0x20   : > { %203 = vst.msk [vmem:[#allocation2 + $0xf0] sm:$0xff] %vm171_vm0, %v8168_v0 }
  0x21   : > { %204 = vst.msk [vmem:[#allocation2 + $0xf8] sm:$0xff] %vm171_vm0, %v8168_v0 }
  0x22   : > { %206 = vst.msk [vmem:[#allocation2 + $0x108] sm:$0xff] %vm171_vm0, %v8168_v0 }
  0x23   : > { %207 = vst.msk [vmem:[#allocation2 + $0x110] sm:$0xff] %vm171_vm0, %v8168_v0 }
  0x24   : > { %209 = vst.msk [vmem:[#allocation2 + $0x120] sm:$0xff] %vm171_vm0, %v8168_v0 }
  0x25   : > { %210 = vst.msk [vmem:[#allocation2 + $0x128] sm:$0xff] %vm171_vm0, %v8168_v0 }
  0x26   : > { %212 = vst.msk [vmem:[#allocation2 + $0x138] sm:$0xff] %vm171_vm0, %v8168_v0 }
  0x27   : > { %213 = vst.msk [vmem:[#allocation2 + $0x140] sm:$0xff] %vm171_vm0, %v8168_v0 }
  0x28   : > { %215 = vst.msk [vmem:[#allocation2 + $0x150] sm:$0xff] %vm171_vm0, %v8168_v0 }
  0x29   : > { %216 = vst.msk [vmem:[#allocation2 + $0x158] sm:$0xff] %vm171_vm0, %v8168_v0 }
  0x2a   : > { %218 = vst.msk [vmem:[#allocation2 + $0x168] sm:$0xff] %vm171_vm0, %v8168_v0 }
  0x2b   : > { %219 = vst.msk [vmem:[#allocation2 + $0x170] sm:$0xff] %vm171_vm0, %v8168_v0 }
  0x2c   : > { %221 = vst.msk [vmem:[#allocation2 + $0x180] sm:$0xff] %vm171_vm0, %v8168_v0 }
  0x2d   : > { %222 = vst.msk [vmem:[#allocation2 + $0x188] sm:$0xff] %vm171_vm0, %v8168_v0 }
  0x2e   : > { %224 = vst.msk [vmem:[#allocation2 + $0x198] sm:$0xff] %vm171_vm0, %v8168_v0 }
  0x2f   : > { %225 = vst.msk [vmem:[#allocation2 + $0x1a0] sm:$0xff] %vm171_vm0, %v8168_v0 }
  0x30   : > { %262 = vst.msk [vmem:[#allocation2 + $0x31] sm:$0xff] %vm171_vm0, %v229_v2 }
  0x31   : > { %260 = vst.msk [vmem:[#allocation2 + $0x19] sm:$0xff] %vm171_vm0, %v227_v3 }
  0x32   : > { %175 = vst.msk [vmem:[#allocation2 + $0x10] sm:$0x3] %vm174_vm1, %v8168_v0 }
  0x33   : > { %178 = vst.msk [vmem:[#allocation2 + $0x28] sm:$0x3] %vm174_vm1, %v8168_v0 }
  0x34   : > { %181 = vst.msk [vmem:[#allocation2 + $0x40] sm:$0x3] %vm174_vm1, %v8168_v0 }
  0x35   : > { %184 = vst.msk [vmem:[#allocation2 + $0x58] sm:$0x3] %vm174_vm1, %v8168_v0 }
  0x36   : > { %187 = vst.msk [vmem:[#allocation2 + $0x70] sm:$0x3] %vm174_vm1, %v8168_v0 }
  0x37   : > { %v4564_v4 = vld [vmem:[#allocation2 + $0x31] sm:$0xff]  ;;  %190 = vst.msk [vmem:[#allocation2 + $0x88] sm:$0x3] %vm174_vm1, %v8168_v0 }
  0x38   : > { %621 = vrot.lane.b32.xlu2 %v4564_v4, %s4424_s14  ;;  %v4570_v5 = vld [vmem:[#allocation2 + $0x19] sm:$0xff]  ;;  %193 = vst.msk [vmem:[#allocation2 + $0xa0] sm:$0x3] %vm174_vm1, %v8168_v0 }
  0x39   : > { %617 = vrot.lane.b32.xlu1 %v4570_v5, %s4424_s14  ;;  %v325_v6 = vld [vmem:[#allocation2 + $0x9] sm:$0xff]  ;;  %196 = vst.msk [vmem:[#allocation2 + $0xb8] sm:$0x3] %vm174_vm1, %v8168_v0 }
  0x3a   : > { %615 = vrot.lane.b32.xlu0 %v325_v6, %s4424_s14  ;;  %199 = vst.msk [vmem:[#allocation2 + $0xd0] sm:$0x3] %vm174_vm1, %v8168_v0  ;;  %v357_v1 = vld [vmem:[#allocation2 + $0xa] sm:$0xff] }
  0x3b   : > { %202 = vst.msk [vmem:[#allocation2 + $0xe8] sm:$0x3] %vm174_vm1, %v8168_v0 }
  0x3c   : > { %205 = vst.msk [vmem:[#allocation2 + $0x100] sm:$0x3] %vm174_vm1, %v8168_v0 }
  0x3d   : > { %208 = vst.msk [vmem:[#allocation2 + $0x118] sm:$0x3] %vm174_vm1, %v8168_v0 }
  0x3e   : > { %211 = vst.msk [vmem:[#allocation2 + $0x130] sm:$0x3] %vm174_vm1, %v8168_v0 }
  0x3f   : > { %214 = vst.msk [vmem:[#allocation2 + $0x148] sm:$0x3] %vm174_vm1, %v8168_v0 }
  0x40   : > { %217 = vst.msk [vmem:[#allocation2 + $0x160] sm:$0x3] %vm174_vm1, %v8168_v0 }
  0x41   : > { %220 = vst.msk [vmem:[#allocation2 + $0x178] sm:$0x3] %vm174_vm1, %v8168_v0 }
  0x42   : > { %223 = vst.msk [vmem:[#allocation2 + $0x190] sm:$0x3] %vm174_vm1, %v8168_v0 }
  0x43   : > { %226 = vst.msk [vmem:[#allocation2 + $0x1a8] sm:$0x3] %vm174_vm1, %v8168_v0  ;;  %vm3935_vm1 = vcmask 392192  }
  0x44   : > { %263 = vst.msk [vmem:[#allocation2 + $0x39] sm:$0xff] %vm171_vm0, %v230_v7 }
  0x45   : > { %261 = vst.msk [vmem:[#allocation2 + $0x21] sm:$0xff] %vm171_vm0, %v228_v8 }
  0x46   : > { %264 = vst.msk [vmem:[#allocation2 + $0x49] sm:$0xff] %vm171_vm0, %v231_v9 }
  0x47   : > { %266 = vst.msk [vmem:[#allocation2 + $0x61] sm:$0xff] %vm171_vm0, %v233_v10 }
  0x48   : > { %265 = vst.msk [vmem:[#allocation2 + $0x51] sm:$0xff] %vm171_vm0, %v232_v11 }
  0x49   : > { %267 = vst.msk [vmem:[#allocation2 + $0x69] sm:$0xff] %vm171_vm0, %v234_v12 }
  0x4a   : > { %269 = vst.msk [vmem:[#allocation2 + $0x81] sm:$0xff] %vm171_vm0, %v236_v13 }
  0x4b   : > { %v4616_v17 = vld [vmem:[#allocation2 + $0x39] sm:$0xff]  ;;  %268 = vst.msk [vmem:[#allocation2 + $0x79] sm:$0xff] %vm171_vm0, %v235_v14 }
  0x4c   : > { %623 = vrot.lane.b32.xlu2 %v4616_v17, %s4424_s14  ;;  %v4622_v19 = vld [vmem:[#allocation2 + $0x21] sm:$0xff]  ;;  %270 = vst.msk [vmem:[#allocation2 + $0x91] sm:$0xff] %vm171_vm0, %v237_v15  ;;  %v4773_v6 = vld [vmem:[#allocation2 + $0x32] sm:$0xff] }
  0x4d   : > { %619 = vrot.lane.b32.xlu1 %v4622_v19, %s4424_s14  ;;  %v4628_v21 = vld [vmem:[#allocation2 + $0x49] sm:$0xff]  ;;  %272 = vst.msk [vmem:[#allocation2 + $0xa9] sm:$0xff] %vm171_vm0, %v239_v16  ;;  %v4771_v3 = vld [vmem:[#allocation2 + $0x1a] sm:$0xff] }
  0x4e   : > { %625 = vrot.lane.b32.xlu0 %v4628_v21, %s4424_s14  ;;  %271 = vst.msk [vmem:[#allocation2 + $0x99] sm:$0xff] %vm171_vm0, %v238_v18  ;;  %v4640_v26 = vld [vmem:[#allocation2 + $0x61] sm:$0xff] }
  0x4f   : > { %273 = vst.msk [vmem:[#allocation2 + $0xb1] sm:$0xff] %vm171_vm0, %v240_v20  ;;  %v4644_v28 = vld [vmem:[#allocation2 + $0x51] sm:$0xff]  ;;  %v4769_v2 = vld [vmem:[#allocation2 + $0x22] sm:$0xff]  ;;  %v4785_v9 = vld [vmem:[#allocation2 + $0x3a] sm:$0xff] }
  0x50   : > { %275 = vst.msk [vmem:[#allocation2 + $0xc9] sm:$0xff] %vm171_vm0, %v242_v22  ;;  %v4648_v30 = vld [vmem:[#allocation2 + $0x69] sm:$0xff]  ;;  %v4787_v10 = vld [vmem:[#allocation2 + $0x52] sm:$0xff] }
  0x51   : > { %274 = vst.msk [vmem:[#allocation2 + $0xc1] sm:$0xff] %vm171_vm0, %v241_v23  ;;  %v4665_v34 = vld [vmem:[#allocation2 + $0x81] sm:$0xff]  ;;  %v4783_v8 = vld [vmem:[#allocation2 + $0x4a] sm:$0xff] }
  0x52   : > { %276 = vst.msk [vmem:[#allocation2 + $0xd9] sm:$0xff] %vm171_vm0, %v243_v24  ;;  %v4667_v35 = vld [vmem:[#allocation2 + $0x79] sm:$0xff]  ;;  %v4797_v12 = vld [vmem:[#allocation2 + $0x6a] sm:$0xff]  ;;  %v4799_v13 = vld [vmem:[#allocation2 + $0x62] sm:$0xff] }
  0x53   : > { %278 = vst.msk [vmem:[#allocation2 + $0xf1] sm:$0xff] %vm171_vm0, %v245_v25  ;;  %v4669_v36 = vld [vmem:[#allocation2 + $0x91] sm:$0xff]  ;;  %v4801_v14 = vld [vmem:[#allocation2 + $0x7a] sm:$0xff]  ;;  %v4815_v20 = vld [vmem:[#allocation2 + $0x82] sm:$0xff] }
  0x54   : > { %629 = vrot.lane.b32.xlu2 %v4640_v26, %s4424_s14  ;;  %277 = vst.msk [vmem:[#allocation2 + $0xe1] sm:$0xff] %vm171_vm0, %v244_v27  ;;  %v4683_v40 = vld [vmem:[#allocation2 + $0xa9] sm:$0xff] }
  0x55   : > { %627 = vrot.lane.b32.xlu1 %v4644_v28, %s4424_s14  ;;  %279 = vst.msk [vmem:[#allocation2 + $0xf9] sm:$0xff] %vm171_vm0, %v246_v29  ;;  %v4685_v41 = vld [vmem:[#allocation2 + $0x99] sm:$0xff] }
  0x56   : > { %631 = vrot.lane.b32.xlu0 %v4648_v30, %s4424_s14  ;;  %281 = vst.msk [vmem:[#allocation2 + $0x111] sm:$0xff] %vm171_vm0, %v248_v31  ;;  %v4687_v42 = vld [vmem:[#allocation2 + $0xb1] sm:$0xff]  ;;  %v4817_v22 = vld [vmem:[#allocation2 + $0x9a] sm:$0xff] }
  0x57   : > { %280 = vst.msk [vmem:[#allocation2 + $0x109] sm:$0xff] %vm171_vm0, %v247_v32  ;;  %v4701_v46 = vld [vmem:[#allocation2 + $0xc9] sm:$0xff]  ;;  %v4813_v18 = vld [vmem:[#allocation2 + $0x92] sm:$0xff] }
  0x58   : > { %282 = vst.msk [vmem:[#allocation2 + $0x121] sm:$0xff] %vm171_vm0, %v249_v33  ;;  %v4703_v47 = vld [vmem:[#allocation2 + $0xc1] sm:$0xff]  ;;  %v4831_v27 = vld [vmem:[#allocation2 + $0xb2] sm:$0xff]  ;;  %v4833_v29 = vld [vmem:[#allocation2 + $0xaa] sm:$0xff] }
  0x59   : > { %284 = vst.msk [vmem:[#allocation2 + $0x139] sm:$0xff] %vm171_vm0, %v251_v37  ;;  %v4705_v48 = vld [vmem:[#allocation2 + $0xd9] sm:$0xff]  ;;  %v4835_v31 = vld [vmem:[#allocation2 + $0xc2] sm:$0xff] }
  0x5a   : > { %283 = vst.msk [vmem:[#allocation2 + $0x129] sm:$0xff] %vm171_vm0, %v250_v38  ;;  %v4715_v50 = vld [vmem:[#allocation2 + $0xf1] sm:$0xff] }
  0x5b   : > { %285 = vst.msk [vmem:[#allocation2 + $0x141] sm:$0xff] %vm171_vm0, %v252_v39  ;;  %v4717_v51 = vld [vmem:[#allocation2 + $0xe1] sm:$0xff]  ;;  %v4851_v39 = vld [vmem:[#allocation2 + $0xca] sm:$0xff] }
  0x5c   : > { %635 = vrot.lane.b32.xlu2 %v4665_v34, %s4424_s14  ;;  %287 = vst.msk [vmem:[#allocation2 + $0x159] sm:$0xff] %vm171_vm0, %v254_v43  ;;  %v4719_v52 = vld [vmem:[#allocation2 + $0xf9] sm:$0xff]  ;;  %v4853_v43 = vld [vmem:[#allocation2 + $0xe2] sm:$0xff] }
  0x5d   : > { %633 = vrot.lane.b32.xlu1 %v4667_v35, %s4424_s14  ;;  %286 = vst.msk [vmem:[#allocation2 + $0x151] sm:$0xff] %vm171_vm0, %v253_v44  ;;  %v4727_v53 = vld [vmem:[#allocation2 + $0x111] sm:$0xff]  ;;  %v4849_v38 = vld [vmem:[#allocation2 + $0xda] sm:$0xff] }
  0x5e   : > { %637 = vrot.lane.b32.xlu0 %v4669_v36, %s4424_s14  ;;  %288 = vst.msk [vmem:[#allocation2 + $0x169] sm:$0xff] %vm171_vm0, %v255_v45  ;;  %v4729_v54 = vld [vmem:[#allocation2 + $0x109] sm:$0xff] }
  0x5f   : > { %289 = vst.msk [vmem:[#allocation2 + $0x171] sm:$0xff] %vm171_vm0, %v256_v49  ;;  %v4731_v55 = vld [vmem:[#allocation2 + $0x121] sm:$0xff]  ;;  %v4871_v0 = vld [vmem:[#allocation2 + $0x10a] sm:$0xff] }
  0x60   : > { %v4739_v56 = vld [vmem:[#allocation2 + $0x139] sm:$0xff] }
  0x61   : > { %v4741_v57 = vld [vmem:[#allocation2 + $0x129] sm:$0xff] }
  0x62   : > { %v4743_v58 = vld [vmem:[#allocation2 + $0x141] sm:$0xff] }
  0x63   : > { %v4751_v59 = vld [vmem:[#allocation2 + $0x159] sm:$0xff] }
  0x64   : > { %641 = vrot.lane.b32.xlu2 %v4683_v40, %s4424_s14  ;;  %v4753_v60 = vld [vmem:[#allocation2 + $0x151] sm:$0xff] }
  0x65   : > { %639 = vrot.lane.b32.xlu1 %v4685_v41, %s4424_s14  ;;  %v4755_v61 = vld [vmem:[#allocation2 + $0x169] sm:$0xff] }
  0x66   : > { %643 = vrot.lane.b32.xlu0 %v4687_v42, %s4424_s14  ;;  %v4763_v63 = vld [vmem:[#allocation2 + $0x171] sm:$0xff] }
  0x6c   : > { %647 = vrot.lane.b32.xlu2 %v4701_v46, %s4424_s14 }
  0x6d   : > { %645 = vrot.lane.b32.xlu1 %v4703_v47, %s4424_s14 }
  0x6e   : > { %649 = vrot.lane.b32.xlu0 %v4705_v48, %s4424_s14 }
  0x74   : > { %653 = vrot.lane.b32.xlu2 %v4715_v50, %s4424_s14 }
  0x75   : > { %651 = vrot.lane.b32.xlu1 %v4717_v51, %s4424_s14 }
  0x76   : > { %655 = vrot.lane.b32.xlu0 %v4719_v52, %s4424_s14 }
  0x7c   : > { %659 = vrot.lane.b32.xlu2 %v4727_v53, %s4424_s14 }
  0x7d   : > { %657 = vrot.lane.b32.xlu1 %v4729_v54, %s4424_s14 }
  0x7e   : > { %661 = vrot.lane.b32.xlu0 %v4731_v55, %s4424_s14 }
  0x84   : > { %665 = vrot.lane.b32.xlu2 %v4739_v56, %s4424_s14 }
  0x85   : > { %663 = vrot.lane.b32.xlu1 %v4741_v57, %s4424_s14 }
  0x86   : > { %667 = vrot.lane.b32.xlu0 %v4743_v58, %s4424_s14 }
  0x87   : > { %v4805_v15 = vpop.permute.xlu0 %613 }
  0x88   : > { %8218 = vst [vmem:[#allocation6_spill] sm:$0xff] %v4805_v15 }
  0x8c   : > { %671 = vrot.lane.b32.xlu2 %v4751_v59, %s4424_s14 }
  0x8d   : > { %669 = vrot.lane.b32.xlu1 %v4753_v60, %s4424_s14 }
  0x8e   : > { %673 = vrot.lane.b32.xlu0 %v4755_v61, %s4424_s14 }
  0x92   : > { %v4777_v7 = vpop.permute.xlu2 %621 }
  0x93   : > { %8216 = vst [vmem:[#allocation4_spill] sm:$0xff] %v4777_v7  ;;  %v4923_v7 = vld [vmem:[#allocation2 + $0x142] sm:$0xff] }
  0x94   : > { %741 = vrot.lane.b32.xlu2 %v356_v62, %s4425_s19  ;;  %v4867_v62 = vld [vmem:[#allocation2 + $0xfa] sm:$0xff]  ;;  %8237 = vst [vmem:[#allocation24_spill] sm:$0xff] %v4923_v7 }
  0x95   : > { %675 = vrot.lane.b32.xlu1 %v4763_v63, %s4424_s14  ;;  %s4436_s14 = smov 64  }
  0x96   : > { %743 = vrot.lane.b32.xlu0 %v357_v1, %s4425_s19  ;;  %v4869_v1 = vld [vmem:[#allocation2 + $0xf2] sm:$0xff] }
  0x9c   : > { %747 = vrot.lane.b32.xlu2 %v4769_v2, %s4425_s19 }
  0x9d   : > { %745 = vrot.lane.b32.xlu1 %v4771_v3, %s4425_s19 }
  0x9e   : > { %749 = vrot.lane.b32.xlu0 %v4773_v6, %s4425_s19 }
  0xa4   : > { %753 = vrot.lane.b32.xlu2 %v4783_v8, %s4425_s19 }
  0xa5   : > { %751 = vrot.lane.b32.xlu1 %v4785_v9, %s4425_s19 }
  0xa6   : > { %755 = vrot.lane.b32.xlu0 %v4787_v10, %s4425_s19  ;;  %v4795_v11 = vpop.permute.xlu2 %623 }
  0xa7   : > { %8217 = vst [vmem:[#allocation5_spill] sm:$0xff] %v4795_v11 }
  0xab   : > { %v4823_v23 = vpop.permute.xlu1 %617 }
  0xac   : > { %759 = vrot.lane.b32.xlu2 %v4797_v12, %s4425_s19  ;;  %8220 = vst [vmem:[#allocation8_spill] sm:$0xff] %v4823_v23  ;;  %v4829_v25 = vpop.permute.xlu0 %615 }
  0xad   : > { %757 = vrot.lane.b32.xlu1 %v4799_v13, %s4425_s19  ;;  %8222 = vst [vmem:[#allocation10_spill] sm:$0xff] %v4829_v25  ;;  %v4961_v25 = vld [vmem:[#allocation2 + $0x15a] sm:$0xff] }
  0xae   : > { %761 = vrot.lane.b32.xlu0 %v4801_v14, %s4425_s19  ;;  %v4811_v16 = vpop.permute.xlu2 %629  ;;  %8243 = vst [vmem:[#allocation30_spill] sm:$0xff] %v4961_v25 }
  0xaf   : > { %8219 = vst [vmem:[#allocation7_spill] sm:$0xff] %v4811_v16 }
  0xb4   : > { %765 = vrot.lane.b32.xlu2 %v4813_v18, %s4425_s19 }
  0xb5   : > { %763 = vrot.lane.b32.xlu1 %v4815_v20, %s4425_s19 }
  0xb6   : > { %767 = vrot.lane.b32.xlu0 %v4817_v22, %s4425_s19  ;;  %v4827_v24 = vpop.permute.xlu2 %635 }
  0xb7   : > { %8221 = vst [vmem:[#allocation9_spill] sm:$0xff] %v4827_v24 }
  0xbc   : > { %771 = vrot.lane.b32.xlu2 %v4831_v27, %s4425_s19 }
  0xbd   : > { %769 = vrot.lane.b32.xlu1 %v4833_v29, %s4425_s19 }
  0xbe   : > { %773 = vrot.lane.b32.xlu0 %v4835_v31, %s4425_s19  ;;  %v4843_v32 = vpop.permute.xlu2 %641 }
  0xbf   : > { %8223 = vst [vmem:[#allocation11_spill] sm:$0xff] %v4843_v32  ;;  %v4845_v33 = vpop.permute.xlu1 %619 }
  0xc0   : > { %8224 = vst [vmem:[#allocation12_spill] sm:$0xff] %v4845_v33  ;;  %v4847_v37 = vpop.permute.xlu0 %625  ;;  %v4927_v33 = vld [vmem:[#allocation2 + $0x13a] sm:$0xff] }
  0xc1   : > { %8225 = vst [vmem:[#allocation13_spill] sm:$0xff] %v4847_v37  ;;  %v4893_v37 = vld [vmem:[#allocation2 + $0x112] sm:$0xff] }
  0xc4   : > { %777 = vrot.lane.b32.xlu2 %v4849_v38, %s4425_s19 }
  0xc5   : > { %775 = vrot.lane.b32.xlu1 %v4851_v39, %s4425_s19 }
  0xc6   : > { %779 = vrot.lane.b32.xlu0 %v4853_v43, %s4425_s19  ;;  %v4861_v44 = vpop.permute.xlu2 %647 }
  0xc7   : > { %8226 = vst [vmem:[#allocation14_spill] sm:$0xff] %v4861_v44  ;;  %v4863_v45 = vpop.permute.xlu1 %627 }
  0xc8   : > { %8227 = vst [vmem:[#allocation15_spill] sm:$0xff] %v4863_v45  ;;  %v4865_v49 = vpop.permute.xlu0 %631  ;;  %v4889_v45 = vld [vmem:[#allocation2 + $0x122] sm:$0xff] }
  0xc9   : > { %8228 = vst [vmem:[#allocation16_spill] sm:$0xff] %v4865_v49  ;;  %v8231_v49 = vmov 0.0  }
  0xca   : > { %2373 = vst.msk [vmem:[#allocation3] sm:$0xff] %vm1637_vm2, %v8231_v49 }
  0xcb   : > { %2374 = vst.msk [vmem:[#allocation3 + $0x8] sm:$0xff] %vm1637_vm2, %v8231_v49 }
  0xcc   : > { %783 = vrot.lane.b32.xlu2 %v4867_v62, %s4425_s19  ;;  %2377 = vst.msk [vmem:[#allocation3 + $0x18] sm:$0xff] %vm1637_vm2, %v8231_v49 }
  0xcd   : > { %781 = vrot.lane.b32.xlu1 %v4869_v1, %s4425_s19  ;;  %2378 = vst.msk [vmem:[#allocation3 + $0x20] sm:$0xff] %vm1637_vm2, %v8231_v49 }
  0xce   : > { %785 = vrot.lane.b32.xlu0 %v4871_v0, %s4425_s19  ;;  %v4879_v24 = vpop.permute.xlu2 %653  ;;  %2380 = vst.msk [vmem:[#allocation3 + $0x30] sm:$0xff] %vm1637_vm2, %v8231_v49 }
  0xcf   : > { %8229 = vst [vmem:[#allocation17_spill] sm:$0xff] %v4879_v24  ;;  %v4881_v44 = vpop.permute.xlu1 %633  ;;  %v4897_v24 = vld [vmem:[#allocation2 + $0x12a] sm:$0xff] }
  0xd0   : > { %8230 = vst [vmem:[#allocation18_spill] sm:$0xff] %v4881_v44  ;;  %v4885_v16 = vpop.permute.xlu0 %637 }
  0xd1   : > { %8232 = vst [vmem:[#allocation19_spill] sm:$0xff] %v4885_v16  ;;  %v4957_v16 = vld [vmem:[#allocation2 + $0x16a] sm:$0xff] }
  0xd2   : > { %8233 = vst [vmem:[#allocation20_spill] sm:$0xff] %v4897_v24 }
  0xd3   : > { %2381 = vst.msk [vmem:[#allocation3 + $0x38] sm:$0xff] %vm1637_vm2, %v8231_v49 }
  0xd4   : > { %789 = vrot.lane.b32.xlu2 %v4889_v45, %s4425_s19  ;;  %2383 = vst.msk [vmem:[#allocation3 + $0x48] sm:$0xff] %vm1637_vm2, %v8231_v49 }
  0xd5   : > { %787 = vrot.lane.b32.xlu1 %v4893_v37, %s4425_s19  ;;  %2384 = vst.msk [vmem:[#allocation3 + $0x50] sm:$0xff] %vm1637_vm2, %v8231_v49 }
  0xd6   : > { %791 = vrot.lane.b32.xlu0 %v4897_v24, %s4425_s19  ;;  %v4911_v44 = vpop.permute.xlu2 %659  ;;  %2386 = vst.msk [vmem:[#allocation3 + $0x60] sm:$0xff] %vm1637_vm2, %v8231_v49  ;;  %v303_v24 = vld [vmem:[#allocation2 + $0x80] sm:$0xff] }
  0xd7   : > { %8234 = vst [vmem:[#allocation21_spill] sm:$0xff] %v4911_v44  ;;  %v4915_v32 = vpop.permute.xlu1 %639  ;;  %v4931_v44 = vld [vmem:[#allocation2 + $0x152] sm:$0xff] }
  0xd8   : > { %8235 = vst [vmem:[#allocation22_spill] sm:$0xff] %v4915_v32  ;;  %v4919_v11 = vpop.permute.xlu0 %643 }
  0xd9   : > { %8236 = vst [vmem:[#allocation23_spill] sm:$0xff] %v4919_v11 }
  0xda   : > { %2387 = vst.msk [vmem:[#allocation3 + $0x68] sm:$0xff] %vm1637_vm2, %v8231_v49 }
  0xdb   : > { %2389 = vst.msk [vmem:[#allocation3 + $0x78] sm:$0xff] %vm1637_vm2, %v8231_v49 }
  0xdc   : > { %2390 = vst.msk [vmem:[#allocation3 + $0x80] sm:$0xff] %vm1637_vm2, %v8231_v49  ;;  %795 = vrot.lane.b32.xlu2 %v4923_v7, %s4425_s19  ;;  %v300_v7 = vld [vmem:[#allocation2 + $0x60] sm:$0xff] }
  0xdd   : > { %8238 = vst [vmem:[#allocation25_spill] sm:$0xff] %v4931_v44  ;;  %793 = vrot.lane.b32.xlu1 %v4927_v33, %s4425_s19 }
  0xde   : > { %2392 = vst.msk [vmem:[#allocation3 + $0x90] sm:$0xff] %vm1637_vm2, %v8231_v49  ;;  %797 = vrot.lane.b32.xlu0 %v4931_v44, %s4425_s19  ;;  %v4945_v11 = vpop.permute.xlu2 %665 }
  0xdf   : > { %2393 = vst.msk [vmem:[#allocation3 + $0x98] sm:$0xff] %vm1637_vm2, %v8231_v49  ;;  %v4949_v32 = vpop.permute.xlu1 %645 }
  0xe0   : > { %2395 = vst.msk [vmem:[#allocation3 + $0xa8] sm:$0xff] %vm1637_vm2, %v8231_v49  ;;  %v4953_v23 = vpop.permute.xlu0 %649 }
  0xe1   : > { %8239 = vst [vmem:[#allocation26_spill] sm:$0xff] %v4945_v11  ;;  %v4965_v11 = vld [vmem:[#allocation2 + $0x172] sm:$0xff] }
  0xe2   : > { %2396 = vst.msk [vmem:[#allocation3 + $0xb0] sm:$0xff] %vm1637_vm2, %v8231_v49 }
  0xe3   : > { %8240 = vst [vmem:[#allocation27_spill] sm:$0xff] %v4949_v32 }
  0xe4   : > { %2398 = vst.msk [vmem:[#allocation3 + $0xc0] sm:$0xff] %vm1637_vm2, %v8231_v49  ;;  %801 = vrot.lane.b32.xlu2 %v4957_v16, %s4425_s19 }
  0xe5   : > { %8241 = vst [vmem:[#allocation28_spill] sm:$0xff] %v4953_v23  ;;  %799 = vrot.lane.b32.xlu1 %v4961_v25, %s4425_s19  ;;  %v301_v25 = vld [vmem:[#allocation2 + $0x68] sm:$0xff] }
  0xe6   : > { %2399 = vst.msk [vmem:[#allocation3 + $0xc8] sm:$0xff] %vm1637_vm2, %v8231_v49  ;;  %803 = vrot.lane.b32.xlu0 %v4965_v11, %s4425_s19  ;;  %v4979_v23 = vpop.permute.xlu2 %671 }
  0xe7   : > { %8242 = vst [vmem:[#allocation29_spill] sm:$0xff] %v4957_v16  ;;  %v4983_v32 = vpop.permute.xlu1 %651 }
  0xe8   : > { %2401 = vst.msk [vmem:[#allocation3 + $0xd8] sm:$0xff] %vm1637_vm2, %v8231_v49  ;;  %v4987_v15 = vpop.permute.xlu0 %655 }
  0xe9   : > { %2402 = vst.msk [vmem:[#allocation3 + $0xe0] sm:$0xff] %vm1637_vm2, %v8231_v49 }
  0xea   : > { %8244 = vst [vmem:[#allocation31_spill] sm:$0xff] %v4965_v11  ;;  %v294_v11 = vld [vmem:[#allocation2 + $0x18] sm:$0xff] }
  0xeb   : > { %2404 = vst.msk [vmem:[#allocation3 + $0xf0] sm:$0xff] %vm1637_vm2, %v8231_v49 }
  0xec   : > { %2405 = vst.msk [vmem:[#allocation3 + $0xf8] sm:$0xff] %vm1637_vm2, %v8231_v49 }
  0xed   : > { %2407 = vst.msk [vmem:[#allocation3 + $0x108] sm:$0xff] %vm1637_vm2, %v8231_v49  ;;  %869 = vrot.lane.b32.xlu1 %v294_v11, %s4426_s20  ;;  %v298_v11 = vld [vmem:[#allocation2 + $0x48] sm:$0xff] }
  0xee   : > { %8245 = vst [vmem:[#allocation32_spill] sm:$0xff] %v4979_v23  ;;  %v295_v23 = vld [vmem:[#allocation2 + $0x20] sm:$0xff] }
  0xef   : > { %2408 = vst.msk [vmem:[#allocation3 + $0x110] sm:$0xff] %vm1637_vm2, %v8231_v49  ;;  %871 = vrot.lane.b32.xlu2 %v295_v23, %s4426_s20  ;;  %v5010_v23 = vpop.permute.xlu1 %657 }
  0xf0   : > { %8246 = vst [vmem:[#allocation33_spill] sm:$0xff] %v4983_v32  ;;  %v296_v32 = vld [vmem:[#allocation2 + $0x30] sm:$0xff]  ;;  %v5014_v16 = vpop.permute.xlu0 %661 }
  0xf1   : > { %2410 = vst.msk [vmem:[#allocation3 + $0x120] sm:$0xff] %vm1637_vm2, %v8231_v49  ;;  %873 = vrot.lane.b32.xlu0 %v296_v32, %s4426_s20  ;;  %v297_v32 = vld [vmem:[#allocation2 + $0x38] sm:$0xff] }
  0xf2   : > { %8247 = vst [vmem:[#allocation34_spill] sm:$0xff] %v4987_v15  ;;  %v5004_v15 = vpop.permute.xlu2 %741 }
  0xf3   : > { %2411 = vst.msk [vmem:[#allocation3 + $0x128] sm:$0xff] %vm1637_vm2, %v8231_v49 }
  0xf4   : > { %2413 = vst.msk [vmem:[#allocation3 + $0x138] sm:$0xff] %vm1637_vm2, %v8231_v49 }
  0xf5   : > { %2414 = vst.msk [vmem:[#allocation3 + $0x140] sm:$0xff] %vm1637_vm2, %v8231_v49  ;;  %875 = vrot.lane.b32.xlu1 %v297_v32, %s4426_s20 }
  0xf6   : > { %2416 = vst.msk [vmem:[#allocation3 + $0x150] sm:$0xff] %vm1637_vm2, %v8231_v49 }
  0xf7   : > { %2417 = vst.msk [vmem:[#allocation3 + $0x158] sm:$0xff] %vm1637_vm2, %v8231_v49  ;;  %877 = vrot.lane.b32.xlu2 %v298_v11, %s4426_s20  ;;  %v5025_v44 = vpop.permute.xlu1 %663 }
  0xf8   : > { %2419 = vst.msk [vmem:[#allocation3 + $0x168] sm:$0xff] %vm1637_vm2, %v8231_v49 }
  0xf9   : > { %8248 = vst [vmem:[#allocation35_spill] sm:$0xff] %v5004_v15  ;;  %v299_v15 = vld [vmem:[#allocation2 + $0x50] sm:$0xff] }
  0xfa   : > { %2420 = vst.msk [vmem:[#allocation3 + $0x170] sm:$0xff] %vm1637_vm2, %v8231_v49  ;;  %879 = vrot.lane.b32.xlu0 %v299_v15, %s4426_s20 }
  0xfb   : > { %2422 = vst.msk [vmem:[#allocation3 + $0x180] sm:$0xff] %vm1637_vm2, %v8231_v49 }
  0xfc   : > { %8249 = vst [vmem:[#allocation36_spill] sm:$0xff] %v5010_v23  ;;  %v5023_v23 = vpop.permute.xlu2 %747 }
  0xfd   : > { %2423 = vst.msk [vmem:[#allocation3 + $0x188] sm:$0xff] %vm1637_vm2, %v8231_v49  ;;  %881 = vrot.lane.b32.xlu1 %v300_v7, %s4426_s20 }
  0xfe   : > { %8250 = vst [vmem:[#allocation37_spill] sm:$0xff] %v5014_v16  ;;  %v5027_v16 = vpop.permute.xlu0 %667 }
  0xff   : > { %2425 = vst.msk [vmem:[#allocation3 + $0x198] sm:$0xff] %vm1637_vm2, %v8231_v49  ;;  %883 = vrot.lane.b32.xlu2 %v301_v25, %s4426_s20  ;;  %v5034_v32 = vpop.permute.xlu1 %669 }
 0x100   : > { %2426 = vst.msk [vmem:[#allocation3 + $0x1a0] sm:$0xff] %vm1637_vm2, %v8231_v49  ;;  %v302_v49 = vld [vmem:[#allocation2 + $0x78] sm:$0xff] }
 0x101   : > { %8251 = vst [vmem:[#allocation38_spill] sm:$0xff] %v5023_v23  ;;  %v304_v23 = vld [vmem:[#allocation2 + $0x90] sm:$0xff] }
 0x102   : > { %8252 = vst [vmem:[#allocation39_spill] sm:$0xff] %v5025_v44  ;;  %885 = vrot.lane.b32.xlu0 %v302_v49, %s4426_s20  ;;  %v5062_v44 = vld [vmem:[#allocation2 + $0xd8] sm:$0xff] }
 0x103   : > { %8253 = vst [vmem:[#allocation40_spill] sm:$0xff] %v5027_v16  ;;  %v305_v16 = vld [vmem:[#allocation2 + $0x98] sm:$0xff] }
 0x104   : > { %v5032_v11 = vpop.permute.xlu2 %753  ;;  %8255 = vst [vmem:[#allocation42_spill] sm:$0xff] %v5034_v32  ;;  %v5047_v32 = vld [vmem:[#allocation2 + $0xb0] sm:$0xff] }
 0x105   : > { %8254 = vst [vmem:[#allocation41_spill] sm:$0xff] %v5032_v11  ;;  %887 = vrot.lane.b32.xlu1 %v303_v24, %s4426_s20  ;;  %v257_v11 = vld [vmem:[%s4538_s18 + $0xf0] sm:$0xff] }
 0x106   : > { %v5036_v15 = vpop.permute.xlu0 %673  ;;  %8260 = vst [vmem:[#allocation47_spill] sm:$0xff] %v5047_v32 }
 0x107   : > { %8256 = vst [vmem:[#allocation43_spill] sm:$0xff] %v5036_v15  ;;  %889 = vrot.lane.b32.xlu2 %v304_v23, %s4426_s20  ;;  %v5043_v7 = vpop.permute.xlu1 %675  ;;  %v306_v15 = vld [vmem:[#allocation2 + $0xa8] sm:$0xff]  ;;  %v5051_v23 = vld [vmem:[#allocation2 + $0xc0] sm:$0xff] }
 0x108   : > { %8258 = vst [vmem:[#allocation45_spill] sm:$0xff] %v5043_v7 }
 0x109   : > { %8264 = vst [vmem:[#allocation51_spill] sm:$0xff] %v5062_v44 }
 0x10a   : > { %891 = vrot.lane.b32.xlu0 %v305_v16, %s4426_s20  ;;  %290 = vst.msk [vmem:[#allocation2 + $0x181] sm:$0xff] %vm171_vm0, %v257_v11 }
 0x10c   : > { %v5041_v25 = vpop.permute.xlu2 %759 }
 0x10d   : > { %8257 = vst [vmem:[#allocation44_spill] sm:$0xff] %v5041_v25  ;;  %893 = vrot.lane.b32.xlu1 %v306_v15, %s4426_s20  ;;  %v309_v25 = vld [vmem:[#allocation2 + $0xc8] sm:$0xff] }
 0x10e   : > { %v5045_v49 = vpop.permute.xlu0 %743 }
 0x10f   : > { %8259 = vst [vmem:[#allocation46_spill] sm:$0xff] %v5045_v49  ;;  %895 = vrot.lane.b32.xlu2 %v5047_v32, %s4426_s20  ;;  %v5058_v24 = vpop.permute.xlu1 %745  ;;  %v258_v49 = vld [vmem:[%s4538_s18 + $0xf8] sm:$0xff]  ;;  %v5068_v32 = vld [vmem:[#allocation2 + $0xe0] sm:$0xff] }
 0x110   : > { %8262 = vst [vmem:[#allocation49_spill] sm:$0xff] %v5058_v24 }
 0x111   : > { %291 = vst.msk [vmem:[#allocation2 + $0x189] sm:$0xff] %vm171_vm0, %v258_v49 }
 0x112   : > { %897 = vrot.lane.b32.xlu0 %v5051_v23, %s4426_s20 }
 0x114   : > { %v5056_v16 = vpop.permute.xlu2 %765 }
 0x115   : > { %8261 = vst [vmem:[#allocation48_spill] sm:$0xff] %v5056_v16  ;;  %899 = vrot.lane.b32.xlu1 %v309_v25, %s4426_s20  ;;  %v5081_v16 = vld [vmem:[#allocation2 + $0xf8] sm:$0xff]  ;;  %v5085_v25 = vld [vmem:[#allocation2 + $0x108] sm:$0xff] }
 0x116   : > { %v5060_v7 = vpop.permute.xlu0 %749  ;;  %8268 = vst [vmem:[#allocation55_spill] sm:$0xff] %v5081_v16 }
 0x117   : > { %8263 = vst [vmem:[#allocation50_spill] sm:$0xff] %v5060_v7  ;;  %901 = vrot.lane.b32.xlu2 %v5062_v44, %s4426_s20  ;;  %v5077_v7 = vpop.permute.xlu1 %751  ;;  %v312_v44 = vld [vmem:[#allocation2 + $0xf0] sm:$0xff] }
 0x118   : > { %8266 = vst [vmem:[#allocation53_spill] sm:$0xff] %v5077_v7  ;;  %v315_v7 = vld [vmem:[#allocation2 + $0x110] sm:$0xff] }
 0x119   : > { %8269 = vst [vmem:[#allocation56_spill] sm:$0xff] %v5085_v25 }
 0x11a   : > { %903 = vrot.lane.b32.xlu0 %v5068_v32, %s4426_s20 }
 0x11c   : > { %v5074_v15 = vpop.permute.xlu2 %771 }
 0x11d   : > { %8265 = vst [vmem:[#allocation52_spill] sm:$0xff] %v5074_v15  ;;  %905 = vrot.lane.b32.xlu1 %v312_v44, %s4426_s20 }
 0x11e   : > { %v5079_v24 = vpop.permute.xlu0 %755 }
 0x11f   : > { %8267 = vst [vmem:[#allocation54_spill] sm:$0xff] %v5079_v24  ;;  %907 = vrot.lane.b32.xlu2 %v5081_v16, %s4426_s20  ;;  %v5092_v49 = vpop.permute.xlu1 %757  ;;  %v5096_v24 = vld [vmem:[#allocation2 + $0x120] sm:$0xff]  ;;  %v5100_v16 = vld [vmem:[#allocation2 + $0x128] sm:$0xff] }
 0x120   : > { %8271 = vst [vmem:[#allocation58_spill] sm:$0xff] %v5092_v49 }
 0x121   : > { %8273 = vst [vmem:[#allocation60_spill] sm:$0xff] %v5096_v24 }
 0x122   : > { %909 = vrot.lane.b32.xlu0 %v5085_v25, %s4426_s20  ;;  %8274 = vst [vmem:[#allocation61_spill] sm:$0xff] %v5100_v16  ;;  %v318_v25 = vld [vmem:[#allocation2 + $0x138] sm:$0xff] }
 0x124   : > { %v5090_v11 = vpop.permute.xlu2 %777 }
 0x125   : > { %8270 = vst [vmem:[#allocation57_spill] sm:$0xff] %v5090_v11  ;;  %911 = vrot.lane.b32.xlu1 %v315_v7, %s4426_s20 }
 0x126   : > { %v5094_v15 = vpop.permute.xlu0 %761 }
 0x127   : > { %8272 = vst [vmem:[#allocation59_spill] sm:$0xff] %v5094_v15  ;;  %913 = vrot.lane.b32.xlu2 %v5096_v24, %s4426_s20  ;;  %v5107_v11 = vpop.permute.xlu1 %763  ;;  %v5111_v15 = vld [vmem:[#allocation2 + $0x140] sm:$0xff]  ;;  %v5115_v24 = vld [vmem:[#allocation2 + $0x150] sm:$0xff] }
 0x128   : > { %8276 = vst [vmem:[#allocation63_spill] sm:$0xff] %v5107_v11 }
 0x129   : > { %8278 = vst [vmem:[#allocation65_spill] sm:$0xff] %v5111_v15 }
 0x12a   : > { %915 = vrot.lane.b32.xlu0 %v5100_v16, %s4426_s20  ;;  %8279 = vst [vmem:[#allocation66_spill] sm:$0xff] %v5115_v24  ;;  %v321_v16 = vld [vmem:[#allocation2 + $0x158] sm:$0xff] }
 0x12c   : > { %v5105_v44 = vpop.permute.xlu2 %783 }
 0x12d   : > { %8275 = vst [vmem:[#allocation62_spill] sm:$0xff] %v5105_v44  ;;  %917 = vrot.lane.b32.xlu1 %v318_v25, %s4426_s20 }
 0x12e   : > { %v5109_v49 = vpop.permute.xlu0 %767 }
 0x12f   : > { %8277 = vst [vmem:[#allocation64_spill] sm:$0xff] %v5109_v49  ;;  %919 = vrot.lane.b32.xlu2 %v5111_v15, %s4426_s20  ;;  %v5122_v44 = vpop.permute.xlu1 %769  ;;  %v5126_v49 = vld [vmem:[#allocation2 + $0x168] sm:$0xff]  ;;  %v5130_v15 = vld [vmem:[#allocation2 + $0x170] sm:$0xff] }
 0x130   : > { %8281 = vst [vmem:[#allocation68_spill] sm:$0xff] %v5122_v44 }
 0x132   : > { %921 = vrot.lane.b32.xlu0 %v5115_v24, %s4426_s20  ;;  %v5143_v24 = vld [vmem:[#allocation2 + $0x180] sm:$0xff] }
 0x134   : > { %v5120_v7 = vpop.permute.xlu2 %789 }
 0x135   : > { %8280 = vst [vmem:[#allocation67_spill] sm:$0xff] %v5120_v7  ;;  %923 = vrot.lane.b32.xlu1 %v321_v16, %s4426_s20 }
 0x136   : > { %v5124_v11 = vpop.permute.xlu0 %773 }
 0x137   : > { %8282 = vst [vmem:[#allocation69_spill] sm:$0xff] %v5124_v11  ;;  %925 = vrot.lane.b32.xlu2 %v5126_v49, %s4426_s20  ;;  %v5137_v7 = vpop.permute.xlu1 %775  ;;  %v5141_v11 = vld [vmem:[#allocation2 + $0x188] sm:$0xff] }
 0x138   : > { %8284 = vst [vmem:[#allocation71_spill] sm:$0xff] %v5137_v7 }
 0x139   : > { %8286 = vst [vmem:[#allocation73_spill] sm:$0xff] %v5141_v11 }
 0x13a   : > { %927 = vrot.lane.b32.xlu0 %v5130_v15, %s4426_s20 }
 0x13c   : > { %v5135_v25 = vpop.permute.xlu2 %795 }
 0x13d   : > { %8283 = vst [vmem:[#allocation70_spill] sm:$0xff] %v5135_v25  ;;  %929 = vrot.lane.b32.xlu1 %v5143_v24, %s4426_s20 }
 0x13e   : > { %v5139_v44 = vpop.permute.xlu0 %779 }
 0x13f   : > { %8285 = vst [vmem:[#allocation72_spill] sm:$0xff] %v5139_v44  ;;  %931 = vrot.lane.b32.xlu2 %v5141_v11, %s4426_s20  ;;  %v5153_v25 = vpop.permute.xlu1 %781  ;;  %s170_s20 = scalar_lea.vmem %s8167_s3, %s4338_s17 }
 0x140   : > { %8288 = vst [vmem:[#allocation75_spill] sm:$0xff] %v5153_v25  ;;  %v487_v25 = vld [vmem:[#allocation2 + $0x48] sm:$0xff] }
 0x142   : > { %997 = vrot.lane.b32.xlu0 %v4570_v5, %s4427_s21 }
 0x144   : > { %v5149_v16 = vpop.permute.xlu2 %801 }
 0x145   : > { %8287 = vst [vmem:[#allocation74_spill] sm:$0xff] %v5149_v16  ;;  %999 = vrot.lane.b32.xlu1 %v4622_v19, %s4427_s21 }
 0x146   : > { %v5155_v7 = vpop.permute.xlu0 %785 }
 0x147   : > { %8289 = vst [vmem:[#allocation76_spill] sm:$0xff] %v5155_v7  ;;  %1001 = vrot.lane.b32.xlu2 %v4564_v4, %s4427_s21  ;;  %v5165_v16 = vpop.permute.xlu1 %787  ;;  %v556_v7 = vld [vmem:[#allocation2 + $0x82] sm:$0xff] }
 0x148   : > { %8290 = vst [vmem:[#allocation77_spill] sm:$0xff] %v5165_v16  ;;  %v524_v16 = vld [vmem:[#allocation2 + $0x81] sm:$0xff] }
 0x14a   : > { %1003 = vrot.lane.b32.xlu0 %v4616_v17, %s4427_s21 }
 0x14c   : > { %v5163_v44 = vpop.permute.xlu2 %871 }
 0x14d   : > { %1005 = vrot.lane.b32.xlu1 %v4628_v21, %s4427_s21 }
 0x14e   : > { %v5167_v11 = vpop.permute.xlu0 %791 }
 0x14f   : > { %8291 = vst [vmem:[#allocation78_spill] sm:$0xff] %v5167_v11  ;;  %1007 = vrot.lane.b32.xlu2 %v4644_v28, %s4427_s21  ;;  %v5177_v5 = vpop.permute.xlu1 %793  ;;  %v491_v11 = vld [vmem:[#allocation2 + $0x78] sm:$0xff] }
 0x150   : > { %8292 = vst [vmem:[#allocation79_spill] sm:$0xff] %v5177_v5  ;;  %v485_v5 = vld [vmem:[#allocation2 + $0x30] sm:$0xff] }
 0x152   : > { %1009 = vrot.lane.b32.xlu0 %v4640_v26, %s4427_s21 }
 0x154   : > { %v5175_v4 = vpop.permute.xlu2 %877 }
 0x155   : > { %1011 = vrot.lane.b32.xlu1 %v4648_v30, %s4427_s21 }
 0x156   : > { %v5179_v17 = vpop.permute.xlu0 %797 }
 0x157   : > { %8293 = vst [vmem:[#allocation80_spill] sm:$0xff] %v5179_v17  ;;  %1013 = vrot.lane.b32.xlu2 %v4667_v35, %s4427_s21  ;;  %v5189_v21 = vpop.permute.xlu1 %799  ;;  %v8329_v17 = vld [vmem:[#allocation25_spill] sm:$0xff] }
 0x158   : > { %8295 = vst [vmem:[#allocation82_spill] sm:$0xff] %v5189_v21 }
 0x15a   : > { %1015 = vrot.lane.b32.xlu0 %v4665_v34, %s4427_s21 }
 0x15c   : > { %v5187_v19 = vpop.permute.xlu2 %883 }
 0x15d   : > { %8294 = vst [vmem:[#allocation81_spill] sm:$0xff] %v5187_v19  ;;  %1017 = vrot.lane.b32.xlu1 %v4669_v36, %s4427_s21  ;;  %v574_v19 = vld [vmem:[#allocation2 + $0x15a] sm:$0xff] }
 0x15e   : > { %v5191_v26 = vpop.permute.xlu0 %803 }
 0x15f   : > { %8296 = vst [vmem:[#allocation83_spill] sm:$0xff] %v5191_v26  ;;  %1019 = vrot.lane.b32.xlu2 %v4685_v41, %s4427_s21  ;;  %v5201_v30 = vpop.permute.xlu1 %869  ;;  %v5279_v26 = vld [vmem:[#allocation2 + $0x189] sm:$0xff] }
 0x162   : > { %1021 = vrot.lane.b32.xlu0 %v4683_v40, %s4427_s21 }
 0x164   : > { %v5199_v28 = vpop.permute.xlu2 %889 }
 0x165   : > { %8297 = vst [vmem:[#allocation84_spill] sm:$0xff] %v5199_v28  ;;  %1023 = vrot.lane.b32.xlu1 %v4687_v42, %s4427_s21 }
 0x166   : > { %v5203_v34 = vpop.permute.xlu0 %873 }
 0x167   : > { %1025 = vrot.lane.b32.xlu2 %v4703_v47, %s4427_s21  ;;  %v5213_v36 = vpop.permute.xlu1 %875 }
 0x16a   : > { %1027 = vrot.lane.b32.xlu0 %v4701_v46, %s4427_s21 }
 0x16c   : > { %v5211_v35 = vpop.permute.xlu2 %895 }
 0x16d   : > { %1029 = vrot.lane.b32.xlu1 %v4705_v48, %s4427_s21 }
 0x16e   : > { %v5215_v40 = vpop.permute.xlu0 %879 }
 0x16f   : > { %1031 = vrot.lane.b32.xlu2 %v4717_v51, %s4427_s21  ;;  %v5225_v42 = vpop.permute.xlu1 %881 }
 0x172   : > { %1033 = vrot.lane.b32.xlu0 %v4715_v50, %s4427_s21 }
 0x174   : > { %v5223_v41 = vpop.permute.xlu2 %901 }
 0x175   : > { %8298 = vst [vmem:[#allocation85_spill] sm:$0xff] %v5223_v41  ;;  %1035 = vrot.lane.b32.xlu1 %v4719_v52, %s4427_s21  ;;  %v550_v41 = vld [vmem:[#allocation2 + $0x3a] sm:$0xff] }
 0x176   : > { %v5227_v46 = vpop.permute.xlu0 %885 }
 0x177   : > { %8299 = vst [vmem:[#allocation86_spill] sm:$0xff] %v5227_v46  ;;  %1037 = vrot.lane.b32.xlu2 %v4729_v54, %s4427_s21  ;;  %v5237_v48 = vpop.permute.xlu1 %887  ;;  %v541_v46 = vld [vmem:[#allocation2 + $0x151] sm:$0xff] }
 0x178   : > { %8301 = vst [vmem:[#allocation88_spill] sm:$0xff] %v5237_v48  ;;  %v525_v48 = vld [vmem:[#allocation2 + $0x91] sm:$0xff] }
 0x17a   : > { %1039 = vrot.lane.b32.xlu0 %v4727_v53, %s4427_s21 }
 0x17c   : > { %v5235_v47 = vpop.permute.xlu2 %907 }
 0x17d   : > { %8300 = vst [vmem:[#allocation87_spill] sm:$0xff] %v5235_v47  ;;  %1041 = vrot.lane.b32.xlu1 %v4731_v55, %s4427_s21  ;;  %v492_v47 = vld [vmem:[#allocation2 + $0x80] sm:$0xff] }
 0x17e   : > { %v5239_v50 = vpop.permute.xlu0 %891 }
 0x17f   : > { %8302 = vst [vmem:[#allocation89_spill] sm:$0xff] %v5239_v50  ;;  %1043 = vrot.lane.b32.xlu2 %v4741_v57, %s4427_s21  ;;  %v5249_v52 = vpop.permute.xlu1 %893  ;;  %v5265_v57 = vld [vmem:[#allocation2 + $0x181] sm:$0xff] }
 0x180   : > { %v490_v50 = vld [vmem:[#allocation2 + $0x68] sm:$0xff] }
 0x182   : > { %1045 = vrot.lane.b32.xlu0 %v4739_v56, %s4427_s21 }
 0x184   : > { %v5247_v51 = vpop.permute.xlu2 %913 }
 0x185   : > { %8303 = vst [vmem:[#allocation90_spill] sm:$0xff] %v5247_v51  ;;  %1047 = vrot.lane.b32.xlu1 %v4743_v58, %s4427_s21  ;;  %v539_v51 = vld [vmem:[#allocation2 + $0x139] sm:$0xff] }
 0x186   : > { %v5251_v53 = vpop.permute.xlu0 %897 }
 0x187   : > { %1049 = vrot.lane.b32.xlu2 %v4753_v60, %s4427_s21  ;;  %v5261_v55 = vpop.permute.xlu1 %899 }
 0x188   : > { %8305 = vst [vmem:[#allocation92_spill] sm:$0xff] %v5261_v55  ;;  %v1868_v55 = vld [vmem:[%s8165_s1] sm:$0xff] }
 0x18a   : > { %1051 = vrot.lane.b32.xlu0 %v4751_v59, %s4427_s21 }
 0x18c   : > { %v5259_v54 = vpop.permute.xlu2 %919 }
 0x18d   : > { %8304 = vst [vmem:[#allocation91_spill] sm:$0xff] %v5259_v54  ;;  %1053 = vrot.lane.b32.xlu1 %v4755_v61, %s4427_s21 }
 0x18e   : > { %v5263_v56 = vpop.permute.xlu0 %903 }
 0x18f   : > { %8306 = vst [vmem:[#allocation93_spill] sm:$0xff] %v5263_v56  ;;  %1055 = vrot.lane.b32.xlu2 %v4763_v63, %s4427_s21  ;;  %v5275_v59 = vpop.permute.xlu1 %905  ;;  %v520_v56 = vld [vmem:[#allocation2 + $0x51] sm:$0xff] }
 0x190   : > { %8308 = vst [vmem:[#allocation95_spill] sm:$0xff] %v5275_v59  ;;  %v8350_v59 = vld [vmem:[#allocation56_spill] sm:$0xff] }
 0x192   : > { %1057 = vrot.lane.b32.xlu0 %v5265_v57, %s4427_s21 }
 0x194   : > { %v5273_v58 = vpop.permute.xlu2 %925 }
 0x195   : > { %8307 = vst [vmem:[#allocation94_spill] sm:$0xff] %v5273_v58  ;;  %1059 = vrot.lane.b32.xlu1 %v5279_v26, %s4427_s21 }
 0x196   : > { %v5277_v60 = vpop.permute.xlu0 %909 }
 0x197   : > { %8309 = vst [vmem:[#allocation96_spill] sm:$0xff] %v5277_v60  ;;  %1125 = vrot.lane.b32.xlu2 %v4771_v3, %s4428_s22  ;;  %v5289_v63 = vpop.permute.xlu1 %911  ;;  %v486_v60 = vld [vmem:[#allocation2 + $0x38] sm:$0xff] }
 0x19a   : > { %1127 = vrot.lane.b32.xlu0 %v4769_v2, %s4428_s22 }
 0x19c   : > { %v5287_v61 = vpop.permute.xlu2 %931 }
 0x19d   : > { %8310 = vst [vmem:[#allocation97_spill] sm:$0xff] %v5287_v61  ;;  %1129 = vrot.lane.b32.xlu1 %v4773_v6, %s4428_s22  ;;  %v8324_v61 = vld [vmem:[#allocation20_spill] sm:$0xff] }
 0x19e   : > { %v5291_v21 = vpop.permute.xlu0 %915 }
 0x19f   : > { %8311 = vst [vmem:[#allocation98_spill] sm:$0xff] %v5291_v21  ;;  %1131 = vrot.lane.b32.xlu2 %v4785_v9, %s4428_s22  ;;  %v5301_v58 = vpop.permute.xlu1 %917  ;;  %v517_v21 = vld [vmem:[#allocation2 + $0x31] sm:$0xff] }
 0x1a0   : > { %8312 = vst [vmem:[#allocation99_spill] sm:$0xff] %v5301_v58  ;;  %v504_v58 = vld [vmem:[#allocation2 + $0x110] sm:$0xff] }
 0x1a2   : > { %1133 = vrot.lane.b32.xlu0 %v4783_v8, %s4428_s22 }
 0x1a4   : > { %v5299_v3 = vpop.permute.xlu2 %1001 }
 0x1a5   : > { %1135 = vrot.lane.b32.xlu1 %v4787_v10, %s4428_s22 }
 0x1a6   : > { %v5303_v2 = vpop.permute.xlu0 %921 }
 0x1a7   : > { %8313 = vst [vmem:[#allocation100_spill] sm:$0xff] %v5303_v2  ;;  %1137 = vrot.lane.b32.xlu2 %v4799_v13, %s4428_s22  ;;  %v5313_v6 = vpop.permute.xlu1 %923  ;;  %v5403_v2 = vld [vmem:[#allocation2 + $0x18a] sm:$0xff] }
 0x1a8   : > { %8314 = vst [vmem:[#allocation101_spill] sm:$0xff] %v5313_v6 }
 0x1aa   : > { %1139 = vrot.lane.b32.xlu0 %v4797_v12, %s4428_s22 }
 0x1ac   : > { %v5311_v9 = vpop.permute.xlu2 %1007 }
 0x1ad   : > { %1141 = vrot.lane.b32.xlu1 %v4801_v14, %s4428_s22 }
 0x1ae   : > { %v5315_v8 = vpop.permute.xlu0 %927 }
 0x1af   : > { %8315 = vst [vmem:[#allocation102_spill] sm:$0xff] %v5315_v8  ;;  %1143 = vrot.lane.b32.xlu2 %v4815_v20, %s4428_s22  ;;  %v5325_v10 = vpop.permute.xlu1 %929  ;;  %v8328_v8 = vld [vmem:[#allocation30_spill] sm:$0xff] }
 0x1b0   : > { %8317 = vst [vmem:[#allocation104_spill] sm:$0xff] %v5325_v10 }
 0x1b2   : > { %1145 = vrot.lane.b32.xlu0 %v4813_v18, %s4428_s22 }
 0x1b4   : > { %v5323_v13 = vpop.permute.xlu2 %1013 }
 0x1b5   : > { %8316 = vst [vmem:[#allocation103_spill] sm:$0xff] %v5323_v13  ;;  %1147 = vrot.lane.b32.xlu1 %v4817_v22, %s4428_s22  ;;  %v538_v13 = vld [vmem:[#allocation2 + $0x129] sm:$0xff] }
 0x1b6   : > { %v5327_v12 = vpop.permute.xlu0 %997 }
 0x1b7   : > { %1149 = vrot.lane.b32.xlu2 %v4833_v29, %s4428_s22  ;;  %v5337_v14 = vpop.permute.xlu1 %999 }
 0x1ba   : > { %1151 = vrot.lane.b32.xlu0 %v4831_v27, %s4428_s22 }
 0x1bc   : > { %v5335_v20 = vpop.permute.xlu2 %1019 }
 0x1bd   : > { %8318 = vst [vmem:[#allocation105_spill] sm:$0xff] %v5335_v20  ;;  %1153 = vrot.lane.b32.xlu1 %v4835_v31, %s4428_s22 }
 0x1be   : > { %v5339_v18 = vpop.permute.xlu0 %1003 }
 0x1bf   : > { %1155 = vrot.lane.b32.xlu2 %v4851_v39, %s4428_s22  ;;  %v5349_v22 = vpop.permute.xlu1 %1005 }
 0x1c2   : > { %1157 = vrot.lane.b32.xlu0 %v4849_v38, %s4428_s22 }
 0x1c4   : > { %v5347_v29 = vpop.permute.xlu2 %1025 }
 0x1c5   : > { %1159 = vrot.lane.b32.xlu1 %v4853_v43, %s4428_s22 }
 0x1c6   : > { %v5351_v27 = vpop.permute.xlu0 %1009 }
 0x1c7   : > { %1161 = vrot.lane.b32.xlu2 %v4869_v1, %s4428_s22  ;;  %v5361_v31 = vpop.permute.xlu1 %1011 }
 0x1c8   : > { %8320 = vst [vmem:[#allocation107_spill] sm:$0xff] %v5361_v31  ;;  %v570_v31 = vld [vmem:[#allocation2 + $0x12a] sm:$0xff] }
 0x1ca   : > { %1163 = vrot.lane.b32.xlu0 %v4867_v62, %s4428_s22 }
 0x1cc   : > { %v5359_v39 = vpop.permute.xlu2 %1031 }
 0x1cd   : > { %8319 = vst [vmem:[#allocation106_spill] sm:$0xff] %v5359_v39  ;;  %1165 = vrot.lane.b32.xlu1 %v4871_v0, %s4428_s22  ;;  %v515_v39 = vld [vmem:[#allocation2 + $0x198] sm:$0xff] }
 0x1ce   : > { %v5363_v38 = vpop.permute.xlu0 %1015 }
 0x1cf   : > { %8321 = vst [vmem:[#allocation108_spill] sm:$0xff] %v5363_v38  ;;  %1167 = vrot.lane.b32.xlu2 %v4893_v37, %s4428_s22  ;;  %v5373_v43 = vpop.permute.xlu1 %1017  ;;  %v8325_v37 = vld [vmem:[#allocation24_spill] sm:$0xff] }
 0x1d0   : > { %8323 = vst [vmem:[#allocation110_spill] sm:$0xff] %v5373_v43  ;;  %v494_v43 = vld [vmem:[#allocation2 + $0x98] sm:$0xff] }
 0x1d2   : > { %1169 = vrot.lane.b32.xlu0 %v4889_v45, %s4428_s22 }
 0x1d4   : > { %v5371_v1 = vpop.permute.xlu2 %1037 }
 0x1d5   : > { %8322 = vst [vmem:[#allocation109_spill] sm:$0xff] %v5371_v1  ;;  %1171 = vrot.lane.b32.xlu1 %v8324_v61, %s4428_s22  ;;  %v5401_v1 = vld [vmem:[#allocation2 + $0x182] sm:$0xff] }
 0x1d6   : > { %v5375_v62 = vpop.permute.xlu0 %1021 }
 0x1d7   : > { %1173 = vrot.lane.b32.xlu2 %v4927_v33, %s4428_s22  ;;  %v5385_v0 = vpop.permute.xlu1 %1023  ;;  %v8330_v33 = vld [vmem:[#allocation29_spill] sm:$0xff] }
 0x1da   : > { %1175 = vrot.lane.b32.xlu0 %v8325_v37, %s4428_s22 }
 0x1dc   : > { %v5383_v10 = vpop.permute.xlu2 %1043 }
 0x1dd   : > { %8326 = vst [vmem:[#allocation20_spill] sm:$0xff] %v5383_v10  ;;  %1177 = vrot.lane.b32.xlu1 %v8329_v17, %s4428_s22  ;;  %v8355_v10 = vld [vmem:[#allocation61_spill] sm:$0xff] }
 0x1de   : > { %v5387_v45 = vpop.permute.xlu0 %1027 }
 0x1df   : > { %8327 = vst [vmem:[#allocation24_spill] sm:$0xff] %v5387_v45  ;;  %1179 = vrot.lane.b32.xlu2 %v8328_v8, %s4428_s22  ;;  %v5397_v61 = vpop.permute.xlu1 %1029  ;;  %v8334_v8 = vld [vmem:[#allocation31_spill] sm:$0xff] }
 0x1e0   : > { %8332 = vst [vmem:[#allocation25_spill] sm:$0xff] %v5397_v61  ;;  %v536_v61 = vld [vmem:[#allocation2 + $0x111] sm:$0xff] }
 0x1e2   : > { %1181 = vrot.lane.b32.xlu0 %v8330_v33, %s4428_s22 }
 0x1e4   : > { %v5395_v6 = vpop.permute.xlu2 %1049 }
 0x1e5   : > { %8331 = vst [vmem:[#allocation30_spill] sm:$0xff] %v5395_v6  ;;  %1183 = vrot.lane.b32.xlu1 %v8334_v8, %s4428_s22 }
 0x1e6   : > { %v5399_v37 = vpop.permute.xlu0 %1033 }
 0x1e7   : > { %8333 = vst [vmem:[#allocation29_spill] sm:$0xff] %v5399_v37  ;;  %1185 = vrot.lane.b32.xlu2 %v5401_v1, %s4428_s22  ;;  %v5413_v33 = vpop.permute.xlu1 %1035  ;;  %v493_v37 = vld [vmem:[#allocation2 + $0x90] sm:$0xff] }
 0x1e8   : > { %8336 = vst [vmem:[#allocation111_spill] sm:$0xff] %v5413_v33  ;;  %v488_v33 = vld [vmem:[#allocation2 + $0x50] sm:$0xff] }
 0x1ea   : > { %1187 = vrot.lane.b32.xlu0 %v5403_v2, %s4428_s22 }
 0x1ec   : > { %v5411_v17 = vpop.permute.xlu2 %1055 }
 0x1ed   : > { %8335 = vst [vmem:[#allocation31_spill] sm:$0xff] %v5411_v17  ;;  %1253 = vrot.lane.b32.xlu1 %v485_v5, %s4429_s23  ;;  %v489_v17 = vld [vmem:[#allocation2 + $0x60] sm:$0xff] }
 0x1ee   : > { %v5415_v6 = vpop.permute.xlu0 %1039 }
 0x1ef   : > { %1255 = vrot.lane.b32.xlu2 %v486_v60, %s4429_s23  ;;  %v5422_v20 = vpop.permute.xlu1 %1041 }
 0x1f0   : > { %8337 = vst [vmem:[#allocation112_spill] sm:$0xff] %v5422_v20  ;;  %v537_v20 = vld [vmem:[#allocation2 + $0x121] sm:$0xff] }
 0x1f2   : > { %1257 = vrot.lane.b32.xlu0 %v487_v25, %s4429_s23 }
 0x1f4   : > { %v5420_v8 = vpop.permute.xlu2 %1125 }
 0x1f5   : > { %1259 = vrot.lane.b32.xlu1 %v488_v33, %s4429_s23 }
 0x1f6   : > { %v5424_v54 = vpop.permute.xlu0 %1045 }
 0x1f7   : > { %8338 = vst [vmem:[#allocation113_spill] sm:$0xff] %v5424_v54  ;;  %1261 = vrot.lane.b32.xlu2 %v489_v17, %s4429_s23  ;;  %v5431_v5 = vpop.permute.xlu1 %1047  ;;  %v495_v54 = vld [vmem:[#allocation2 + $0xa8] sm:$0xff] }
 0x1f8   : > { %8339 = vst [vmem:[#allocation114_spill] sm:$0xff] %v5431_v5  ;;  %v498_v5 = vld [vmem:[#allocation2 + $0xc8] sm:$0xff] }
 0x1fa   : > { %1263 = vrot.lane.b32.xlu0 %v490_v50, %s4429_s23 }
 0x1fc   : > { %v5429_v60 = vpop.permute.xlu2 %1131 }
 0x1fd   : > { %1265 = vrot.lane.b32.xlu1 %v491_v11, %s4429_s23 }
 0x1fe   : > { %v5433_v25 = vpop.permute.xlu0 %1051 }
 0x1ff   : > { %8340 = vst [vmem:[#allocation115_spill] sm:$0xff] %v5433_v25  ;;  %1267 = vrot.lane.b32.xlu2 %v492_v47, %s4429_s23  ;;  %v5440_v33 = vpop.permute.xlu1 %1053  ;;  %v8343_v25 = vld [vmem:[#allocation47_spill] sm:$0xff] }
 0x200   : > { %8341 = vst [vmem:[#allocation116_spill] sm:$0xff] %v5440_v33  ;;  %v501_v33 = vld [vmem:[#allocation2 + $0xf0] sm:$0xff] }
 0x202   : > { %1269 = vrot.lane.b32.xlu0 %v493_v37, %s4429_s23 }
 0x204   : > { %v5438_v17 = vpop.permute.xlu2 %1137 }
 0x205   : > { %1271 = vrot.lane.b32.xlu1 %v494_v43, %s4429_s23 }
 0x206   : > { %v5442_v50 = vpop.permute.xlu0 %1057 }
 0x207   : > { %8342 = vst [vmem:[#allocation117_spill] sm:$0xff] %v5442_v50  ;;  %1273 = vrot.lane.b32.xlu2 %v495_v54, %s4429_s23  ;;  %v5450_v11 = vpop.permute.xlu1 %1059  ;;  %v8346_v50 = vld [vmem:[#allocation51_spill] sm:$0xff] }
 0x208   : > { %8345 = vst [vmem:[#allocation118_spill] sm:$0xff] %v5450_v11 }
 0x20a   : > { %1275 = vrot.lane.b32.xlu0 %v8343_v25, %s4429_s23 }
 0x20c   : > { %v5448_v47 = vpop.permute.xlu2 %1143 }
 0x20d   : > { %8344 = vst [vmem:[#allocation47_spill] sm:$0xff] %v5448_v47  ;;  %1277 = vrot.lane.b32.xlu1 %v5051_v23, %s4429_s23  ;;  %v507_v47 = vld [vmem:[#allocation2 + $0x138] sm:$0xff] }
 0x20e   : > { %v5452_v37 = vpop.permute.xlu0 %1127 }
 0x20f   : > { %1279 = vrot.lane.b32.xlu2 %v498_v5, %s4429_s23  ;;  %v5461_v43 = vpop.permute.xlu1 %1129  ;;  %v8347_v5 = vld [vmem:[#allocation55_spill] sm:$0xff] }
 0x212   : > { %1281 = vrot.lane.b32.xlu0 %v8346_v50, %s4429_s23 }
 0x214   : > { %v5459_v54 = vpop.permute.xlu2 %1149 }
 0x215   : > { %1283 = vrot.lane.b32.xlu1 %v5068_v32, %s4429_s23 }
 0x216   : > { %v5463_v25 = vpop.permute.xlu0 %1133 }
 0x217   : > { %1285 = vrot.lane.b32.xlu2 %v501_v33, %s4429_s23  ;;  %v5472_v23 = vpop.permute.xlu1 %1135  ;;  %v8351_v33 = vld [vmem:[#allocation60_spill] sm:$0xff] }
 0x21a   : > { %1287 = vrot.lane.b32.xlu0 %v8347_v5, %s4429_s23 }
 0x21c   : > { %v5470_v11 = vpop.permute.xlu2 %1155 }
 0x21d   : > { %8348 = vst [vmem:[#allocation51_spill] sm:$0xff] %v5470_v11  ;;  %1289 = vrot.lane.b32.xlu1 %v8350_v59, %s4429_s23  ;;  %v568_v11 = vld [vmem:[#allocation2 + $0x112] sm:$0xff] }
 0x21e   : > { %v5474_v50 = vpop.permute.xlu0 %1139 }
 0x21f   : > { %8349 = vst [vmem:[#allocation55_spill] sm:$0xff] %v5474_v50  ;;  %1291 = vrot.lane.b32.xlu2 %v504_v58, %s4429_s23  ;;  %v5483_v32 = vpop.permute.xlu1 %1141  ;;  %v8356_v58 = vld [vmem:[#allocation65_spill] sm:$0xff]  ;;  %v566_v50 = vld [vmem:[#allocation2 + $0xfa] sm:$0xff] }
 0x220   : > { %8353 = vst [vmem:[#allocation60_spill] sm:$0xff] %v5483_v32  ;;  %v535_v32 = vld [vmem:[#allocation2 + $0x109] sm:$0xff] }
 0x222   : > { %1293 = vrot.lane.b32.xlu0 %v8351_v33, %s4429_s23 }
 0x224   : > { %v5481_v28 = vpop.permute.xlu2 %1161 }
 0x225   : > { %8352 = vst [vmem:[#allocation56_spill] sm:$0xff] %v5481_v28  ;;  %1295 = vrot.lane.b32.xlu1 %v8355_v10, %s4429_s23  ;;  %v510_v28 = vld [vmem:[#allocation2 + $0x158] sm:$0xff] }
 0x226   : > { %v5485_v5 = vpop.permute.xlu0 %1145 }
 0x227   : > { %8354 = vst [vmem:[#allocation119_spill] sm:$0xff] %v5485_v5  ;;  %1297 = vrot.lane.b32.xlu2 %v507_v47, %s4429_s23  ;;  %v5494_v59 = vpop.permute.xlu1 %1147  ;;  %v8358_v5 = vld [vmem:[#allocation66_spill] sm:$0xff] }
 0x228   : > { %8357 = vst [vmem:[#allocation61_spill] sm:$0xff] %v5494_v59 }
 0x22a   : > { %1299 = vrot.lane.b32.xlu0 %v8356_v58, %s4429_s23 }
 0x22c   : > { %v5492_v38 = vpop.permute.xlu2 %1167 }
 0x22d   : > { %1301 = vrot.lane.b32.xlu1 %v8358_v5, %s4429_s23 }
 0x22e   : > { %v5496_v33 = vpop.permute.xlu0 %1151 }
 0x22f   : > { %1303 = vrot.lane.b32.xlu2 %v510_v28, %s4429_s23  ;;  %v5505_v10 = vpop.permute.xlu1 %1153  ;;  %v8361_v28 = vld [vmem:[#allocation73_spill] sm:$0xff] }
 0x232   : > { %1305 = vrot.lane.b32.xlu0 %v5126_v49, %s4429_s23 }
 0x234   : > { %v5503_v47 = vpop.permute.xlu2 %1173 }
 0x235   : > { %8359 = vst [vmem:[#allocation65_spill] sm:$0xff] %v5503_v47  ;;  %1307 = vrot.lane.b32.xlu1 %v5130_v15, %s4429_s23  ;;  %v516_v47 = vld [vmem:[#allocation2 + $0x1a0] sm:$0xff] }
 0x236   : > { %v5507_v58 = vpop.permute.xlu0 %1157 }
 0x237   : > { %8360 = vst [vmem:[#allocation66_spill] sm:$0xff] %v5507_v58  ;;  %1309 = vrot.lane.b32.xlu2 %v5143_v24, %s4429_s23  ;;  %v5517_v5 = vpop.permute.xlu1 %1159  ;;  %v530_v58 = vld [vmem:[#allocation2 + $0xc9] sm:$0xff] }
 0x238   : > { %8363 = vst [vmem:[#allocation120_spill] sm:$0xff] %v5517_v5  ;;  %v518_v5 = vld [vmem:[#allocation2 + $0x39] sm:$0xff] }
 0x23a   : > { %1311 = vrot.lane.b32.xlu0 %v8361_v28, %s4429_s23 }
 0x23c   : > { %v5515_v59 = vpop.permute.xlu2 %1179 }
 0x23d   : > { %8362 = vst [vmem:[#allocation73_spill] sm:$0xff] %v5515_v59  ;;  %1313 = vrot.lane.b32.xlu1 %v515_v39, %s4429_s23  ;;  %v519_v59 = vld [vmem:[#allocation2 + $0x49] sm:$0xff] }
 0x23e   : > { %v5519_v49 = vpop.permute.xlu0 %1163 }
 0x23f   : > { %8364 = vst [vmem:[#allocation121_spill] sm:$0xff] %v5519_v49  ;;  %1315 = vrot.lane.b32.xlu2 %v516_v47, %s4429_s23  ;;  %v5526_v15 = vpop.permute.xlu1 %1165  ;;  %v521_v49 = vld [vmem:[#allocation2 + $0x61] sm:$0xff] }
 0x240   : > { %8366 = vst [vmem:[#allocation123_spill] sm:$0xff] %v5526_v15  ;;  %v523_v15 = vld [vmem:[#allocation2 + $0x79] sm:$0xff] }
 0x242   : > { %1381 = vrot.lane.b32.xlu0 %v517_v21, %s4430_s24 }
 0x244   : > { %v5524_v24 = vpop.permute.xlu2 %1185 }
 0x245   : > { %8365 = vst [vmem:[#allocation122_spill] sm:$0xff] %v5524_v24  ;;  %1383 = vrot.lane.b32.xlu1 %v518_v5, %s4430_s24  ;;  %v522_v24 = vld [vmem:[#allocation2 + $0x69] sm:$0xff] }
 0x246   : > { %v5528_v28 = vpop.permute.xlu0 %1169 }
 0x247   : > { %8367 = vst [vmem:[#allocation124_spill] sm:$0xff] %v5528_v28  ;;  %1385 = vrot.lane.b32.xlu2 %v519_v59, %s4430_s24  ;;  %v5535_v39 = vpop.permute.xlu1 %1171  ;;  %v527_v28 = vld [vmem:[#allocation2 + $0xa9] sm:$0xff] }
 0x248   : > { %8368 = vst [vmem:[#allocation125_spill] sm:$0xff] %v5535_v39  ;;  %v526_v39 = vld [vmem:[#allocation2 + $0x99] sm:$0xff] }
 0x24a   : > { %1387 = vrot.lane.b32.xlu0 %v520_v56, %s4430_s24 }
 0x24c   : > { %v5533_v47 = vpop.permute.xlu2 %1255 }
 0x24d   : > { %1389 = vrot.lane.b32.xlu1 %v521_v49, %s4430_s24 }
 0x24e   : > { %v5537_v21 = vpop.permute.xlu0 %1175 }
 0x24f   : > { %8369 = vst [vmem:[#allocation126_spill] sm:$0xff] %v5537_v21  ;;  %1391 = vrot.lane.b32.xlu2 %v522_v24, %s4430_s24  ;;  %v5544_v5 = vpop.permute.xlu1 %1177  ;;  %v528_v21 = vld [vmem:[#allocation2 + $0xb1] sm:$0xff] }
 0x250   : > { %8370 = vst [vmem:[#allocation127_spill] sm:$0xff] %v5544_v5  ;;  %v529_v5 = vld [vmem:[#allocation2 + $0xc1] sm:$0xff] }
 0x252   : > { %1393 = vrot.lane.b32.xlu0 %v523_v15, %s4430_s24 }
 0x254   : > { %v5542_v59 = vpop.permute.xlu2 %1261 }
 0x255   : > { %1395 = vrot.lane.b32.xlu1 %v524_v16, %s4430_s24 }
 0x256   : > { %v5546_v56 = vpop.permute.xlu0 %1181 }
 0x257   : > { %8371 = vst [vmem:[#allocation128_spill] sm:$0xff] %v5546_v56  ;;  %1397 = vrot.lane.b32.xlu2 %v525_v48, %s4430_s24  ;;  %v5553_v49 = vpop.permute.xlu1 %1183  ;;  %v531_v56 = vld [vmem:[#allocation2 + $0xd9] sm:$0xff] }
 0x258   : > { %8373 = vst [vmem:[#allocation130_spill] sm:$0xff] %v5553_v49  ;;  %v532_v49 = vld [vmem:[#allocation2 + $0xe1] sm:$0xff] }
 0x25a   : > { %1399 = vrot.lane.b32.xlu0 %v526_v39, %s4430_s24 }
 0x25c   : > { %v5551_v24 = vpop.permute.xlu2 %1267 }
 0x25d   : > { %8372 = vst [vmem:[#allocation129_spill] sm:$0xff] %v5551_v24  ;;  %1401 = vrot.lane.b32.xlu1 %v527_v28, %s4430_s24  ;;  %v560_v24 = vld [vmem:[#allocation2 + $0xb2] sm:$0xff] }
 0x25e   : > { %v5555_v15 = vpop.permute.xlu0 %1187 }
 0x25f   : > { %8374 = vst [vmem:[#allocation131_spill] sm:$0xff] %v5555_v15  ;;  %1403 = vrot.lane.b32.xlu2 %v528_v21, %s4430_s24  ;;  %v5562_v16 = vpop.permute.xlu1 %1253  ;;  %v534_v15 = vld [vmem:[#allocation2 + $0xf9] sm:$0xff] }
 0x262   : > { %1405 = vrot.lane.b32.xlu0 %v529_v5, %s4430_s24 }
 0x264   : > { %v5560_v48 = vpop.permute.xlu2 %1273 }
 0x265   : > { %8375 = vst [vmem:[#allocation132_spill] sm:$0xff] %v5560_v48  ;;  %1407 = vrot.lane.b32.xlu1 %v530_v58, %s4430_s24  ;;  %v533_v48 = vld [vmem:[#allocation2 + $0xf1] sm:$0xff] }
 0x266   : > { %v5564_v39 = vpop.permute.xlu0 %1257 }
 0x267   : > { %1409 = vrot.lane.b32.xlu2 %v531_v56, %s4430_s24  ;;  %v5571_v28 = vpop.permute.xlu1 %1259 }
 0x26a   : > { %1411 = vrot.lane.b32.xlu0 %v532_v49, %s4430_s24 }
 0x26c   : > { %v5569_v21 = vpop.permute.xlu2 %1279 }
 0x26d   : > { %1413 = vrot.lane.b32.xlu1 %v533_v48, %s4430_s24 }
 0x26e   : > { %v5573_v5 = vpop.permute.xlu0 %1263 }
 0x26f   : > { %1415 = vrot.lane.b32.xlu2 %v534_v15, %s4430_s24  ;;  %v5580_v58 = vpop.permute.xlu1 %1265 }
 0x272   : > { %1417 = vrot.lane.b32.xlu0 %v535_v32, %s4430_s24 }
 0x274   : > { %v5578_v56 = vpop.permute.xlu2 %1285 }
 0x275   : > { %8376 = vst [vmem:[#allocation133_spill] sm:$0xff] %v5578_v56  ;;  %1419 = vrot.lane.b32.xlu1 %v536_v61, %s4430_s24  ;;  %v540_v56 = vld [vmem:[#allocation2 + $0x141] sm:$0xff] }
 0x276   : > { %v5582_v49 = vpop.permute.xlu0 %1269 }
 0x277   : > { %8377 = vst [vmem:[#allocation134_spill] sm:$0xff] %v5582_v49  ;;  %1421 = vrot.lane.b32.xlu2 %v537_v20, %s4430_s24  ;;  %v5589_v48 = vpop.permute.xlu1 %1271  ;;  %v542_v49 = vld [vmem:[#allocation2 + $0x159] sm:$0xff] }
 0x278   : > { %8379 = vst [vmem:[#allocation136_spill] sm:$0xff] %v5589_v48  ;;  %v544_v48 = vld [vmem:[#allocation2 + $0x171] sm:$0xff] }
 0x27a   : > { %1423 = vrot.lane.b32.xlu0 %v538_v13, %s4430_s24 }
 0x27c   : > { %v5587_v15 = vpop.permute.xlu2 %1291 }
 0x27d   : > { %8378 = vst [vmem:[#allocation135_spill] sm:$0xff] %v5587_v15  ;;  %1425 = vrot.lane.b32.xlu1 %v539_v51, %s4430_s24  ;;  %v543_v15 = vld [vmem:[#allocation2 + $0x169] sm:$0xff] }
 0x27e   : > { %v5591_v32 = vpop.permute.xlu0 %1275 }
 0x27f   : > { %8380 = vst [vmem:[#allocation137_spill] sm:$0xff] %v5591_v32  ;;  %1427 = vrot.lane.b32.xlu2 %v540_v56, %s4430_s24  ;;  %v5598_v61 = vpop.permute.xlu1 %1277  ;;  %v547_v32 = vld [vmem:[#allocation2 + $0x199] sm:$0xff] }
 0x282   : > { %1429 = vrot.lane.b32.xlu0 %v541_v46, %s4430_s24 }
 0x284   : > { %v5596_v20 = vpop.permute.xlu2 %1297 }
 0x285   : > { %8381 = vst [vmem:[#allocation138_spill] sm:$0xff] %v5596_v20  ;;  %1431 = vrot.lane.b32.xlu1 %v542_v49, %s4430_s24  ;;  %v548_v20 = vld [vmem:[#allocation2 + $0x1a1] sm:$0xff] }
 0x286   : > { %v5600_v13 = vpop.permute.xlu0 %1281 }
 0x287   : > { %1433 = vrot.lane.b32.xlu2 %v543_v15, %s4430_s24  ;;  %v5607_v51 = vpop.permute.xlu1 %1283 }
 0x288   : > { %8383 = vst [vmem:[#allocation140_spill] sm:$0xff] %v5607_v51  ;;  %v557_v51 = vld [vmem:[#allocation2 + $0x92] sm:$0xff] }
 0x28a   : > { %1435 = vrot.lane.b32.xlu0 %v544_v48, %s4430_s24 }
 0x28c   : > { %v5605_v56 = vpop.permute.xlu2 %1303 }
 0x28d   : > { %8382 = vst [vmem:[#allocation139_spill] sm:$0xff] %v5605_v56  ;;  %1437 = vrot.lane.b32.xlu1 %v5265_v57, %s4430_s24  ;;  %v549_v56 = vld [vmem:[#allocation2 + $0x32] sm:$0xff] }
 0x28e   : > { %v5609_v46 = vpop.permute.xlu0 %1287 }
 0x28f   : > { %8384 = vst [vmem:[#allocation141_spill] sm:$0xff] %v5609_v46  ;;  %1439 = vrot.lane.b32.xlu2 %v5279_v26, %s4430_s24  ;;  %v5618_v49 = vpop.permute.xlu1 %1289  ;;  %v553_v46 = vld [vmem:[#allocation2 + $0x62] sm:$0xff] }
 0x290   : > { %8386 = vst [vmem:[#allocation143_spill] sm:$0xff] %v5618_v49  ;;  %v551_v49 = vld [vmem:[#allocation2 + $0x4a] sm:$0xff] }
 0x292   : > { %1441 = vrot.lane.b32.xlu0 %v547_v32, %s4430_s24 }
 0x294   : > { %v5616_v15 = vpop.permute.xlu2 %1309 }
 0x295   : > { %8385 = vst [vmem:[#allocation142_spill] sm:$0xff] %v5616_v15  ;;  %1443 = vrot.lane.b32.xlu1 %v548_v20, %s4430_s24  ;;  %v552_v15 = vld [vmem:[#allocation2 + $0x52] sm:$0xff] }
 0x296   : > { %v5620_v48 = vpop.permute.xlu0 %1293 }
 0x297   : > { %8387 = vst [vmem:[#allocation144_spill] sm:$0xff] %v5620_v48  ;;  %1509 = vrot.lane.b32.xlu2 %v549_v56, %s4431_s25  ;;  %v5627_v57 = vpop.permute.xlu1 %1295  ;;  %v554_v48 = vld [vmem:[#allocation2 + $0x6a] sm:$0xff] }
 0x29a   : > { %1511 = vrot.lane.b32.xlu0 %v550_v41, %s4431_s25 }
 0x29c   : > { %v5625_v26 = vpop.permute.xlu2 %1315 }
 0x29d   : > { %8388 = vst [vmem:[#allocation145_spill] sm:$0xff] %v5625_v26  ;;  %1513 = vrot.lane.b32.xlu1 %v551_v49, %s4431_s25  ;;  %v555_v26 = vld [vmem:[#allocation2 + $0x7a] sm:$0xff] }
 0x29e   : > { %v5629_v32 = vpop.permute.xlu0 %1299 }
 0x29f   : > { %8389 = vst [vmem:[#allocation146_spill] sm:$0xff] %v5629_v32  ;;  %1515 = vrot.lane.b32.xlu2 %v552_v15, %s4431_s25  ;;  %v5636_v20 = vpop.permute.xlu1 %1301  ;;  %v558_v32 = vld [vmem:[#allocation2 + $0x9a] sm:$0xff] }
 0x2a0   : > { %8390 = vst [vmem:[#allocation147_spill] sm:$0xff] %v5636_v20  ;;  %v559_v20 = vld [vmem:[#allocation2 + $0xaa] sm:$0xff] }
 0x2a2   : > { %1517 = vrot.lane.b32.xlu0 %v553_v46, %s4431_s25 }
 0x2a4   : > { %v5634_v56 = vpop.permute.xlu2 %1385 }
 0x2a5   : > { %1519 = vrot.lane.b32.xlu1 %v554_v48, %s4431_s25 }
 0x2a6   : > { %v5638_v41 = vpop.permute.xlu0 %1305 }
 0x2a7   : > { %8391 = vst [vmem:[#allocation148_spill] sm:$0xff] %v5638_v41  ;;  %1521 = vrot.lane.b32.xlu2 %v555_v26, %s4431_s25  ;;  %v5645_v49 = vpop.permute.xlu1 %1307  ;;  %v561_v41 = vld [vmem:[#allocation2 + $0xc2] sm:$0xff] }
 0x2a8   : > { %8392 = vst [vmem:[#allocation149_spill] sm:$0xff] %v5645_v49  ;;  %v562_v49 = vld [vmem:[#allocation2 + $0xca] sm:$0xff] }
 0x2aa   : > { %1523 = vrot.lane.b32.xlu0 %v556_v7, %s4431_s25 }
 0x2ac   : > { %v5643_v15 = vpop.permute.xlu2 %1391 }
 0x2ad   : > { %1525 = vrot.lane.b32.xlu1 %v557_v51, %s4431_s25 }
 0x2ae   : > { %v5647_v46 = vpop.permute.xlu0 %1311 }
 0x2af   : > { %8393 = vst [vmem:[#allocation150_spill] sm:$0xff] %v5647_v46  ;;  %1527 = vrot.lane.b32.xlu2 %v558_v32, %s4431_s25  ;;  %v5654_v48 = vpop.permute.xlu1 %1313  ;;  %v564_v46 = vld [vmem:[#allocation2 + $0xe2] sm:$0xff] }
 0x2b0   : > { %8395 = vst [vmem:[#allocation152_spill] sm:$0xff] %v5654_v48  ;;  %v565_v48 = vld [vmem:[#allocation2 + $0xf2] sm:$0xff] }
 0x2b2   : > { %1529 = vrot.lane.b32.xlu0 %v559_v20, %s4431_s25 }
 0x2b4   : > { %v5652_v26 = vpop.permute.xlu2 %1397 }
 0x2b5   : > { %8394 = vst [vmem:[#allocation151_spill] sm:$0xff] %v5652_v26  ;;  %1531 = vrot.lane.b32.xlu1 %v560_v24, %s4431_s25  ;;  %v563_v26 = vld [vmem:[#allocation2 + $0xda] sm:$0xff] }
 0x2b6   : > { %v5656_v7 = vpop.permute.xlu0 %1381 }
 0x2b7   : > { %1533 = vrot.lane.b32.xlu2 %v561_v41, %s4431_s25  ;;  %v5663_v51 = vpop.permute.xlu1 %1383 }
 0x2ba   : > { %1535 = vrot.lane.b32.xlu0 %v562_v49, %s4431_s25 }
 0x2bc   : > { %v5661_v32 = vpop.permute.xlu2 %1403 }
 0x2bd   : > { %8396 = vst [vmem:[#allocation153_spill] sm:$0xff] %v5661_v32  ;;  %1537 = vrot.lane.b32.xlu1 %v563_v26, %s4431_s25  ;;  %v567_v32 = vld [vmem:[#allocation2 + $0x10a] sm:$0xff] }
 0x2be   : > { %v5665_v20 = vpop.permute.xlu0 %1387 }
 0x2bf   : > { %1539 = vrot.lane.b32.xlu2 %v564_v46, %s4431_s25  ;;  %v5672_v24 = vpop.permute.xlu1 %1389 }
 0x2c2   : > { %1541 = vrot.lane.b32.xlu0 %v565_v48, %s4431_s25  ;;  %v1872_v48 = vld [vmem:[%s8165_s1 + $0x20] sm:$0xf] }
 0x2c3   : > { %4268 = vmatpush.msk.msra.mxu0 %vm1970_vm3, %v1872_v48  ;;  %4339 = vmatpush.msk.msra.mxu1 %vm1970_vm3, %v1872_v48 }
 0x2c4   : > { %v5670_v41 = vpop.permute.xlu2 %1409  ;;  %4340 = vmatpush.msk.msra.mxu3 %vm1970_vm3, %v1872_v48  ;;  %vm4001_vm3 = vcmask 523264  }
 0x2c5   : > { %1543 = vrot.lane.b32.xlu1 %v566_v50, %s4431_s25  ;;  %v1871_v50 = vld [vmem:[%s8165_s1 + $0x18] sm:$0xff] }
 0x2c6   : > { %v5674_v49 = vpop.permute.xlu0 %1393  ;;  %1986 = vmatpush.msra.mxu0 %v1871_v50  ;;  %4341 = vmatpush.msra.mxu1 %v1871_v50 }
 0x2c7   : > { %8397 = vst [vmem:[#allocation154_spill] sm:$0xff] %v5674_v49  ;;  %1545 = vrot.lane.b32.xlu2 %v567_v32, %s4431_s25  ;;  %v5681_v26 = vpop.permute.xlu1 %1395  ;;  %v569_v32 = vld [vmem:[#allocation2 + $0x122] sm:$0xff]  ;;  %4342 = vmatpush.msra.mxu3 %v1871_v50  ;;  %v575_v49 = vld [vmem:[#allocation2 + $0x16a] sm:$0xff] }
 0x2c8   : > { %8399 = vst [vmem:[#allocation156_spill] sm:$0xff] %v5681_v26 }
 0x2ca   : > { %1547 = vrot.lane.b32.xlu0 %v568_v11, %s4431_s25  ;;  %v1870_v11 = vld [vmem:[%s8165_s1 + $0x10] sm:$0xff] }
 0x2cb   : > { %1987 = vmatpush.msra.mxu0 %v1870_v11  ;;  %4343 = vmatpush.msra.mxu1 %v1870_v11 }
 0x2cc   : > { %v5679_v46 = vpop.permute.xlu2 %1415  ;;  %4344 = vmatpush.msra.mxu3 %v1870_v11 }
 0x2cd   : > { %8398 = vst [vmem:[#allocation155_spill] sm:$0xff] %v5679_v46  ;;  %v571_v46 = vld [vmem:[#allocation2 + $0x13a] sm:$0xff]  ;;  %1549 = vrot.lane.b32.xlu1 %v569_v32, %s4431_s25  ;;  %v572_v32 = vld [vmem:[#allocation2 + $0x142] sm:$0xff] }
 0x2ce   : > { %v5686_v45 = vpop.permute.xlu0 %1399 }
 0x2cf   : > { %8400 = vst [vmem:[#allocation157_spill] sm:$0xff] %v5686_v45  ;;  %v1869_v45 = vld [vmem:[%s8165_s1 + $0x8] sm:$0xff]  ;;  %1551 = vrot.lane.b32.xlu2 %v570_v31, %s4431_s25  ;;  %v5702_v48 = vpop.permute.xlu1 %1401  ;;  %v573_v31 = vld [vmem:[#allocation2 + $0x152] sm:$0xff] }
 0x2d0   : > { %1988 = vmatpush.msra.mxu0 %v1869_v45  ;;  %8402 = vst [vmem:[#allocation159_spill] sm:$0xff] %v5702_v48  ;;  %4345 = vmatpush.msra.mxu1 %v1869_v45  ;;  %v576_v48 = vld [vmem:[#allocation2 + $0x172] sm:$0xff] }
 0x2d1   : > { %4346 = vmatpush.msra.mxu3 %v1869_v45 }
 0x2d2   : > { %1553 = vrot.lane.b32.xlu0 %v571_v46, %s4431_s25  ;;  %1989 = vmatpush.msra.mxu0 %v1868_v55 }
 0x2d3   : > { %4347 = vmatpush.msra.mxu1 %v1868_v55  ;;  %4348 = vmatpush.msra.mxu3 %v1868_v55 }
 0x2d4   : > { %v5700_v26 = vpop.permute.xlu2 %1421 }
 0x2d5   : > { %8401 = vst [vmem:[#allocation158_spill] sm:$0xff] %v5700_v26  ;;  %1555 = vrot.lane.b32.xlu1 %v572_v32, %s4431_s25  ;;  %v580_v32 = vld [vmem:[#allocation2 + $0x1a2] sm:$0xff] }
 0x2d6   : > { %v5707_v50 = vpop.permute.xlu0 %1405 }
 0x2d7   : > { %1557 = vrot.lane.b32.xlu2 %v573_v31, %s4431_s25  ;;  %v5714_v26 = vpop.permute.xlu1 %1407  ;;  %v579_v31 = vld [vmem:[#allocation2 + $0x19a] sm:$0xff] }
 0x2da   : > { %1559 = vrot.lane.b32.xlu0 %v574_v19, %s4431_s25 }
 0x2dc   : > { %v5712_v46 = vpop.permute.xlu2 %1427 }
 0x2dd   : > { %8403 = vst [vmem:[#allocation160_spill] sm:$0xff] %v5712_v46  ;;  %1561 = vrot.lane.b32.xlu1 %v575_v49, %s4431_s25  ;;  %v292_v46 = vld [vmem:[#allocation2] sm:$0xff] }
 0x2de   : > { %v5716_v11 = vpop.permute.xlu0 %1411 }
 0x2df   : > { %8404 = vst [vmem:[#allocation161_spill] sm:$0xff] %v5716_v11  ;;  %1563 = vrot.lane.b32.xlu2 %v576_v48, %s4431_s25  ;;  %v5724_v45 = vpop.permute.xlu1 %1413 }
 0x2e0   : > { %8406 = vst [vmem:[#allocation163_spill] sm:$0xff] %v5724_v45 }
 0x2e2   : > { %1565 = vrot.lane.b32.xlu0 %v5401_v1, %s4431_s25  ;;  %v8410_v1 = vld [vmem:[#allocation6_spill] sm:$0xff] }
 0x2e4   : > { %v5722_v55 = vpop.permute.xlu2 %1433 }
 0x2e5   : > { %8405 = vst [vmem:[#allocation162_spill] sm:$0xff] %v5722_v55  ;;  %1567 = vrot.lane.b32.xlu1 %v5403_v2, %s4431_s25  ;;  %v1605_v55 = vsel %vm171_vm0, %v292_v46, %v8410_v1 }
 0x2e6   : > { %v5726_v19 = vpop.permute.xlu0 %1417 }
 0x2e7   : > { %8407 = vst [vmem:[#allocation164_spill] sm:$0xff] %v5726_v19  ;;  %1569 = vrot.lane.b32.xlu2 %v579_v31, %s4431_s25  ;;  %v5734_v48 = vpop.permute.xlu1 %1419  ;;  %v8411_v19 = vld [vmem:[#allocation35_spill] sm:$0xff] }
 0x2e8   : > { %8409 = vst [vmem:[#allocation166_spill] sm:$0xff] %v5734_v48  ;;  %v1638_v11 = vsel %vm1637_vm2, %v1605_v55, %v8411_v19 }
 0x2e9   : > { %v1671_v31 = vsel %vm1670_vm4, %v1638_v11, %v5201_v30 }
 0x2ea   : > { %1571 = vrot.lane.b32.xlu0 %v580_v32, %s4431_s25  ;;  %v1704_v2 = vsel %vm1703_vm6, %v1671_v31, %v5327_v12 }
 0x2eb   : > { %v1737_v32 = vsel %vm1736_vm5, %v1704_v2, %v5420_v8  ;;  %v293_v2 = vld [vmem:[#allocation2 + $0x8] sm:$0xff] }
 0x2ec   : > { %v5732_v49 = vpop.permute.xlu2 %1439  ;;  %v1770_v46 = vsel %vm1769_vm7, %v1737_v32, %v5562_v16 }
 0x2ed   : > { %8408 = vst [vmem:[#allocation165_spill] sm:$0xff] %v5732_v49  ;;  %v1803_v55 = vsel %vm1802_vm9, %v1770_v46, %v5656_v7  ;;  %v8417_v46 = vld [vmem:[#allocation10_spill] sm:$0xff] }
 0x2ee   : > { %v5738_v45 = vpop.permute.xlu0 %1423  ;;  %v1606_v49 = vsel %vm171_vm0, %v293_v2, %v8417_v46  ;;  %v4377_v2 = vld [vmem:[#allocation2 + $0x90] sm:$0xff]  ;;  %v8419_v46 = vld [vmem:[#allocation19_spill] sm:$0xff] }
 0x2ef   : > { %v5752_v1 = vpop.permute.xlu1 %1425 }
 0x2f4   : > { %v1510_v19 = vpop.permute.xlu2 %1509 }
 0x2f5   : > { %v1836_v30 = vsel %vm1835_vm8, %v1803_v55, %v1510_v19  ;;  %v8418_v55 = vld [vmem:[#allocation46_spill] sm:$0xff] }
 0x2f6   : > { %v5755_v11 = vpop.permute.xlu0 %1429  ;;  %4269 = vmatmul.msk.f32.vlgmr.msra.gmra.mxu0 %vm1873_vm10, %v1836_v30  ;;  %v1639_v19 = vsel %vm1637_vm2, %v1606_v49, %v8418_v55  ;;  %v1617_v49 = vsel %vm171_vm0, %v4377_v2, %v8419_v46 }
 0x2f7   : > { %8412 = vst [vmem:[#allocation6_spill] sm:$0xff] %v5755_v11  ;;  %v5758_v8 = vpop.permute.xlu1 %1431  ;;  %v1672_v30 = vsel %vm1670_vm4, %v1639_v19, %v5163_v44  ;;  %v8420_v19 = vld [vmem:[#allocation48_spill] sm:$0xff] }
 0x2f8   : > { %8413 = vst [vmem:[#allocation35_spill] sm:$0xff] %v5758_v8  ;;  %v1705_v8 = vsel %vm1703_vm6, %v1672_v30, %v5337_v14  ;;  %v1650_v14 = vsel %vm1637_vm2, %v1617_v49, %v8420_v19  ;;  %v8421_v30 = vld [vmem:[#allocation8_spill] sm:$0xff] }
 0x2fc   : > { %v1516_v12 = vpop.permute.xlu2 %1515 }
 0x2fe   : > { %v5760_v31 = vpop.permute.xlu0 %1435 }
 0x2ff   : > { %8414 = vst [vmem:[#allocation167_spill] sm:$0xff] %v5760_v31  ;;  %v5764_v32 = vpop.permute.xlu1 %1437  ;;  %v1738_v31 = vsel %vm1736_vm5, %v1705_v8, %v5452_v37  ;;  %v4378_v8 = vld [vmem:[#allocation2 + $0x18] sm:$0xff] }
 0x300   : > { %8415 = vst [vmem:[#allocation168_spill] sm:$0xff] %v5764_v32  ;;  %v1607_v11 = vsel %vm171_vm0, %v4378_v8, %v8421_v30 }
 0x304   : > { %v5762_v16 = vpop.permute.xlu2 %1521 }
 0x306   : > { %v5766_v7 = vpop.permute.xlu0 %1441 }
 0x307   : > { %8416 = vst [vmem:[#allocation169_spill] sm:$0xff] %v5766_v7  ;;  %v1771_v7 = vsel %vm1769_vm7, %v1738_v31, %v5533_v47  ;;  %v5782_v32 = vpop.permute.xlu1 %1443  ;;  %v1683_v47 = vsel %vm1670_vm4, %v1650_v14, %v5249_v52  ;;  %v8422_v31 = vld [vmem:[#allocation49_spill] sm:$0xff]  ;;  %v4379_v14 = vld [vmem:[#allocation2 + $0x20] sm:$0xff] }
 0x308   : > { %v1804_v44 = vsel %vm1802_vm9, %v1771_v7, %v5663_v51  ;;  %v1640_v2 = vsel %vm1637_vm2, %v1607_v11, %v8422_v31  ;;  %v1716_v51 = vsel %vm1703_vm6, %v1683_v47, %v5375_v62 }
 0x309   : > { %v1673_v7 = vsel %vm1670_vm4, %v1640_v2, %v5203_v34  ;;  %v1749_v46 = vsel %vm1736_vm5, %v1716_v51, %v5459_v54 }
 0x30a   : > { %v1706_v49 = vsel %vm1703_vm6, %v1673_v7, %v5299_v3  ;;  %v1782_v52 = vsel %vm1769_vm7, %v1749_v46, %v5598_v61 }
 0x30b   : > { %v1815_v11 = vsel %vm1802_vm9, %v1782_v52, %v5707_v50  ;;  %v8424_v50 = vld [vmem:[#allocation38_spill] sm:$0xff] }
 0x30c   : > { %v5778_v48 = vpop.permute.xlu2 %1527 }
 0x30e   : > { %v1512_v55 = vpop.permute.xlu0 %1511 }
 0x30f   : > { %v1837_v37 = vsel %vm1835_vm8, %v1804_v44, %v1512_v55  ;;  %v1739_v44 = vsel %vm1736_vm5, %v1706_v49, %v5461_v43  ;;  %v1514_v34 = vpop.permute.xlu1 %1513  ;;  %v8423_v43 = vld [vmem:[#allocation12_spill] sm:$0xff] }
 0x310   : > { %4270 = vmatmul.msk.f32.gmra.mxu0 %vm1873_vm10, %v1837_v37  ;;  %v1772_v62 = vsel %vm1769_vm7, %v1739_v44, %v5564_v39  ;;  %v1608_v37 = vsel %vm171_vm0, %v4379_v14, %v8423_v43  ;;  %v8425_v49 = vld [vmem:[#allocation4_spill] sm:$0xff]  ;;  %v4382_v14 = vld [vmem:[#allocation2 + $0x38] sm:$0xff]  ;;  %v8429_v43 = vld [vmem:[#allocation5_spill] sm:$0xff] }
 0x311   : > { %v1805_v54 = vsel %vm1802_vm9, %v1772_v62, %v5634_v56  ;;  %v1641_v39 = vsel %vm1637_vm2, %v1608_v37, %v8424_v50  ;;  %v4381_v62 = vld [vmem:[#allocation2 + $0xf8] sm:$0xff]  ;;  %v8430_v50 = vld [vmem:[#allocation22_spill] sm:$0xff] }
 0x312   : > { %v1838_v61 = vsel %vm1835_vm8, %v1805_v54, %v1514_v34  ;;  %v1674_v8 = vsel %vm1670_vm4, %v1641_v39, %v5213_v36  ;;  %v4380_v36 = vld [vmem:[#allocation2 + $0x30] sm:$0xff]  ;;  %v4383_v37 = vld [vmem:[#allocation2 + $0x98] sm:$0xff] }
 0x313   : > { %v1707_v56 = vsel %vm1703_vm6, %v1674_v8, %v5339_v18  ;;  %v1609_v18 = vsel %vm171_vm0, %v4380_v36, %v8425_v49  ;;  %v8427_v34 = vld [vmem:[#allocation34_spill] sm:$0xff]  ;;  %v1618_v39 = vsel %vm171_vm0, %v4383_v37, %v8430_v50 }
 0x314   : > { %v1534_v55 = vpop.permute.xlu2 %1533  ;;  %v1740_v30 = vsel %vm1736_vm5, %v1707_v56, %v5429_v60  ;;  %v8426_v60 = vld [vmem:[#allocation50_spill] sm:$0xff] }
 0x315   : > { %v1848_v19 = vsel %vm1835_vm8, %v1815_v11, %v1534_v55  ;;  %v1773_v31 = vsel %vm1769_vm7, %v1740_v30, %v5571_v28  ;;  %v1642_v52 = vsel %vm1637_vm2, %v1609_v18, %v8426_v60  ;;  %v8432_v30 = vld [vmem:[#allocation64_spill] sm:$0xff] }
 0x316   : > { %v1518_v3 = vpop.permute.xlu0 %1517  ;;  %4281 = vmatmul.msk.f32.vlgmr.msra.gmra.mxu1 %vm1873_vm10, %v1848_v19  ;;  %v1806_v51 = vsel %vm1802_vm9, %v1773_v31, %v5665_v20  ;;  %v1675_v28 = vsel %vm1670_vm4, %v1642_v52, %v5175_v4  ;;  %v1626_v19 = vsel %vm171_vm0, %v4381_v62, %v8427_v34  ;;  %v1651_v31 = vsel %vm1637_vm2, %v1618_v39, %v8432_v30  ;;  %v8436_v34 = vld [vmem:[#allocation68_spill] sm:$0xff]  ;;  %v8438_v39 = vld [vmem:[#allocation15_spill] sm:$0xff]  ;;  %v8441_v30 = vld [vmem:[#allocation54_spill] sm:$0xff] }
 0x317   : > { %v1520_v2 = vpop.permute.xlu1 %1519  ;;  %v1839_v46 = vsel %vm1835_vm8, %v1806_v51, %v1516_v12  ;;  %v1708_v44 = vsel %vm1703_vm6, %v1675_v28, %v5349_v22  ;;  %v8428_v22 = vld [vmem:[#allocation62_spill] sm:$0xff]  ;;  %v1684_v51 = vsel %vm1670_vm4, %v1651_v31, %v5211_v35  ;;  %v4384_v28 = vld [vmem:[#allocation2 + $0xa8] sm:$0xff] }
 0x318   : > { %4271 = vmatmul.msk.f32.gmra.mxu0 %vm1873_vm10, %v1838_v61  ;;  %v1741_v20 = vsel %vm1736_vm5, %v1708_v44, %v5463_v25  ;;  %v1659_v61 = vsel %vm1637_vm2, %v1626_v19, %v8428_v22  ;;  %v1717_v49 = vsel %vm1703_vm6, %v1684_v51, %v5385_v0  ;;  %v8433_v44 = vld [vmem:[#allocation11_spill] sm:$0xff]  ;;  %v8442_v31 = vld [vmem:[#allocation81_spill] sm:$0xff]  ;;  %v8443_v51 = vld [vmem:[#allocation92_spill] sm:$0xff] }
 0x319   : > { %v1774_v12 = vsel %vm1769_vm7, %v1741_v20, %v5542_v59  ;;  %v1610_v59 = vsel %vm171_vm0, %v4382_v14, %v8429_v43  ;;  %v1692_v8 = vsel %vm1670_vm4, %v1659_v61, %v5289_v63  ;;  %v1750_v35 = vsel %vm1736_vm5, %v1717_v49, %v5496_v33  ;;  %v4385_v20 = vld [vmem:[#allocation2 + $0x48] sm:$0xff]  ;;  %v8445_v49 = vld [vmem:[#allocation24_spill] sm:$0xff] }
 0x31a   : > { %v1807_v4 = vsel %vm1802_vm9, %v1774_v12, %v5672_v24  ;;  %v8431_v24 = vld [vmem:[#allocation53_spill] sm:$0xff] }
 0x31b   : > { %v1840_v25 = vsel %vm1835_vm8, %v1807_v4, %v1518_v3  ;;  %v1643_v56 = vsel %vm1637_vm2, %v1610_v59, %v8431_v24  ;;  %v1725_v3 = vsel %vm1703_vm6, %v1692_v8, %v5415_v6  ;;  %v8434_v12 = vld [vmem:[#allocation13_spill] sm:$0xff]  ;;  %v4387_v8 = vld [vmem:[#allocation2 + $0xb0] sm:$0xff]  ;;  %v8439_v24 = vld [vmem:[#allocation23_spill] sm:$0xff] }
 0x31c   : > { %v5830_v47 = vpop.permute.xlu2 %1539  ;;  %v1758_v63 = vsel %vm1736_vm5, %v1725_v3, %v5492_v38  ;;  %v1783_v38 = vsel %vm1769_vm7, %v1750_v35, %v5569_v21  ;;  %v1611_v62 = vsel %vm171_vm0, %v4385_v20, %v8434_v12  ;;  %v4388_v12 = vld [vmem:[#allocation2 + $0x60] sm:$0xff] }
 0x31d   : > { %v1791_v18 = vsel %vm1769_vm7, %v1758_v63, %v5627_v57  ;;  %v1816_v33 = vsel %vm1802_vm9, %v1783_v38, %v5714_v26  ;;  %v8444_v63 = vld [vmem:[#allocation107_spill] sm:$0xff]  ;;  %v8448_v38 = vld [vmem:[#allocation129_spill] sm:$0xff] }
 0x31e   : > { %v5836_v7 = vpop.permute.xlu0 %1523 }
 0x31f   : > { %v5854_v55 = vpop.permute.xlu1 %1525 }
 0x320   : > { %4272 = vmatmul.msk.f32.gmra.mxu0 %vm1873_vm10, %v1839_v46  ;;  %v1676_v46 = vsel %vm1670_vm4, %v1643_v56, %v5215_v40  ;;  %v1824_v40 = vsel %vm1802_vm9, %v1791_v18, %v5738_v45 }
 0x321   : > { %v1709_v36 = vsel %vm1703_vm6, %v1676_v46, %v5311_v9 }
 0x322   : > { %v1742_v6 = vsel %vm1736_vm5, %v1709_v36, %v5472_v23 }
 0x323   : > { %v1775_v9 = vsel %vm1769_vm7, %v1742_v6, %v5573_v5  ;;  %v1619_v5 = vsel %vm171_vm0, %v4384_v28, %v8433_v44  ;;  %v8446_v6 = vld [vmem:[#allocation51_spill] sm:$0xff] }
 0x324   : > { %v5850_v11 = vpop.permute.xlu2 %1545  ;;  %v1808_v23 = vsel %vm1802_vm9, %v1775_v9, %v5643_v15  ;;  %v8435_v15 = vld [vmem:[#allocation41_spill] sm:$0xff] }
 0x325   : > { %v1841_v45 = vsel %vm1835_vm8, %v1808_v23, %v1520_v2  ;;  %v1644_v26 = vsel %vm1637_vm2, %v1611_v62, %v8435_v15  ;;  %v1652_v2 = vsel %vm1637_vm2, %v1619_v5, %v8436_v34  ;;  %v8452_v62 = vld [vmem:[#allocation7_spill] sm:$0xff] }
 0x326   : > { %v5860_v54 = vpop.permute.xlu0 %1529  ;;  %v1677_v19 = vsel %vm1670_vm4, %v1644_v26, %v5225_v42  ;;  %v1685_v4 = vsel %vm1670_vm4, %v1652_v2, %v5251_v53  ;;  %v1613_v15 = vsel %vm171_vm0, %v4388_v12, %v8452_v62  ;;  %v4389_v26 = vld [vmem:[#allocation2 + $0xc0] sm:$0xff]  ;;  %v8453_v34 = vld [vmem:[#allocation27_spill] sm:$0xff]  ;;  %v8474_v62 = vld [vmem:[#allocation21_spill] sm:$0xff] }
 0x327   : > { %v5900_v0 = vpop.permute.xlu1 %1531  ;;  %v1718_v22 = vsel %vm1703_vm6, %v1685_v4, %v5347_v29  ;;  %v1710_v61 = vsel %vm1703_vm6, %v1677_v19, %v5351_v27  ;;  %v8437_v29 = vld [vmem:[#allocation154_spill] sm:$0xff]  ;;  %v1621_v2 = vsel %vm171_vm0, %v4389_v26, %v8453_v34  ;;  %v4390_v19 = vld [vmem:[#allocation2 + $0x108] sm:$0xff]  ;;  %v8454_v4 = vld [vmem:[#allocation36_spill] sm:$0xff] }
 0x328   : > { %4273 = vmatmul.msk.f32.gmra.mxu0 %vm1873_vm10, %v1840_v25  ;;  %v1743_v25 = vsel %vm1736_vm5, %v1710_v61, %v5438_v17  ;;  %v1751_v14 = vsel %vm1736_vm5, %v1718_v22, %v5505_v10  ;;  %v4386_v10 = vld [vmem:[#allocation2 + $0x50] sm:$0xff]  ;;  %v1627_v22 = vsel %vm171_vm0, %v4390_v19, %v8454_v4  ;;  %v8476_v26 = vld [vmem:[#allocation71_spill] sm:$0xff]  ;;  %v8478_v4 = vld [vmem:[#allocation88_spill] sm:$0xff] }
 0x329   : > { %v1776_v43 = vsel %vm1769_vm7, %v1743_v25, %v5580_v58  ;;  %v1784_v42 = vsel %vm1769_vm7, %v1751_v14, %v5600_v13  ;;  %v1612_v58 = vsel %vm171_vm0, %v4386_v10, %v8438_v39  ;;  %v1620_v13 = vsel %vm171_vm0, %v4387_v8, %v8439_v24  ;;  %v8457_v14 = vld [vmem:[#allocation76_spill] sm:$0xff]  ;;  %v8462_v39 = vld [vmem:[#allocation25_spill] sm:$0xff] }
 0x32a   : > { %v1817_v53 = vsel %vm1802_vm9, %v1784_v42, %v5670_v41  ;;  %v1809_v37 = vsel %vm1802_vm9, %v1776_v43, %v8437_v29  ;;  %v8440_v41 = vld [vmem:[#allocation52_spill] sm:$0xff]  ;;  %v1660_v43 = vsel %vm1637_vm2, %v1627_v22, %v8457_v14  ;;  %v8458_v42 = vld [vmem:[#allocation85_spill] sm:$0xff]  ;;  %v8481_v14 = vld [vmem:[#allocation106_spill] sm:$0xff] }
 0x32b   : > { %v1842_v17 = vsel %vm1835_vm8, %v1809_v37, %v5762_v16  ;;  %v1653_v56 = vsel %vm1637_vm2, %v1620_v13, %v8440_v41  ;;  %v1645_v16 = vsel %vm1637_vm2, %v1612_v58, %v8441_v30  ;;  %v8460_v37 = vld [vmem:[#allocation90_spill] sm:$0xff]  ;;  %v8463_v8 = vld [vmem:[#allocation112_spill] sm:$0xff] }
 0x32c   : > { %v1552_v60 = vpop.permute.xlu2 %1551  ;;  %v1678_v3 = vsel %vm1670_vm4, %v1645_v16, %v8442_v31  ;;  %v1686_v46 = vsel %vm1670_vm4, %v1653_v56, %v8443_v51  ;;  %v8464_v13 = vld [vmem:[#allocation60_spill] sm:$0xff]  ;;  %v8465_v56 = vld [vmem:[#allocation66_spill] sm:$0xff] }
 0x32d   : > { %v1857_v57 = vsel %vm1835_vm8, %v1824_v40, %v1552_v60  ;;  %v1711_v36 = vsel %vm1703_vm6, %v1678_v3, %v8444_v63  ;;  %v1719_v18 = vsel %vm1703_vm6, %v1686_v46, %v8445_v49  ;;  %v8447_v40 = vld [vmem:[#allocation55_spill] sm:$0xff]  ;;  %v8466_v16 = vld [vmem:[#allocation124_spill] sm:$0xff]  ;;  %v8467_v3 = vld [vmem:[#allocation133_spill] sm:$0xff] }
 0x32e   : > { %v1536_v52 = vpop.permute.xlu0 %1535  ;;  %4290 = vmatmul.msk.f32.vlgmr.msra.gmra.mxu3 %vm1873_vm10, %v1857_v57  ;;  %v1752_v35 = vsel %vm1736_vm5, %v1719_v18, %v8446_v6  ;;  %v1744_v60 = vsel %vm1736_vm5, %v1711_v36, %v8447_v40  ;;  %v8449_v57 = vld [vmem:[#allocation140_spill] sm:$0xff]  ;;  %v8468_v46 = vld [vmem:[#allocation134_spill] sm:$0xff]  ;;  %v8470_v6 = vld [vmem:[#allocation151_spill] sm:$0xff] }
 0x32f   : > { %v1849_v21 = vsel %vm1835_vm8, %v1816_v33, %v1536_v52  ;;  %v1538_v59 = vpop.permute.xlu1 %1537  ;;  %v1777_v9 = vsel %vm1769_vm7, %v1744_v60, %v8448_v38  ;;  %v1785_v23 = vsel %vm1769_vm7, %v1752_v35, %v8449_v57  ;;  %v8450_v52 = vld [vmem:[#allocation156_spill] sm:$0xff]  ;;  %v8469_v36 = vld [vmem:[#allocation138_spill] sm:$0xff]  ;;  %v8471_v40 = vld [vmem:[#allocation163_spill] sm:$0xff] }
 0x330   : > { %4274 = vmatmul.msk.f32.gmra.mxu0 %vm1873_vm10, %v1841_v45  ;;  %4282 = vmatmul.msk.f32.gmra.mxu1 %vm1873_vm10, %v1849_v21  ;;  %v1850_v50 = vsel %vm1835_vm8, %v1817_v53, %v1538_v59  ;;  %v1810_v45 = vsel %vm1802_vm9, %v1777_v9, %v8450_v52  ;;  %v8451_v21 = vld [vmem:[#allocation161_spill] sm:$0xff]  ;;  %v8459_v53 = vld [vmem:[#allocation86_spill] sm:$0xff] }
 0x331   : > { %v1818_v28 = vsel %vm1802_vm9, %v1785_v23, %v8451_v21  ;;  %v1843_v5 = vsel %vm1835_vm8, %v1810_v45, %v5836_v7  ;;  %v8455_v7 = vld [vmem:[#allocation58_spill] sm:$0xff]  ;;  %v4391_v45 = vld [vmem:[#allocation2 + $0xc8] sm:$0xff] }
 0x332   : > { %v1851_v20 = vsel %vm1835_vm8, %v1818_v28, %v5830_v47  ;;  %v1646_v61 = vsel %vm1637_vm2, %v1613_v15, %v8455_v7  ;;  %v8456_v47 = vld [vmem:[#allocation69_spill] sm:$0xff]  ;;  %v8472_v21 = vld [vmem:[#allocation14_spill] sm:$0xff]  ;;  %v8475_v15 = vld [vmem:[#allocation44_spill] sm:$0xff] }
 0x333   : > { %v1654_v25 = vsel %vm1637_vm2, %v1621_v2, %v8456_v47  ;;  %v1679_v29 = vsel %vm1670_vm4, %v1646_v61, %v8459_v53  ;;  %v1622_v28 = vsel %vm171_vm0, %v4391_v45, %v8472_v21  ;;  %v8477_v2 = vld [vmem:[#allocation77_spill] sm:$0xff]  ;;  %v8480_v47 = vld [vmem:[#allocation98_spill] sm:$0xff]  ;;  %v8483_v53 = vld [vmem:[#allocation20_spill] sm:$0xff] }
 0x334   : > { %v1687_v59 = vsel %vm1670_vm4, %v1654_v25, %v8458_v42  ;;  %v1655_v34 = vsel %vm1637_vm2, %v1622_v28, %v8476_v26  ;;  %v8479_v7 = vld [vmem:[#allocation93_spill] sm:$0xff]  ;;  %v8482_v42 = vld [vmem:[#allocation108_spill] sm:$0xff]  ;;  %v8497_v28 = vld [vmem:[#allocation59_spill] sm:$0xff] }
 0x335   : > { %v1720_v58 = vsel %vm1703_vm6, %v1687_v59, %v8462_v39  ;;  %v1688_v61 = vsel %vm1670_vm4, %v1655_v34, %v8479_v7  ;;  %v8486_v39 = vld [vmem:[#allocation125_spill] sm:$0xff]  ;;  %v8502_v34 = vld [vmem:[#allocation110_spill] sm:$0xff] }
 0x336   : > { %v1542_v27 = vpop.permute.xlu0 %1541  ;;  %v1753_v30 = vsel %vm1736_vm5, %v1720_v58, %v8465_v56  ;;  %v8495_v45 = vld [vmem:[#allocation37_spill] sm:$0xff] }
 0x337   : > { %v5969_v33 = vpop.permute.xlu1 %1543  ;;  %v1786_v51 = vsel %vm1769_vm7, %v1753_v30, %v8467_v3  ;;  %v8489_v30 = vld [vmem:[#allocation146_spill] sm:$0xff]  ;;  %v8496_v21 = vld [vmem:[#allocation57_spill] sm:$0xff] }
 0x338   : > { %4275 = vmatmul.msk.f32.gmra.mxu0 %vm1873_vm10, %v1842_v17  ;;  %4283 = vmatmul.msk.f32.gmra.mxu1 %vm1873_vm10, %v1850_v50  ;;  %v1693_v17 = vsel %vm1670_vm4, %v1660_v43, %v8460_v37  ;;  %v8461_v50 = vld [vmem:[#allocation103_spill] sm:$0xff]  ;;  %v1819_v60 = vsel %vm1802_vm9, %v1786_v51, %v8471_v40  ;;  %v1721_v43 = vsel %vm1703_vm6, %v1688_v61, %v8481_v14  ;;  %v8491_v51 = vld [vmem:[#allocation157_spill] sm:$0xff]  ;;  %v8493_v40 = vld [vmem:[#allocation18_spill] sm:$0xff] }
 0x339   : > { %v1712_v10 = vsel %vm1703_vm6, %v1679_v29, %v8461_v50  ;;  %v1726_v24 = vsel %vm1703_vm6, %v1693_v17, %v8463_v8  ;;  %v1852_v23 = vsel %vm1835_vm8, %v1819_v60, %v1542_v27  ;;  %v8484_v37 = vld [vmem:[#allocation47_spill] sm:$0xff]  ;;  %v8485_v50 = vld [vmem:[#allocation120_spill] sm:$0xff] }
 0x33a   : > { %v1745_v41 = vsel %vm1736_vm5, %v1712_v10, %v8464_v13  ;;  %v1759_v31 = vsel %vm1736_vm5, %v1726_v24, %v8466_v16  ;;  %v1754_v10 = vsel %vm1736_vm5, %v1721_v43, %v8485_v50  ;;  %v8487_v8 = vld [vmem:[#allocation136_spill] sm:$0xff]  ;;  %v8488_v13 = vld [vmem:[#allocation141_spill] sm:$0xff]  ;;  %v8510_v50 = vld [vmem:[#allocation147_spill] sm:$0xff] }
 0x33b   : > { %v1778_v63 = vsel %vm1769_vm7, %v1745_v41, %v8468_v46  ;;  %v1792_v49 = vsel %vm1769_vm7, %v1759_v31, %v8469_v36  ;;  %v1787_v41 = vsel %vm1769_vm7, %v1754_v10, %v8488_v13  ;;  %v8490_v31 = vld [vmem:[#allocation155_spill] sm:$0xff]  ;;  %v8505_v61 = vld [vmem:[#allocation56_spill] sm:$0xff]  ;;  %v8507_v43 = vld [vmem:[#allocation65_spill] sm:$0xff] }
 0x33c   : > { %v1811_v35 = vsel %vm1802_vm9, %v1778_v63, %v8470_v6  ;;  %v1825_v38 = vsel %vm1802_vm9, %v1792_v49, %v5752_v1  ;;  %v4393_v1 = vld [vmem:[#allocation2 + $0x110] sm:$0xff]  ;;  %v1820_v3 = vsel %vm1802_vm9, %v1787_v41, %v8490_v31  ;;  %v8492_v63 = vld [vmem:[#allocation160_spill] sm:$0xff]  ;;  %v8514_v31 = vld [vmem:[#allocation9_spill] sm:$0xff] }
 0x33d   : > { %v1844_v57 = vsel %vm1835_vm8, %v1811_v35, %v5854_v55  ;;  %v1628_v55 = vsel %vm171_vm0, %v4393_v1, %v8474_v62  ;;  %v1853_v6 = vsel %vm1835_vm8, %v1820_v3, %v5969_v33  ;;  %v4394_v35 = vld [vmem:[#allocation2 + $0x78] sm:$0xff]  ;;  %v8499_v1 = vld [vmem:[#allocation84_spill] sm:$0xff]  ;;  %v8513_v13 = vld [vmem:[#allocation6_spill] sm:$0xff] }
 0x33e   : > { %v5975_v44 = vpop.permute.xlu0 %1547  ;;  %v1661_v19 = vsel %vm1637_vm2, %v1628_v55, %v8477_v2  ;;  %v1615_v60 = vsel %vm171_vm0, %v4394_v35, %v8493_v40  ;;  %v8500_v55 = vld [vmem:[#allocation95_spill] sm:$0xff]  ;;  %v8518_v40 = vld [vmem:[#allocation72_spill] sm:$0xff] }
 0x33f   : > { %v6019_v18 = vpop.permute.xlu1 %1549  ;;  %v1694_v25 = vsel %vm1670_vm4, %v1661_v19, %v8480_v47  ;;  %v8503_v19 = vld [vmem:[#allocation29_spill] sm:$0xff]  ;;  %v8517_v35 = vld [vmem:[#allocation63_spill] sm:$0xff] }
 0x340   : > { %4276 = vmatmul.msk.f32.gmra.mxu0 %vm1873_vm10, %v1843_v5  ;;  %4284 = vmatmul.msk.f32.gmra.mxu1 %vm1873_vm10, %v1851_v20  ;;  %v4392_v5 = vld [vmem:[#allocation2 + $0x68] sm:$0xff]  ;;  %v8473_v20 = vld [vmem:[#allocation16_spill] sm:$0xff]  ;;  %v1727_v29 = vsel %vm1703_vm6, %v1694_v25, %v8483_v53  ;;  %v8506_v25 = vld [vmem:[#allocation119_spill] sm:$0xff] }
 0x341   : > { %v1614_v12 = vsel %vm171_vm0, %v4392_v5, %v8473_v20  ;;  %v1760_v58 = vsel %vm1736_vm5, %v1727_v29, %v8486_v39  ;;  %v1648_v5 = vsel %vm1637_vm2, %v1615_v60, %v8497_v28  ;;  %v8498_v20 = vld [vmem:[#allocation67_spill] sm:$0xff] }
 0x342   : > { %v1647_v27 = vsel %vm1637_vm2, %v1614_v12, %v8475_v15  ;;  %v1793_v16 = vsel %vm1769_vm7, %v1760_v58, %v8489_v30  ;;  %v1681_v62 = vsel %vm1670_vm4, %v1648_v5, %v8499_v1  ;;  %v8509_v29 = vld [vmem:[#allocation143_spill] sm:$0xff] }
 0x343   : > { %v1680_v22 = vsel %vm1670_vm4, %v1647_v27, %v8478_v4  ;;  %v1826_v36 = vsel %vm1802_vm9, %v1793_v16, %v8492_v63  ;;  %v8501_v27 = vld [vmem:[#allocation99_spill] sm:$0xff]  ;;  %v1714_v2 = vsel %vm1703_vm6, %v1681_v62, %v8502_v34  ;;  %v4397_v16 = vld [vmem:[#allocation2 + $0x80] sm:$0xff]  ;;  %v8526_v62 = vld [vmem:[#allocation61_spill] sm:$0xff] }
 0x344   : > { %v1713_v59 = vsel %vm1703_vm6, %v1680_v22, %v8482_v42  ;;  %v8504_v22 = vld [vmem:[#allocation113_spill] sm:$0xff]  ;;  %v1747_v14 = vsel %vm1736_vm5, %v1714_v2, %v8506_v25  ;;  %v8511_v39 = vld [vmem:[#allocation159_spill] sm:$0xff]  ;;  %v1616_v3 = vsel %vm171_vm0, %v4397_v16, %v8514_v31  ;;  %v8540_v16 = vld [vmem:[#allocation100_spill] sm:$0xff] }
 0x345   : > { %v1746_v17 = vsel %vm1736_vm5, %v1713_v59, %v8484_v37  ;;  %v8508_v59 = vld [vmem:[#allocation132_spill] sm:$0xff]  ;;  %v8524_v5 = vld [vmem:[#allocation111_spill] sm:$0xff]  ;;  %v8532_v25 = vld [vmem:[#allocation153_spill] sm:$0xff] }
 0x346   : > { %v1554_v9 = vpop.permute.xlu0 %1553  ;;  %v1779_v24 = vsel %vm1769_vm7, %v1746_v17, %v8487_v8  ;;  %v1780_v53 = vsel %vm1769_vm7, %v1747_v14, %v8508_v59  ;;  %v1558_v17 = vpop.permute.xlu2 %1557  ;;  %v8512_v8 = vld [vmem:[#allocation164_spill] sm:$0xff]  ;;  %v8529_v2 = vld [vmem:[#allocation135_spill] sm:$0xff] }
 0x347   : > { %v1858_v52 = vsel %vm1835_vm8, %v1825_v38, %v1554_v9  ;;  %v1556_v56 = vpop.permute.xlu1 %1555  ;;  %v1812_v46 = vsel %vm1802_vm9, %v1779_v24, %v8491_v51  ;;  %v4395_v38 = vld [vmem:[#allocation2 + $0xd8] sm:$0xff]  ;;  %v8494_v9 = vld [vmem:[#allocation28_spill] sm:$0xff]  ;;  %v1813_v58 = vsel %vm1802_vm9, %v1780_v53, %v8511_v39 }
 0x348   : > { %4277 = vmatmul.msk.f32.gmra.mxu0 %vm1873_vm10, %v1844_v57  ;;  %4285 = vmatmul.msk.f32.gmra.mxu1 %vm1873_vm10, %v1852_v23  ;;  %v1845_v49 = vsel %vm1835_vm8, %v1812_v46, %v5778_v48  ;;  %v1623_v57 = vsel %vm171_vm0, %v4395_v38, %v8494_v9  ;;  %v1859_v23 = vsel %vm1835_vm8, %v1826_v36, %v1556_v56  ;;  %v4398_v51 = vld [vmem:[#allocation2 + $0xe0] sm:$0xff]  ;;  %v8515_v46 = vld [vmem:[#allocation33_spill] sm:$0xff]  ;;  %v8519_v38 = vld [vmem:[#allocation78_spill] sm:$0xff] }
 0x349   : > { %4291 = vmatmul.msk.f32.gmra.mxu3 %vm1873_vm10, %v1858_v52  ;;  %v4396_v52 = vld [vmem:[#allocation2 + $0x120] sm:$0xff]  ;;  %v1656_v33 = vsel %vm1637_vm2, %v1623_v57, %v8496_v21  ;;  %v1846_v56 = vsel %vm1835_vm8, %v1813_v58, %v5860_v54  ;;  %v1624_v63 = vsel %vm171_vm0, %v4398_v51, %v8515_v46  ;;  %v8520_v57 = vld [vmem:[#allocation87_spill] sm:$0xff]  ;;  %v8542_v46 = vld [vmem:[#allocation30_spill] sm:$0xff] }
 0x34a   : > { %v1629_v48 = vsel %vm171_vm0, %v4396_v52, %v8495_v45  ;;  %v1689_v15 = vsel %vm1670_vm4, %v1656_v33, %v8500_v55  ;;  %v1657_v60 = vsel %vm1637_vm2, %v1624_v63, %v8518_v40  ;;  %v8521_v52 = vld [vmem:[#allocation89_spill] sm:$0xff]  ;;  %v8534_v59 = vld [vmem:[#allocation35_spill] sm:$0xff] }
 0x34b   : > { %v1662_v12 = vsel %vm1637_vm2, %v1629_v48, %v8498_v20  ;;  %v1722_v4 = vsel %vm1703_vm6, %v1689_v15, %v8503_v19  ;;  %v8522_v48 = vld [vmem:[#allocation91_spill] sm:$0xff]  ;;  %v8523_v33 = vld [vmem:[#allocation105_spill] sm:$0xff] }
 0x34c   : > { %v1695_v26 = vsel %vm1670_vm4, %v1662_v12, %v8501_v27  ;;  %v1755_v47 = vsel %vm1736_vm5, %v1722_v4, %v8505_v61  ;;  %v8525_v12 = vld [vmem:[#allocation114_spill] sm:$0xff]  ;;  %v8527_v15 = vld [vmem:[#allocation121_spill] sm:$0xff]  ;;  %v8531_v61 = vld [vmem:[#allocation139_spill] sm:$0xff] }
 0x34d   : > { %v1728_v7 = vsel %vm1703_vm6, %v1695_v26, %v8504_v22  ;;  %v1788_v37 = vsel %vm1769_vm7, %v1755_v47, %v8509_v29  ;;  %v8528_v26 = vld [vmem:[#allocation126_spill] sm:$0xff]  ;;  %v8530_v4 = vld [vmem:[#allocation137_spill] sm:$0xff]  ;;  %v4401_v58 = vld [vmem:[#allocation2 + $0x138] sm:$0xff] }
 0x34e   : > { %v1761_v42 = vsel %vm1736_vm5, %v1728_v7, %v8507_v43  ;;  %v1821_v24 = vsel %vm1802_vm9, %v1788_v37, %v8512_v8  ;;  %v1560_v7 = vpop.permute.xlu0 %1559  ;;  %v8533_v43 = vld [vmem:[#allocation166_spill] sm:$0xff] }
 0x34f   : > { %v1794_v10 = vsel %vm1769_vm7, %v1761_v42, %v8510_v50  ;;  %v1854_v30 = vsel %vm1835_vm8, %v1821_v24, %v5850_v11  ;;  %v1649_v11 = vsel %vm1637_vm2, %v1616_v3, %v8517_v35  ;;  %v8535_v50 = vld [vmem:[#allocation17_spill] sm:$0xff]  ;;  %v8536_v8 = vld [vmem:[#allocation26_spill] sm:$0xff]  ;;  %v8545_v35 = vld [vmem:[#allocation144_spill] sm:$0xff]  ;;  %v1562_v40 = vpop.permute.xlu1 %1561 }
 0x350   : > { %4278 = vmatmul.msk.f32.gmra.mxu0 %vm1873_vm10, %v1845_v49  ;;  %4286 = vmatmul.msk.f32.gmra.mxu1 %vm1873_vm10, %v1853_v6  ;;  %v1827_v41 = vsel %vm1802_vm9, %v1794_v10, %v8513_v13  ;;  %v4399_v49 = vld [vmem:[#allocation2 + $0x128] sm:$0xff]  ;;  %v8516_v6 = vld [vmem:[#allocation39_spill] sm:$0xff]  ;;  %v1682_v45 = vsel %vm1670_vm4, %v1649_v11, %v8521_v52  ;;  %v1631_v24 = vsel %vm171_vm0, %v4401_v58, %v8536_v8 }
 0x351   : > { %4292 = vmatmul.msk.f32.gmra.mxu3 %vm1873_vm10, %v1859_v23  ;;  %v1860_v36 = vsel %vm1835_vm8, %v1827_v41, %v1558_v17  ;;  %v1630_v54 = vsel %vm171_vm0, %v4399_v49, %v8516_v6  ;;  %v1690_v23 = vsel %vm1670_vm4, %v1657_v60, %v8520_v57  ;;  %v1715_v28 = vsel %vm1703_vm6, %v1682_v45, %v8523_v33  ;;  %v4400_v17 = vld [vmem:[#allocation2 + $0xf0] sm:$0xff]  ;;  %v8537_v13 = vld [vmem:[#allocation75_spill] sm:$0xff]  ;;  %v8541_v3 = vld [vmem:[#allocation109_spill] sm:$0xff] }
 0x352   : > { %v1663_v9 = vsel %vm1637_vm2, %v1630_v54, %v8519_v38  ;;  %v1723_v20 = vsel %vm1703_vm6, %v1690_v23, %v8524_v5  ;;  %v1748_v55 = vsel %vm1736_vm5, %v1715_v28, %v8526_v62  ;;  %v1625_v10 = vsel %vm171_vm0, %v4400_v17, %v8535_v50  ;;  %v8544_v6 = vld [vmem:[#allocation127_spill] sm:$0xff]  ;;  %v8546_v60 = vld [vmem:[#allocation148_spill] sm:$0xff]  ;;  %v8548_v23 = vld [vmem:[#allocation162_spill] sm:$0xff] }
 0x353   : > { %v1696_v21 = vsel %vm1670_vm4, %v1663_v9, %v8522_v48  ;;  %v1756_v27 = vsel %vm1736_vm5, %v1723_v20, %v8527_v15  ;;  %v1781_v22 = vsel %vm1769_vm7, %v1748_v55, %v8530_v4  ;;  %v8547_v9 = vld [vmem:[#allocation158_spill] sm:$0xff]  ;;  %v8549_v33 = vld [vmem:[#allocation40_spill] sm:$0xff]  ;;  %v8552_v62 = vld [vmem:[#allocation115_spill] sm:$0xff] }
 0x354   : > { %v1729_v1 = vsel %vm1703_vm6, %v1696_v21, %v8525_v12  ;;  %v1789_v19 = vsel %vm1769_vm7, %v1756_v27, %v8529_v2  ;;  %v1814_v14 = vsel %vm1802_vm9, %v1781_v22, %v8532_v25  ;;  %v4402_v21 = vld [vmem:[#allocation2 + $0x140] sm:$0xff]  ;;  %v8550_v5 = vld [vmem:[#allocation70_spill] sm:$0xff]  ;;  %v8551_v12 = vld [vmem:[#allocation101_spill] sm:$0xff]  ;;  %v1564_v27 = vpop.permute.xlu2 %1563  ;;  %v8556_v22 = vmov 0.0  }
 0x355   : > { %v1762_v34 = vsel %vm1736_vm5, %v1729_v1, %v8528_v26  ;;  %v1822_v42 = vsel %vm1802_vm9, %v1789_v19, %v8533_v43  ;;  %v1847_v29 = vsel %vm1835_vm8, %v1814_v14, %v5900_v0  ;;  %v1658_v0 = vsel %vm1637_vm2, %v1625_v10, %v8537_v13  ;;  %v8554_v26 = vld [vmem:[#allocation149_spill] sm:$0xff]  ;;  %v8555_v2 = vld [vmem:[#allocation167_spill] sm:$0xff]  ;;  %2379 = vst.msk [vmem:[#allocation3 + $0x28] sm:$0x3] %vm2375_vm11, %v8556_v22  ;;  %v8558_v25 = vld [vmem:[#allocation80_spill] sm:$0xff] }
 0x356   : > { %v1795_v47 = vsel %vm1769_vm7, %v1762_v34, %v8531_v61  ;;  %v1855_v37 = vsel %vm1835_vm8, %v1822_v42, %v5975_v44  ;;  %v8538_v44 = vld [vmem:[#allocation79_spill] sm:$0xff]  ;;  %v1632_v28 = vsel %vm171_vm0, %v4402_v21, %v8549_v33  ;;  %v8557_v61 = vld [vmem:[#allocation42_spill] sm:$0xff]  ;;  %2376 = vst.msk [vmem:[#allocation3 + $0x10] sm:$0x3] %vm2375_vm11, %v8556_v22  ;;  %v1566_v17 = vpop.permute.xlu0 %1565  ;;  %v8564_v13 = vld [vmem:[#allocation32_spill] sm:$0xff] }
 0x357   : > { %v1828_v53 = vsel %vm1802_vm9, %v1795_v47, %v8534_v59  ;;  %v1664_v41 = vsel %vm1637_vm2, %v1631_v24, %v8538_v44  ;;  %v1665_v20 = vsel %vm1637_vm2, %v1632_v28, %v8550_v5  ;;  %2382 = vst.msk [vmem:[#allocation3 + $0x40] sm:$0x3] %vm2375_vm11, %v8556_v22  ;;  %v8559_v43 = vld [vmem:[#allocation94_spill] sm:$0xff]  ;;  %v8560_v59 = vld [vmem:[#allocation116_spill] sm:$0xff]  ;;  %v4404_v24 = vld [vmem:[#allocation2 + $0x158] sm:$0xff] }
 0x358   : > { %4279 = vmatmul.msk.f32.gmra.mxu0 %vm1873_vm10, %v1846_v56  ;;  %4287 = vmatmul.msk.f32.gmra.mxu1 %vm1873_vm10, %v1854_v30  ;;  %v1861_v39 = vsel %vm1835_vm8, %v1828_v53, %v1560_v7  ;;  %v8539_v56 = vld [vmem:[#allocation96_spill] sm:$0xff]  ;;  %v1697_v31 = vsel %vm1670_vm4, %v1664_v41, %v8540_v16  ;;  %v1698_v1 = vsel %vm1670_vm4, %v1665_v20, %v8551_v12  ;;  %v4403_v7 = vld [vmem:[#allocation2 + $0x150] sm:$0xff]  ;;  %v8567_v16 = vld [vmem:[#allocation31_spill] sm:$0xff] }
 0x359   : > { %4293 = vmatmul.msk.f32.gmra.mxu3 %vm1873_vm10, %v1860_v36  ;;  %v1691_v30 = vsel %vm1670_vm4, %v1658_v0, %v8539_v56  ;;  %v1730_v63 = vsel %vm1703_vm6, %v1697_v31, %v8542_v46  ;;  %v8543_v36 = vld [vmem:[#allocation123_spill] sm:$0xff]  ;;  %v1731_v55 = vsel %vm1703_vm6, %v1698_v1, %v8552_v62  ;;  %v1633_v47 = vsel %vm171_vm0, %v4403_v7, %v8557_v61  ;;  %v8562_v50 = vld [vmem:[#allocation142_spill] sm:$0xff]  ;;  %v1568_v46 = vpop.permute.xlu1 %1567  ;;  %v8576_v28 = vld [vmem:[#allocation152_spill] sm:$0xff] }
 0x35a   : > { %v1724_v51 = vsel %vm1703_vm6, %v1691_v30, %v8541_v3  ;;  %v1763_v54 = vsel %vm1736_vm5, %v1730_v63, %v8544_v6  ;;  %v1666_v14 = vsel %vm1637_vm2, %v1633_v47, %v8558_v25  ;;  %2385 = vst.msk [vmem:[#allocation3 + $0x58] sm:$0x3] %vm2375_vm11, %v8556_v22  ;;  %v1634_v0 = vsel %vm171_vm0, %v4404_v24, %v8564_v13  ;;  %v8565_v44 = vld [vmem:[#allocation82_spill] sm:$0xff]  ;;  %v8577_v20 = vld [vmem:[#allocation169_spill] sm:$0xff] }
 0x35b   : > { %v1757_v49 = vsel %vm1736_vm5, %v1724_v51, %v8543_v36  ;;  %v1796_v38 = vsel %vm1769_vm7, %v1763_v54, %v8546_v60  ;;  %v1699_v42 = vsel %vm1670_vm4, %v1666_v14, %v8559_v43  ;;  %2388 = vst.msk [vmem:[#allocation3 + $0x70] sm:$0x3] %vm2375_vm11, %v8556_v22  ;;  %v1667_v41 = vsel %vm1637_vm2, %v1634_v0, %v8565_v44  ;;  %v8566_v56 = vld [vmem:[#allocation102_spill] sm:$0xff]  ;;  %v8583_v47 = vld [vmem:[#allocation145_spill] sm:$0xff] }
 0x35c   : > { %v1790_v11 = vsel %vm1769_vm7, %v1757_v49, %v8545_v35  ;;  %v1829_v52 = vsel %vm1802_vm9, %v1796_v38, %v8548_v23  ;;  %v1732_v53 = vsel %vm1703_vm6, %v1699_v42, %v8560_v59  ;;  %2391 = vst.msk [vmem:[#allocation3 + $0x88] sm:$0x3] %vm2375_vm11, %v8556_v22  ;;  %v1700_v30 = vsel %vm1670_vm4, %v1667_v41, %v8566_v56  ;;  %v8568_v3 = vld [vmem:[#allocation130_spill] sm:$0xff]  ;;  %v8570_v49 = vld [vmem:[#allocation165_spill] sm:$0xff]  ;;  %v1570_v21 = vpop.permute.xlu2 %1569 }
 0x35d   : > { %v1823_v57 = vsel %vm1802_vm9, %v1790_v11, %v8547_v9  ;;  %v1862_v48 = vsel %vm1835_vm8, %v1829_v52, %v1562_v40  ;;  %2394 = vst.msk [vmem:[#allocation3 + $0xa0] sm:$0x3] %vm2375_vm11, %v8556_v22  ;;  %v1733_v31 = vsel %vm1703_vm6, %v1700_v30, %v8567_v16  ;;  %v8569_v63 = vld [vmem:[#allocation150_spill] sm:$0xff]  ;;  %v4405_v35 = vld [vmem:[#allocation2 + $0x168] sm:$0xff]  ;;  %v8571_v11 = vld [vmem:[#allocation43_spill] sm:$0xff] }
 0x35e   : > { %v1856_v45 = vsel %vm1835_vm8, %v1823_v57, %v6019_v18  ;;  %v8553_v18 = vld [vmem:[#allocation73_spill] sm:$0xff]  ;;  %2397 = vst.msk [vmem:[#allocation3 + $0xb8] sm:$0x3] %vm2375_vm11, %v8556_v22  ;;  %v1766_v51 = vsel %vm1736_vm5, %v1733_v31, %v8568_v3  ;;  %v1635_v40 = vsel %vm171_vm0, %v4405_v35, %v8571_v11  ;;  %v8572_v60 = vld [vmem:[#allocation74_spill] sm:$0xff]  ;;  %v8573_v9 = vld [vmem:[#allocation104_spill] sm:$0xff]  ;;  %v1572_v7 = vpop.permute.xlu0 %1571 }
 0x35f   : > { %v1764_v15 = vsel %vm1736_vm5, %v1731_v55, %v8553_v18  ;;  %2400 = vst.msk [vmem:[#allocation3 + $0xd0] sm:$0x3] %vm2375_vm11, %v8556_v22  ;;  %v1799_v36 = vsel %vm1769_vm7, %v1766_v51, %v8569_v63  ;;  %v1668_v38 = vsel %vm1637_vm2, %v1635_v40, %v8572_v60  ;;  %v8574_v23 = vld [vmem:[#allocation117_spill] sm:$0xff]  ;;  %v4406_v62 = vld [vmem:[#allocation2 + $0x170] sm:$0xff] }
 0x360   : > { %4280 = vmatmul.msk.f32.gmra.mxu0 %vm1873_vm10, %v1847_v29  ;;  %4288 = vmatmul.msk.f32.gmra.mxu1 %vm1873_vm10, %v1855_v37  ;;  %v1797_v34 = vsel %vm1769_vm7, %v1764_v15, %v8554_v26  ;;  %v8561_v29 = vld [vmem:[#allocation128_spill] sm:$0xff]  ;;  %2403 = vst.msk [vmem:[#allocation3 + $0xe8] sm:$0x3] %vm2375_vm11, %v8556_v22  ;;  %v1832_v6 = vsel %vm1802_vm9, %v1799_v36, %v8570_v49  ;;  %v8578_v55 = vld [vmem:[#allocation45_spill] sm:$0xff]  ;;  %v8579_v15 = vld [vmem:[#allocation83_spill] sm:$0xff] }
 0x361   : > { %4294 = vmatmul.msk.f32.gmra.mxu3 %vm1873_vm10, %v1861_v39  ;;  %v1830_v19 = vsel %vm1802_vm9, %v1797_v34, %v8555_v2  ;;  %v1765_v37 = vsel %vm1736_vm5, %v1732_v53, %v8561_v29  ;;  %v8563_v39 = vld [vmem:[#allocation168_spill] sm:$0xff]  ;;  %2406 = vst.msk [vmem:[#allocation3 + $0x100] sm:$0x3] %vm2375_vm11, %v8556_v22  ;;  %v1865_v54 = vsel %vm1835_vm8, %v1832_v6, %v1568_v46  ;;  %v8580_v26 = vld [vmem:[#allocation97_spill] sm:$0xff]  ;;  %v8581_v2 = vld [vmem:[#allocation118_spill] sm:$0xff] }
 0x362   : > { %v1863_v4 = vsel %vm1835_vm8, %v1830_v19, %v1564_v27  ;;  %v1798_v10 = vsel %vm1769_vm7, %v1765_v37, %v8562_v50  ;;  %2409 = vst.msk [vmem:[#allocation3 + $0x118] sm:$0x3] %vm2375_vm11, %v8556_v22  ;;  %v1701_v57 = vsel %vm1670_vm4, %v1668_v38, %v8573_v9  ;;  %v1636_v18 = vsel %vm171_vm0, %v4406_v62, %v8578_v55 }
 0x363   : > { %v1831_v58 = vsel %vm1802_vm9, %v1798_v10, %v8563_v39  ;;  %2412 = vst.msk [vmem:[#allocation3 + $0x130] sm:$0x3] %vm2375_vm11, %v8556_v22  ;;  %v1734_v52 = vsel %vm1703_vm6, %v1701_v57, %v8574_v23  ;;  %v1669_v27 = vsel %vm1637_vm2, %v1636_v18, %v8579_v15  ;;  %vm3902_vm0 = vcmask 326656  }
 0x364   : > { %v1864_v8 = vsel %vm1835_vm8, %v1831_v58, %v1566_v17  ;;  %2415 = vst.msk [vmem:[#allocation3 + $0x148] sm:$0x3] %vm2375_vm11, %v8556_v22  ;;  %v1702_v34 = vsel %vm1670_vm4, %v1669_v27, %v8580_v26  ;;  %vm3968_vm4 = vcmask 457728  }
 0x365   : > { %2418 = vst.msk [vmem:[#allocation3 + $0x160] sm:$0x3] %vm2375_vm11, %v8556_v22  ;;  %v1735_v19 = vsel %vm1703_vm6, %v1702_v34, %v8581_v2 }
 0x366   : > { %2421 = vst.msk [vmem:[#allocation3 + $0x178] sm:$0x3] %vm2375_vm11, %v8556_v22 }
 0x367   : > { %2424 = vst.msk [vmem:[#allocation3 + $0x190] sm:$0x3] %vm2375_vm11, %v8556_v22 }
 0x368   : > { %4289 = vmatmul.msk.f32.gmra.mxu1 %vm1873_vm10, %v1856_v45  ;;  %2427 = vst.msk [vmem:[#allocation3 + $0x1a8] sm:$0x3] %vm2375_vm11, %v8556_v22  ;;  %v8575_v45 = vld [vmem:[#allocation122_spill] sm:$0xff] }
 0x369   : > { %4295 = vmatmul.msk.f32.gmra.mxu3 %vm1873_vm10, %v1862_v48  ;;  %v1767_v48 = vsel %vm1736_vm5, %v1734_v52, %v8575_v45 }
 0x36a   : > { %v1800_v5 = vsel %vm1769_vm7, %v1767_v48, %v8576_v28 }
 0x36b   : > { %v1833_v12 = vsel %vm1802_vm9, %v1800_v5, %v8577_v20 }
 0x36c   : > { %v1866_v1 = vsel %vm1835_vm8, %v1833_v12, %v1570_v21 }
 0x371   : > { %4296 = vmatmul.msk.f32.gmra.mxu3 %vm1873_vm10, %v1863_v4  ;;  %v8582_v4 = vld [vmem:[#allocation131_spill] sm:$0xff] }
 0x372   : > { %v1768_v22 = vsel %vm1736_vm5, %v1735_v19, %v8582_v4  ;;  %vm4035_vm5 = vcmask 588800  }
 0x373   : > { %v6311_v33 = vpop.f32.mrf.mxu0  ;;  %v1801_v25 = vsel %vm1769_vm7, %v1768_v22, %v8583_v47 }
 0x374   : > { %v1834_v14 = vsel %vm1802_vm9, %v1801_v25, %v5782_v32  ;;  %v2087_v0 = vsel %vm1637_vm2, %v6311_v33, 0.0 }
 0x375   : > { %v1867_v43 = vsel %vm1835_vm8, %v1834_v14, %v1572_v7 }
 0x379   : > { %4297 = vmatmul.msk.f32.gmra.mxu3 %vm1873_vm10, %v1864_v8 }
 0x381   : > { %4298 = vmatmul.msk.f32.gmra.mxu3 %vm1873_vm10, %v1865_v54 }
 0x389   : > { %4299 = vmatmul.msk.f32.gmra.mxu3 %vm1873_vm10, %v1866_v1 }
 0x38d   : > { %v6329_v61 = vpop.f32.mrf.mxu0 }
 0x38e   : > { %v2088_v13 = vsel %vm1637_vm2, %v6329_v61, 0.0 }
 0x38f   : > { %v2089_v41 = vadd.f32 %v2088_v13, %v2087_v0 }
 0x391   : > { %4300 = vmatmul.msk.f32.gmra.mxu3 %vm1873_vm10, %v1867_v43 }
 0x393   : > { %v6341_v53 = vpop.f32.mrf.mxu1 }
 0x394   : > { %v2110_v12 = vsel %vm1637_vm2, %v6341_v53, 0.0 }
 0x395   : > { %v6337_v42 = vpop.f32.mrf.mxu0 }
 0x396   : > { %v2090_v44 = vsel %vm1637_vm2, %v6337_v42, 0.0 }
 0x397   : > { %v2091_v16 = vadd.f32 %v2090_v44, %v2089_v41 }
 0x39d   : > { %v6339_v59 = vpop.f32.mrf.mxu0 }
 0x39e   : > { %v2092_v56 = vsel %vm1637_vm2, %v6339_v59, 0.0 }
 0x39f   : > { %v2093_v51 = vadd.f32 %v2092_v56, %v2091_v16 }
 0x3a5   : > { %v6343_v29 = vpop.f32.mrf.mxu0 }
 0x3a6   : > { %v2094_v3 = vsel %vm1637_vm2, %v6343_v29, 0.0 }
 0x3a7   : > { %v2095_v36 = vadd.f32 %v2094_v3, %v2093_v51 }
 0x3ad   : > { %v6345_v37 = vpop.f32.mrf.mxu0  ;;  %v6347_v17 = vpop.f32.mrf.mxu1 }
 0x3ae   : > { %v2096_v63 = vsel %vm1637_vm2, %v6345_v37, 0.0  ;;  %v2112_v62 = vsel %vm1637_vm2, %v6347_v17, 0.0 }
 0x3af   : > { %v2097_v6 = vadd.f32 %v2096_v63, %v2095_v36 }
 0x3b1   : > { %v6357_v58 = vpop.f32.mrf.mxu3 }
 0x3b2   : > { %v2128_v56 = vsel %vm1637_vm2, %v6357_v58, 0.0 }
 0x3b5   : > { %v6349_v50 = vpop.f32.mrf.mxu0  ;;  %v6351_v10 = vpop.f32.mrf.mxu1 }
 0x3b6   : > { %v2098_v49 = vsel %vm1637_vm2, %v6349_v50, 0.0  ;;  %v2114_v15 = vsel %vm1637_vm2, %v6351_v10, 0.0 }
 0x3b7   : > { %v2099_v11 = vadd.f32 %v2098_v49, %v2097_v6 }
 0x3bd   : > { %v6353_v32 = vpop.f32.mrf.mxu0  ;;  %v6355_v39 = vpop.f32.mrf.mxu1 }
 0x3be   : > { %v2100_v54 = vsel %vm1637_vm2, %v6353_v32, 0.0  ;;  %v2116_v34 = vsel %vm1637_vm2, %v6355_v39, 0.0 }
 0x3bf   : > { %v2101_v38 = vadd.f32 %v2100_v54, %v2099_v11 }
 0x3c5   : > { %v6359_v8 = vpop.f32.mrf.mxu0  ;;  %v6361_v24 = vpop.f32.mrf.mxu1 }
 0x3c6   : > { %v2102_v60 = vsel %vm1637_vm2, %v6359_v8, 0.0  ;;  %v2118_v19 = vsel %vm1637_vm2, %v6361_v24, 0.0 }
 0x3c7   : > { %v2103_v57 = vadd.f32 %v2102_v60, %v2101_v38 }
 0x3cc   : > { %v6371_v30 = vpop.f32.mrf.mxu3 }
 0x3cd   : > { %v6373_v31 = vpop.f32.mrf.mxu0  ;;  %v6377_v46 = vpop.f32.mrf.mxu1  ;;  %v2130_v51 = vsel %vm1637_vm2, %v6371_v30, 0.0 }
 0x3ce   : > { %v2104_v9 = vsel %vm1637_vm2, %v6373_v31, 0.0  ;;  %v2120_v22 = vsel %vm1637_vm2, %v6377_v46, 0.0 }
 0x3cf   : > { %v2105_v45 = vadd.f32 %v2104_v9, %v2103_v57 }
 0x3d4   : > { %v6385_v35 = vpop.f32.mrf.mxu3 }
 0x3d5   : > { %v6387_v40 = vpop.f32.mrf.mxu0  ;;  %v6393_v23 = vpop.f32.mrf.mxu1  ;;  %v2132_v36 = vsel %vm1637_vm2, %v6385_v35, 0.0 }
 0x3d6   : > { %v2106_v52 = vsel %vm1637_vm2, %v6387_v40, 0.0  ;;  %v2122_v47 = vsel %vm1637_vm2, %v6393_v23, 0.0 }
 0x3d7   : > { %v2107_v21 = vadd.f32 %v2106_v52, %v2105_v45 }
 0x3dc   : > { %v6397_v48 = vpop.f32.mrf.mxu3 }
 0x3dd   : > { %v6399_v28 = vpop.f32.mrf.mxu0  ;;  %v6407_v18 = vpop.f32.mrf.mxu1  ;;  %v2134_v54 = vsel %vm1637_vm2, %v6397_v48, 0.0 }
 0x3de   : > { %v2108_v5 = vsel %vm1637_vm2, %v6399_v28, 0.0  ;;  %v2124_v13 = vsel %vm1637_vm2, %v6407_v18, 0.0 }
 0x3df   : > { %v2109_v20 = vadd.f32 %v2108_v5, %v2107_v21 }
 0x3e1   : > { %v2111_v1 = vadd.f32 %v2110_v12, %v2109_v20  ;;  %v4432_v20 = vmov 256.0  }
 0x3e2   : > { %4371 = vrcp.f32 %v4432_v20 }
 0x3e3   : > { %v2113_v55 = vadd.f32 %v2112_v62, %v2111_v1 }
 0x3e4   : > { %v6411_v27 = vpop.f32.mrf.mxu3 }
 0x3e5   : > { %v2115_v26 = vadd.f32 %v2114_v15, %v2113_v55  ;;  %v6423_v43 = vpop.f32.mrf.mxu1  ;;  %v2136_v60 = vsel %vm1637_vm2, %v6411_v27, 0.0 }
 0x3e6   : > { %v2126_v44 = vsel %vm1637_vm2, %v6423_v43, 0.0 }
 0x3e7   : > { %v2117_v2 = vadd.f32 %v2116_v34, %v2115_v26 }
 0x3e8   : > { %v4372_v26 = vpop.eup %4371 }
 0x3e9   : > { %v2119_v4 = vadd.f32 %v2118_v19, %v2117_v2  ;;  %vm2161_vm12 = vweird.f32 %v4372_v26 }
 0x3eb   : > { %v2121_v7 = vadd.f32 %v2120_v22, %v2119_v4  ;;  %v2157_v22 = vmul.f32 256.0, %v4372_v26 }
 0x3ec   : > { %v6421_v25 = vpop.f32.mrf.mxu3 }
 0x3ed   : > { %v2123_v14 = vadd.f32 %v2122_v47, %v2121_v7  ;;  %v2138_v57 = vsel %vm1637_vm2, %v6421_v25, 0.0 }
 0x3ef   : > { %v2125_v0 = vadd.f32 %v2124_v13, %v2123_v14  ;;  %v2158_v14 = vsub.f32 1.0, %v2157_v22 }
 0x3f1   : > { %v2127_v41 = vadd.f32 %v2126_v44, %v2125_v0  ;;  %v2159_v44 = vmul.f32 %v4372_v26, %v2158_v14 }
 0x3f3   : > { %v2129_v16 = vadd.f32 %v2128_v56, %v2127_v41  ;;  %v2160_v56 = vadd.f32 %v4372_v26, %v2159_v44 }
 0x3f4   : > { %v6431_v3 = vpop.f32.mrf.mxu3 }
 0x3f5   : > { %v2131_v63 = vadd.f32 %v2130_v51, %v2129_v16  ;;  %v2140_v45 = vsel %vm1637_vm2, %v6431_v3, 0.0  ;;  %v6461_v51 = vsel %vm2161_vm12, %v4372_v26, %v2160_v56 }
 0x3f6   : > { %8584 = vst [vmem:[#allocation10_spill] sm:$0xff] %v6461_v51 }
 0x3f7   : > { %v2133_v49 = vadd.f32 %v2132_v36, %v2131_v63 }
 0x3f9   : > { %v2135_v11 = vadd.f32 %v2134_v54, %v2133_v49 }
 0x3fb   : > { %v2137_v38 = vadd.f32 %v2136_v60, %v2135_v11 }
 0x3fc   : > { %v6437_v6 = vpop.f32.mrf.mxu3 }
 0x3fd   : > { %v2139_v52 = vadd.f32 %v2138_v57, %v2137_v38  ;;  %v2142_v12 = vsel %vm1637_vm2, %v6437_v6, 0.0 }
 0x3ff   : > { %v2141_v21 = vadd.f32 %v2140_v45, %v2139_v52 }
 0x401   : > { %v2143_v62 = vadd.f32 %v2142_v12, %v2141_v21 }
 0x404   : > { %v6443_v9 = vpop.f32.mrf.mxu3 }
 0x405   : > { %v2144_v1 = vsel %vm1637_vm2, %v6443_v9, 0.0 }
 0x406   : > { %v2145_v15 = vadd.f32 %v2144_v1, %v2143_v62 }
 0x40c   : > { %v6449_v5 = vpop.f32.mrf.mxu3 }
 0x40d   : > { %v2146_v55 = vsel %vm1637_vm2, %v6449_v5, 0.0 }
 0x40e   : > { %v2147_v34 = vadd.f32 %v2146_v55, %v2145_v15 }
 0x414   : > { %v6457_v2 = vpop.f32.mrf.mxu3 }
 0x415   : > { %v2148_v19 = vsel %vm1637_vm2, %v6457_v2, 0.0 }
 0x416   : > { %v2149_v4 = vadd.f32 %v2148_v19, %v2147_v34 }
 0x418   : > { %v2150_v7 = vrot.slane %v2149_v4, 4 }
 0x41a   : > { %v2151_v47 = vadd.f32 %v2150_v7, %v2149_v4 }
 0x41c   : > { %v2152_v13 = vrot.slane %v2151_v47, 2 }
 0x41e   : > { %v2153_v0 = vadd.f32 %v2152_v13, %v2151_v47 }
 0x420   : > { %v2154_v41 = vrot.slane %v2153_v0, 1 }
 0x422   : > { %v2155_v16 = vadd.f32 %v2154_v41, %v2153_v0 }
 0x424   : > { %v6464_v63 = vmul.f32 %v6461_v51, %v2155_v16 }
 0x426   : > { %v6468_v36 = vsub.f32 %v6311_v33, %v6464_v63  ;;  %v6472_v49 = vsub.f32 %v6329_v61, %v6464_v63  ;;  %v6476_v54 = vsub.f32 %v6337_v42, %v6464_v63  ;;  %v6480_v11 = vsub.f32 %v6339_v59, %v6464_v63 }
 0x427   : > { %v6488_v33 = vsub.f32 %v6343_v29, %v6464_v63  ;;  %v6494_v42 = vsub.f32 %v6345_v37, %v6464_v63  ;;  %v6502_v21 = vsub.f32 %v6349_v50, %v6464_v63  ;;  %v6509_v37 = vsub.f32 %v6353_v32, %v6464_v63 }
 0x428   : > { %v2196_v60 = vmul.f32 %v6468_v36, %v6468_v36  ;;  %v2197_v38 = vmul.f32 %v6472_v49, %v6472_v49  ;;  %v2198_v61 = vmul.f32 %v6476_v54, %v6476_v54  ;;  %v2199_v59 = vmul.f32 %v6480_v11, %v6480_v11 }
 0x429   : > { %v2200_v29 = vmul.f32 %v6488_v33, %v6488_v33  ;;  %v2201_v1 = vmul.f32 %v6494_v42, %v6494_v42  ;;  %v6516_v50 = vsub.f32 %v6359_v8, %v6464_v63  ;;  %v2202_v15 = vmul.f32 %v6502_v21, %v6502_v21 }
 0x42a   : > { %v2228_v57 = vsel %vm1637_vm2, %v2196_v60, 0.0  ;;  %v2229_v52 = vsel %vm1637_vm2, %v2197_v38, 0.0  ;;  %v2231_v20 = vsel %vm1637_vm2, %v2198_v61, 0.0  ;;  %v2233_v62 = vsel %vm1637_vm2, %v2199_v59, 0.0 }
 0x42b   : > { %v2230_v45 = vadd.f32 %v2229_v52, %v2228_v57  ;;  %v2235_v26 = vsel %vm1637_vm2, %v2200_v29, 0.0  ;;  %v6523_v32 = vsub.f32 %v6373_v31, %v6464_v63  ;;  %v2203_v19 = vmul.f32 %v6509_v37, %v6509_v37 }
 0x42c   : > { %v2237_v4 = vsel %vm1637_vm2, %v2201_v1, 0.0  ;;  %v6530_v8 = vsub.f32 %v6387_v40, %v6464_v63  ;;  %v2204_v7 = vmul.f32 %v6516_v50, %v6516_v50  ;;  %v2239_v47 = vsel %vm1637_vm2, %v2202_v15, 0.0 }
 0x42d   : > { %v2232_v12 = vadd.f32 %v2231_v20, %v2230_v45  ;;  %v6537_v31 = vsub.f32 %v6399_v28, %v6464_v63  ;;  %v2205_v13 = vmul.f32 %v6523_v32, %v6523_v32  ;;  %v2241_v0 = vsel %vm1637_vm2, %v2203_v19, 0.0 }
 0x42e   : > { %v6544_v40 = vsub.f32 %v6341_v53, %v6464_v63  ;;  %v2206_v41 = vmul.f32 %v6530_v8, %v6530_v8  ;;  %v2243_v56 = vsel %vm1637_vm2, %v2204_v7, 0.0  ;;  %v6551_v28 = vsub.f32 %v6347_v17, %v6464_v63 }
 0x42f   : > { %v2234_v55 = vadd.f32 %v2233_v62, %v2232_v12  ;;  %v2207_v60 = vmul.f32 %v6537_v31, %v6537_v31  ;;  %v2245_v38 = vsel %vm1637_vm2, %v2205_v13, 0.0  ;;  %v6558_v53 = vsub.f32 %v6351_v10, %v6464_v63 }
 0x430   : > { %v2208_v59 = vmul.f32 %v6544_v40, %v6544_v40  ;;  %v2247_v57 = vsel %vm1637_vm2, %v2206_v41, 0.0  ;;  %v6565_v17 = vsub.f32 %v6355_v39, %v6464_v63  ;;  %v2209_v45 = vmul.f32 %v6551_v28, %v6551_v28 }
 0x431   : > { %v2236_v34 = vadd.f32 %v2235_v26, %v2234_v55  ;;  %v2249_v29 = vsel %vm1637_vm2, %v2207_v60, 0.0  ;;  %v6572_v10 = vsub.f32 %v6361_v24, %v6464_v63  ;;  %v2210_v12 = vmul.f32 %v6558_v53, %v6558_v53 }
 0x432   : > { %v2251_v1 = vsel %vm1637_vm2, %v2208_v59, 0.0  ;;  %v6579_v39 = vsub.f32 %v6377_v46, %v6464_v63  ;;  %v2211_v55 = vmul.f32 %v6565_v17, %v6565_v17  ;;  %v2253_v15 = vsel %vm1637_vm2, %v2209_v45, 0.0 }
 0x433   : > { %v2238_v22 = vadd.f32 %v2237_v4, %v2236_v34  ;;  %v6586_v24 = vsub.f32 %v6393_v23, %v6464_v63  ;;  %v2212_v34 = vmul.f32 %v6572_v10, %v6572_v10  ;;  %v2255_v19 = vsel %vm1637_vm2, %v2210_v12, 0.0 }
 0x434   : > { %v6593_v46 = vsub.f32 %v6407_v18, %v6464_v63  ;;  %v2257_v7 = vsel %vm1637_vm2, %v2211_v55, 0.0  ;;  %v6600_v23 = vsub.f32 %v6423_v43, %v6464_v63  ;;  %v6607_v18 = vsub.f32 %v6357_v58, %v6464_v63 }
 0x435   : > { %v2240_v14 = vadd.f32 %v2239_v47, %v2238_v22  ;;  %v2213_v22 = vmul.f32 %v6579_v39, %v6579_v39  ;;  %v2259_v13 = vsel %vm1637_vm2, %v2212_v34, 0.0  ;;  %v6614_v43 = vsub.f32 %v6371_v30, %v6464_v63 }
 0x436   : > { %v6621_v58 = vsub.f32 %v6385_v35, %v6464_v63  ;;  %v6628_v30 = vsub.f32 %v6397_v48, %v6464_v63  ;;  %v6635_v35 = vsub.f32 %v6411_v27, %v6464_v63  ;;  %v6642_v48 = vsub.f32 %v6421_v25, %v6464_v63 }
 0x437   : > { %v2242_v44 = vadd.f32 %v2241_v0, %v2240_v14  ;;  %v2214_v14 = vmul.f32 %v6586_v24, %v6586_v24  ;;  %v2261_v41 = vsel %vm1637_vm2, %v2213_v22, 0.0  ;;  %v6649_v27 = vsub.f32 %v6431_v3, %v6464_v63 }
 0x438   : > { %v6656_v25 = vsub.f32 %v6437_v6, %v6464_v63  ;;  %v6663_v3 = vsub.f32 %v6443_v9, %v6464_v63  ;;  %v6670_v6 = vsub.f32 %v6449_v5, %v6464_v63  ;;  %v2195_v9 = vsub.f32 %v6457_v2, %v6464_v63 }
 0x439   : > { %v2244_v16 = vadd.f32 %v2243_v56, %v2242_v44  ;;  %v2215_v44 = vmul.f32 %v6593_v46, %v6593_v46  ;;  %v2263_v60 = vsel %vm1637_vm2, %v2214_v14, 0.0 }
 0x43b   : > { %v2246_v61 = vadd.f32 %v2245_v38, %v2244_v16  ;;  %v2216_v16 = vmul.f32 %v6600_v23, %v6600_v23  ;;  %v2265_v59 = vsel %vm1637_vm2, %v2215_v44, 0.0 }
 0x43d   : > { %v2248_v52 = vadd.f32 %v2247_v57, %v2246_v61  ;;  %v2217_v61 = vmul.f32 %v6607_v18, %v6607_v18  ;;  %v2267_v45 = vsel %vm1637_vm2, %v2216_v16, 0.0 }
 0x43f   : > { %v2250_v20 = vadd.f32 %v2249_v29, %v2248_v52  ;;  %v2218_v52 = vmul.f32 %v6614_v43, %v6614_v43  ;;  %v2269_v12 = vsel %vm1637_vm2, %v2217_v61, 0.0 }
 0x441   : > { %v2252_v62 = vadd.f32 %v2251_v1, %v2250_v20  ;;  %v2219_v20 = vmul.f32 %v6621_v58, %v6621_v58  ;;  %v2271_v55 = vsel %vm1637_vm2, %v2218_v52, 0.0 }
 0x443   : > { %v2254_v26 = vadd.f32 %v2253_v15, %v2252_v62  ;;  %v2220_v62 = vmul.f32 %v6628_v30, %v6628_v30  ;;  %v2273_v34 = vsel %vm1637_vm2, %v2219_v20, 0.0 }
 0x445   : > { %v2256_v4 = vadd.f32 %v2255_v19, %v2254_v26  ;;  %v2221_v26 = vmul.f32 %v6635_v35, %v6635_v35  ;;  %v2275_v22 = vsel %vm1637_vm2, %v2220_v62, 0.0 }
 0x447   : > { %v2258_v47 = vadd.f32 %v2257_v7, %v2256_v4  ;;  %v2222_v4 = vmul.f32 %v6642_v48, %v6642_v48  ;;  %v2277_v14 = vsel %vm1637_vm2, %v2221_v26, 0.0  ;;  %v2494_v26 = vld [vmem:[#allocation3 + $0x9] sm:$0xff] }
 0x448   : > { %2784 = vrot.lane.b32.xlu2 %v2494_v26, %s4425_s19 }
 0x449   : > { %v2260_v0 = vadd.f32 %v2259_v13, %v2258_v47  ;;  %v2223_v47 = vmul.f32 %v6649_v27, %v6649_v27  ;;  %v2279_v44 = vsel %vm1637_vm2, %v2222_v4, 0.0  ;;  %v2493_v4 = vld [vmem:[#allocation3 + $0x1] sm:$0xff] }
 0x44a   : > { %2782 = vrot.lane.b32.xlu1 %v2493_v4, %s4425_s19 }
 0x44b   : > { %v2262_v56 = vadd.f32 %v2261_v41, %v2260_v0  ;;  %v2224_v0 = vmul.f32 %v6656_v25, %v6656_v25  ;;  %v2281_v16 = vsel %vm1637_vm2, %v2223_v47, 0.0 }
 0x44d   : > { %v2264_v38 = vadd.f32 %v2263_v60, %v2262_v56  ;;  %v2225_v56 = vmul.f32 %v6663_v3, %v6663_v3  ;;  %v2283_v5 = vsel %vm1637_vm2, %v2224_v0, 0.0 }
 0x44f   : > { %v2266_v57 = vadd.f32 %v2265_v59, %v2264_v38  ;;  %v2226_v38 = vmul.f32 %v6670_v6, %v6670_v6  ;;  %v2227_v59 = vmul.f32 %v2195_v9, %v2195_v9 }
 0x451   : > { %v2268_v29 = vadd.f32 %v2267_v45, %v2266_v57  ;;  %v2285_v57 = vsel %vm1637_vm2, %v2225_v56, 0.0  ;;  %v2287_v45 = vsel %vm1637_vm2, %v2226_v38, 0.0  ;;  %v2289_v2 = vsel %vm1637_vm2, %v2227_v59, 0.0 }
 0x453   : > { %v2270_v1 = vadd.f32 %v2269_v12, %v2268_v29 }
 0x455   : > { %v2272_v15 = vadd.f32 %v2271_v55, %v2270_v1 }
 0x457   : > { %v2274_v19 = vadd.f32 %v2273_v34, %v2272_v15 }
 0x459   : > { %v2276_v7 = vadd.f32 %v2275_v22, %v2274_v19 }
 0x45b   : > { %v2278_v13 = vadd.f32 %v2277_v14, %v2276_v7 }
 0x45d   : > { %v2280_v41 = vadd.f32 %v2279_v44, %v2278_v13 }
 0x45f   : > { %v2282_v60 = vadd.f32 %v2281_v16, %v2280_v41 }
 0x461   : > { %v2284_v61 = vadd.f32 %v2283_v5, %v2282_v60 }
 0x463   : > { %v2286_v52 = vadd.f32 %v2285_v57, %v2284_v61 }
 0x465   : > { %v2288_v29 = vadd.f32 %v2287_v45, %v2286_v52 }
 0x467   : > { %v2290_v63 = vadd.f32 %v2289_v2, %v2288_v29 }
 0x469   : > { %v2291_v20 = vrot.slane %v2290_v63, 4 }
 0x46b   : > { %v2292_v12 = vadd.f32 %v2291_v20, %v2290_v63 }
 0x46d   : > { %v2293_v1 = vrot.slane %v2292_v12, 2 }
 0x46f   : > { %v2294_v62 = vadd.f32 %v2293_v1, %v2292_v12 }
 0x471   : > { %v2295_v55 = vrot.slane %v2294_v62, 1 }
 0x473   : > { %v2296_v15 = vadd.f32 %v2295_v55, %v2294_v62 }
 0x475   : > { %v2297_v34 = vmul.f32 %v2296_v15, %v6461_v51 }
 0x477   : > { %v2298_v19 = vadd.f32 1e-05, %v2297_v34 }
 0x479   : > { %4373 = vrsqrt.f32 %v2298_v19  ;;  %vm2305_vm14 = vweird.f32 %v2298_v19 }
 0x47f   : > { %v4374_v22 = vpop.eup %4373 }
 0x480   : > { %v2300_v7 = vmul.f32 %v4374_v22, %v2298_v19  ;;  %vm2306_vm13 = vweird.f32 %v4374_v22 }
 0x481   : > { %vm2307_vm15 = vmor %vm2305_vm14, %vm2306_vm13 }
 0x482   : > { %v2301_v47 = vmul.f32 %v4374_v22, %v2300_v7 }
 0x484   : > { %v2302_v14 = vmul.f32 0.5, %v2301_v47 }
 0x486   : > { %v2303_v13 = vsub.f32 1.5, %v2302_v14 }
 0x488   : > { %v2304_v0 = vmul.f32 %v4374_v22, %v2303_v13 }
 0x48a   : > { %v6689_v44 = vsel %vm2307_vm15, %v4374_v22, %v2304_v0 }
 0x48b   : > { %v2340_v41 = vmul.f32 %v6689_v44, %v2195_v9  ;;  %v2309_v16 = vmul.f32 %v6689_v44, %v6468_v36  ;;  %v2310_v60 = vmul.f32 %v6689_v44, %v6472_v49  ;;  %v2311_v38 = vmul.f32 %v6689_v44, %v6476_v54 }
 0x48c   : > { %v2312_v5 = vmul.f32 %v6689_v44, %v6480_v11  ;;  %v2313_v61 = vmul.f32 %v6689_v44, %v6488_v33  ;;  %v2314_v9 = vmul.f32 %v6689_v44, %v6494_v42  ;;  %v2315_v59 = vmul.f32 %v6689_v44, %v6502_v21 }
 0x48d   : > { %v2372_v56 = vmax.f32 %v2340_v41, 0.0  ;;  %v2341_v57 = vmax.f32 %v2309_v16, 0.0  ;;  %v2342_v36 = vmax.f32 %v2310_v60, 0.0  ;;  %v2343_v52 = vmax.f32 %v2311_v38, 0.0 }
 0x48e   : > { %v2316_v49 = vmul.f32 %v6689_v44, %v6509_v37  ;;  %v2344_v45 = vmax.f32 %v2312_v5, 0.0  ;;  %v2317_v54 = vmul.f32 %v6689_v44, %v6516_v50  ;;  %v2345_v11 = vmax.f32 %v2313_v61, 0.0 }
 0x48f   : > { %2460 = vst.msk [vmem:[#allocation3 + $0x189] sm:$0xff] %vm1637_vm2, %v2372_v56  ;;  %v2318_v33 = vmul.f32 %v6689_v44, %v6523_v32  ;;  %v2346_v42 = vmax.f32 %v2314_v9, 0.0  ;;  %v2319_v21 = vmul.f32 %v6689_v44, %v6530_v8  ;;  %v2347_v29 = vmax.f32 %v2315_v59, 0.0 }
 0x490   : > { %2429 = vst.msk [vmem:[#allocation3 + $0x19] sm:$0xff] %vm1637_vm2, %v2341_v57  ;;  %v2320_v37 = vmul.f32 %v6689_v44, %v6537_v31  ;;  %v2348_v2 = vmax.f32 %v2316_v49, 0.0  ;;  %v2321_v50 = vmul.f32 %v6689_v44, %v6544_v40  ;;  %v2349_v63 = vmax.f32 %v2317_v54, 0.0 }
 0x491   : > { %2430 = vst.msk [vmem:[#allocation3 + $0x21] sm:$0xff] %vm1637_vm2, %v2342_v36  ;;  %v2322_v32 = vmul.f32 %v6689_v44, %v6551_v28  ;;  %v2350_v20 = vmax.f32 %v2318_v33, 0.0  ;;  %v2323_v8 = vmul.f32 %v6689_v44, %v6558_v53  ;;  %v2351_v12 = vmax.f32 %v2319_v21, 0.0 }
 0x492   : > { %2431 = vst.msk [vmem:[#allocation3 + $0x31] sm:$0xff] %vm1637_vm2, %v2343_v52  ;;  %v2324_v31 = vmul.f32 %v6689_v44, %v6565_v17  ;;  %v2352_v1 = vmax.f32 %v2320_v37, 0.0  ;;  %v2325_v28 = vmul.f32 %v6689_v44, %v6572_v10  ;;  %v2353_v62 = vmax.f32 %v2321_v50, 0.0 }
 0x493   : > { %2432 = vst.msk [vmem:[#allocation3 + $0x39] sm:$0xff] %vm1637_vm2, %v2344_v45  ;;  %v2326_v53 = vmul.f32 %v6689_v44, %v6579_v39  ;;  %v2354_v17 = vmax.f32 %v2322_v32, 0.0  ;;  %v2327_v10 = vmul.f32 %v6689_v44, %v6586_v24  ;;  %v2355_v26 = vmax.f32 %v2323_v8, 0.0 }
 0x494   : > { %2433 = vst.msk [vmem:[#allocation3 + $0x49] sm:$0xff] %vm1637_vm2, %v2345_v11  ;;  %v2328_v39 = vmul.f32 %v6689_v44, %v6593_v46  ;;  %v2356_v34 = vmax.f32 %v2324_v31, 0.0  ;;  %v2329_v19 = vmul.f32 %v6689_v44, %v6600_v23  ;;  %v2357_v4 = vmax.f32 %v2325_v28, 0.0 }
 0x495   : > { %2434 = vst.msk [vmem:[#allocation3 + $0x51] sm:$0xff] %vm1637_vm2, %v2346_v42  ;;  %v2330_v24 = vmul.f32 %v6689_v44, %v6607_v18  ;;  %v2358_v22 = vmax.f32 %v2326_v53, 0.0  ;;  %v2331_v7 = vmul.f32 %v6689_v44, %v6614_v43  ;;  %v2359_v47 = vmax.f32 %v2327_v10, 0.0  ;;  %v2526_v53 = vld [vmem:[#allocation3 + $0xa] sm:$0xff] }
 0x496   : > { %2435 = vst.msk [vmem:[#allocation3 + $0x61] sm:$0xff] %vm1637_vm2, %v2347_v29  ;;  %v2332_v46 = vmul.f32 %v6689_v44, %v6621_v58  ;;  %v2360_v14 = vmax.f32 %v2328_v39, 0.0  ;;  %v2333_v18 = vmul.f32 %v6689_v44, %v6628_v30  ;;  %v2361_v13 = vmax.f32 %v2329_v19, 0.0 }
 0x497   : > { %2436 = vst.msk [vmem:[#allocation3 + $0x69] sm:$0xff] %vm1637_vm2, %v2348_v2  ;;  %v6733_v40 = vld [vmem:[#allocation3 + $0x19] sm:$0xff]  ;;  %v2334_v43 = vmul.f32 %v6689_v44, %v6635_v35  ;;  %v2362_v58 = vmax.f32 %v2330_v24, 0.0  ;;  %v2335_v30 = vmul.f32 %v6689_v44, %v6642_v48  ;;  %v2363_v56 = vmax.f32 %v2331_v7, 0.0 }
 0x498   : > { %2437 = vst.msk [vmem:[#allocation3 + $0x79] sm:$0xff] %vm1637_vm2, %v2349_v63  ;;  %v6738_v55 = vld [vmem:[#allocation3 + $0x21] sm:$0xff]  ;;  %2786 = vrot.lane.b32.xlu0 %v6733_v40, %s4425_s19  ;;  %v2336_v35 = vmul.f32 %v6689_v44, %v6649_v27  ;;  %v2364_v16 = vmax.f32 %v2332_v46, 0.0  ;;  %v2337_v60 = vmul.f32 %v6689_v44, %v6656_v25  ;;  %v2365_v38 = vmax.f32 %v2333_v18, 0.0 }
 0x499   : > { %2438 = vst.msk [vmem:[#allocation3 + $0x81] sm:$0xff] %vm1637_vm2, %v2350_v20  ;;  %v6745_v15 = vld [vmem:[#allocation3 + $0x31] sm:$0xff]  ;;  %2788 = vrot.lane.b32.xlu1 %v6738_v55, %s4425_s19  ;;  %v2338_v48 = vmul.f32 %v6689_v44, %v6663_v3  ;;  %v2366_v5 = vmax.f32 %v2334_v43, 0.0  ;;  %v2339_v61 = vmul.f32 %v6689_v44, %v6670_v6  ;;  %v2367_v9 = vmax.f32 %v2335_v30, 0.0 }
 0x49a   : > { %2439 = vst.msk [vmem:[#allocation3 + $0x91] sm:$0xff] %vm1637_vm2, %v2351_v12  ;;  %2790 = vrot.lane.b32.xlu2 %v6745_v15, %s4425_s19  ;;  %v6769_v23 = vld [vmem:[#allocation3 + $0x39] sm:$0xff]  ;;  %v2368_v27 = vmax.f32 %v2336_v35, 0.0  ;;  %v2369_v25 = vmax.f32 %v2337_v60, 0.0 }
 0x49b   : > { %2440 = vst.msk [vmem:[#allocation3 + $0x99] sm:$0xff] %vm1637_vm2, %v2352_v1  ;;  %v6774_v0 = vld [vmem:[#allocation3 + $0x49] sm:$0xff]  ;;  %v2370_v3 = vmax.f32 %v2338_v48, 0.0  ;;  %v2371_v44 = vmax.f32 %v2339_v61, 0.0  ;;  %v6916_v39 = vld [vmem:[#allocation3 + $0x32] sm:$0xff] }
 0x49c   : > { %2441 = vst.msk [vmem:[#allocation3 + $0xa9] sm:$0xff] %vm1637_vm2, %v2353_v62  ;;  %v6781_v41 = vld [vmem:[#allocation3 + $0x51] sm:$0xff]  ;;  %v2525_v62 = vld [vmem:[#allocation3 + $0x2] sm:$0xff] }
 0x49d   : > { %2442 = vst.msk [vmem:[#allocation3 + $0xb1] sm:$0xff] %vm1637_vm2, %v2354_v17  ;;  %v6803_v59 = vld [vmem:[#allocation3 + $0x61] sm:$0xff]  ;;  %v6930_v24 = vld [vmem:[#allocation3 + $0x52] sm:$0xff] }
 0x49e   : > { %2443 = vst.msk [vmem:[#allocation3 + $0xc1] sm:$0xff] %vm1637_vm2, %v2355_v26  ;;  %v6806_v57 = vld [vmem:[#allocation3 + $0x69] sm:$0xff]  ;;  %v6908_v17 = vld [vmem:[#allocation3 + $0x1a] sm:$0xff] }
 0x49f   : > { %2444 = vst.msk [vmem:[#allocation3 + $0xc9] sm:$0xff] %vm1637_vm2, %v2356_v34  ;;  %v6811_v6 = vld [vmem:[#allocation3 + $0x79] sm:$0xff]  ;;  %v6914_v26 = vld [vmem:[#allocation3 + $0x22] sm:$0xff] }
 0x4a0   : > { %2445 = vst.msk [vmem:[#allocation3 + $0xd9] sm:$0xff] %vm1637_vm2, %v2357_v4  ;;  %2792 = vrot.lane.b32.xlu0 %v6769_v23, %s4425_s19  ;;  %v6822_v36 = vld [vmem:[#allocation3 + $0x81] sm:$0xff]  ;;  %v6928_v4 = vld [vmem:[#allocation3 + $0x4a] sm:$0xff] }
 0x4a1   : > { %2446 = vst.msk [vmem:[#allocation3 + $0xe1] sm:$0xff] %vm1637_vm2, %v2358_v22  ;;  %2794 = vrot.lane.b32.xlu1 %v6774_v0, %s4425_s19  ;;  %v6824_v52 = vld [vmem:[#allocation3 + $0x91] sm:$0xff]  ;;  %v6922_v34 = vld [vmem:[#allocation3 + $0x3a] sm:$0xff]  ;;  %v6936_v22 = vld [vmem:[#allocation3 + $0x62] sm:$0xff] }
 0x4a2   : > { %2447 = vst.msk [vmem:[#allocation3 + $0xf1] sm:$0xff] %vm1637_vm2, %v2359_v47  ;;  %2796 = vrot.lane.b32.xlu2 %v6781_v41, %s4425_s19  ;;  %v6828_v49 = vld [vmem:[#allocation3 + $0x99] sm:$0xff]  ;;  %v6912_v10 = vpop.permute.xlu2 %2784  ;;  %v6942_v47 = vld [vmem:[#allocation3 + $0x6a] sm:$0xff] }
 0x4a3   : > { %2448 = vst.msk [vmem:[#allocation3 + $0xf9] sm:$0xff] %vm1637_vm2, %v2360_v14  ;;  %v6834_v45 = vld [vmem:[#allocation3 + $0xa9] sm:$0xff]  ;;  %v6944_v46 = vld [vmem:[#allocation3 + $0x7a] sm:$0xff]  ;;  %v6958_v43 = vld [vmem:[#allocation3 + $0x92] sm:$0xff] }
 0x4a4   : > { %2449 = vst.msk [vmem:[#allocation3 + $0x109] sm:$0xff] %vm1637_vm2, %v2361_v13  ;;  %v6836_v54 = vld [vmem:[#allocation3 + $0xb1] sm:$0xff]  ;;  %v6950_v14 = vld [vmem:[#allocation3 + $0x82] sm:$0xff] }
 0x4a5   : > { %2450 = vst.msk [vmem:[#allocation3 + $0x111] sm:$0xff] %vm1637_vm2, %v2362_v58  ;;  %v6840_v11 = vld [vmem:[#allocation3 + $0xc1] sm:$0xff]  ;;  %v6966_v30 = vld [vmem:[#allocation3 + $0xaa] sm:$0xff]  ;;  %v6976_v60 = vld [vmem:[#allocation3 + $0xb2] sm:$0xff] }
 0x4a6   : > { %2451 = vst.msk [vmem:[#allocation3 + $0x121] sm:$0xff] %vm1637_vm2, %v2363_v56  ;;  %v6846_v33 = vld [vmem:[#allocation3 + $0xc9] sm:$0xff]  ;;  %v6960_v58 = vld [vmem:[#allocation3 + $0x9a] sm:$0xff] }
 0x4a7   : > { %2452 = vst.msk [vmem:[#allocation3 + $0x129] sm:$0xff] %vm1637_vm2, %v2364_v16  ;;  %v6848_v42 = vld [vmem:[#allocation3 + $0xd9] sm:$0xff]  ;;  %v6984_v48 = vld [vmem:[#allocation3 + $0xca] sm:$0xff] }
 0x4a8   : > { %2453 = vst.msk [vmem:[#allocation3 + $0x139] sm:$0xff] %vm1637_vm2, %v2365_v38  ;;  %2798 = vrot.lane.b32.xlu0 %v6803_v59, %s4425_s19  ;;  %v6852_v21 = vld [vmem:[#allocation3 + $0xe1] sm:$0xff] }
 0x4a9   : > { %2454 = vst.msk [vmem:[#allocation3 + $0x141] sm:$0xff] %vm1637_vm2, %v2366_v5  ;;  %2800 = vrot.lane.b32.xlu1 %v6806_v57, %s4425_s19  ;;  %v6858_v29 = vld [vmem:[#allocation3 + $0xf1] sm:$0xff]  ;;  %v6978_v38 = vld [vmem:[#allocation3 + $0xc2] sm:$0xff] }
 0x4aa   : > { %2455 = vst.msk [vmem:[#allocation3 + $0x151] sm:$0xff] %vm1637_vm2, %v2367_v9  ;;  %2802 = vrot.lane.b32.xlu2 %v6811_v6, %s4425_s19  ;;  %v6860_v37 = vld [vmem:[#allocation3 + $0xf9] sm:$0xff] }
 0x4ab   : > { %2456 = vst.msk [vmem:[#allocation3 + $0x159] sm:$0xff] %vm1637_vm2, %v2368_v27  ;;  %v6864_v2 = vld [vmem:[#allocation3 + $0x109] sm:$0xff]  ;;  %v6994_v27 = vld [vmem:[#allocation3 + $0xda] sm:$0xff] }
 0x4ac   : > { %2457 = vst.msk [vmem:[#allocation3 + $0x169] sm:$0xff] %vm1637_vm2, %v2369_v25  ;;  %v6870_v50 = vld [vmem:[#allocation3 + $0x111] sm:$0xff]  ;;  %v6996_v25 = vld [vmem:[#allocation3 + $0xe2] sm:$0xff]  ;;  %v2546_v51 = vld [vmem:[#allocation3 + $0xfa] sm:$0xff] }
 0x4ad   : > { %2458 = vst.msk [vmem:[#allocation3 + $0x171] sm:$0xff] %vm1637_vm2, %v2370_v3  ;;  %v6872_v63 = vld [vmem:[#allocation3 + $0x121] sm:$0xff]  ;;  %v2545_v3 = vld [vmem:[#allocation3 + $0xf2] sm:$0xff] }
 0x4ae   : > { %2459 = vst.msk [vmem:[#allocation3 + $0x181] sm:$0xff] %vm1637_vm2, %v2371_v44  ;;  %v6876_v32 = vld [vmem:[#allocation3 + $0x129] sm:$0xff] }
 0x4af   : > { %v6882_v20 = vld [vmem:[#allocation3 + $0x139] sm:$0xff]  ;;  %8585 = vst [vmem:[#allocation46_spill] sm:$0xff] %v6912_v10 }
 0x4b0   : > { %2804 = vrot.lane.b32.xlu0 %v6822_v36, %s4425_s19  ;;  %v6884_v8 = vld [vmem:[#allocation3 + $0x141] sm:$0xff]  ;;  %8596 = vst [vmem:[#allocation5_spill] sm:$0xff] %v6994_v27  ;;  %v2548_v10 = vld [vmem:[#allocation3 + $0x112] sm:$0xff] }
 0x4b1   : > { %2806 = vrot.lane.b32.xlu1 %v6824_v52, %s4425_s19  ;;  %v6888_v12 = vld [vmem:[#allocation3 + $0x151] sm:$0xff] }
 0x4b2   : > { %2808 = vrot.lane.b32.xlu2 %v6828_v49, %s4425_s19  ;;  %v6894_v31 = vld [vmem:[#allocation3 + $0x159] sm:$0xff] }
 0x4b3   : > { %v6896_v1 = vld [vmem:[#allocation3 + $0x169] sm:$0xff] }
 0x4b4   : > { %v6900_v28 = vld [vmem:[#allocation3 + $0x171] sm:$0xff] }
 0x4b8   : > { %2810 = vrot.lane.b32.xlu0 %v6834_v45, %s4425_s19 }
 0x4b9   : > { %2812 = vrot.lane.b32.xlu1 %v6836_v54, %s4425_s19 }
 0x4ba   : > { %2814 = vrot.lane.b32.xlu2 %v6840_v11, %s4425_s19 }
 0x4bc   : > { %v6952_v18 = vpop.permute.xlu1 %2782 }
 0x4bd   : > { %8588 = vst [vmem:[#allocation8_spill] sm:$0xff] %v6952_v18  ;;  %v2547_v18 = vld [vmem:[#allocation3 + $0x10a] sm:$0xff] }
 0x4c0   : > { %2816 = vrot.lane.b32.xlu0 %v6846_v33, %s4425_s19 }
 0x4c1   : > { %2818 = vrot.lane.b32.xlu1 %v6848_v42, %s4425_s19 }
 0x4c2   : > { %2820 = vrot.lane.b32.xlu2 %v6852_v21, %s4425_s19 }
 0x4c8   : > { %2822 = vrot.lane.b32.xlu0 %v6858_v29, %s4425_s19 }
 0x4c9   : > { %2824 = vrot.lane.b32.xlu1 %v6860_v37, %s4425_s19 }
 0x4ca   : > { %2826 = vrot.lane.b32.xlu2 %v6864_v2, %s4425_s19 }
 0x4d0   : > { %2828 = vrot.lane.b32.xlu0 %v6870_v50, %s4425_s19 }
 0x4d1   : > { %2830 = vrot.lane.b32.xlu1 %v6872_v63, %s4425_s19 }
 0x4d2   : > { %2832 = vrot.lane.b32.xlu2 %v6876_v32, %s4425_s19 }
 0x4d8   : > { %2834 = vrot.lane.b32.xlu0 %v6882_v20, %s4425_s19 }
 0x4d9   : > { %2836 = vrot.lane.b32.xlu1 %v6884_v8, %s4425_s19 }
 0x4da   : > { %2838 = vrot.lane.b32.xlu2 %v6888_v12, %s4425_s19 }
 0x4e0   : > { %2840 = vrot.lane.b32.xlu0 %v6894_v31, %s4425_s19 }
 0x4e1   : > { %2842 = vrot.lane.b32.xlu1 %v6896_v1, %s4425_s19 }
 0x4e2   : > { %2844 = vrot.lane.b32.xlu2 %v6900_v28, %s4425_s19 }
 0x4e8   : > { %2910 = vrot.lane.b32.xlu0 %v2525_v62, %s4427_s21 }
 0x4e9   : > { %2912 = vrot.lane.b32.xlu1 %v2526_v53, %s4427_s21 }
 0x4ea   : > { %2914 = vrot.lane.b32.xlu2 %v6908_v17, %s4427_s21 }
 0x4f0   : > { %2916 = vrot.lane.b32.xlu0 %v6914_v26, %s4427_s21 }
 0x4f1   : > { %2918 = vrot.lane.b32.xlu1 %v6916_v39, %s4427_s21 }
 0x4f2   : > { %2920 = vrot.lane.b32.xlu2 %v6922_v34, %s4427_s21 }
 0x4f4   : > { %v6926_v19 = vpop.permute.xlu2 %2790 }
 0x4f5   : > { %8586 = vst [vmem:[#allocation19_spill] sm:$0xff] %v6926_v19 }
 0x4f8   : > { %2922 = vrot.lane.b32.xlu0 %v6928_v4, %s4427_s21 }
 0x4f9   : > { %2924 = vrot.lane.b32.xlu1 %v6930_v24, %s4427_s21 }
 0x4fa   : > { %2926 = vrot.lane.b32.xlu2 %v6936_v22, %s4427_s21 }
 0x4fc   : > { %v6940_v7 = vpop.permute.xlu2 %2796 }
 0x4fd   : > { %8587 = vst [vmem:[#allocation48_spill] sm:$0xff] %v6940_v7  ;;  %v2549_v7 = vld [vmem:[#allocation3 + $0x122] sm:$0xff] }
 0x500   : > { %2928 = vrot.lane.b32.xlu0 %v6942_v47, %s4427_s21 }
 0x501   : > { %2930 = vrot.lane.b32.xlu1 %v6944_v46, %s4427_s21 }
 0x502   : > { %2932 = vrot.lane.b32.xlu2 %v6950_v14, %s4427_s21 }
 0x504   : > { %v6956_v13 = vpop.permute.xlu2 %2802 }
 0x505   : > { %8589 = vst [vmem:[#allocation49_spill] sm:$0xff] %v6956_v13  ;;  %v2550_v13 = vld [vmem:[#allocation3 + $0x12a] sm:$0xff] }
 0x508   : > { %2934 = vrot.lane.b32.xlu0 %v6958_v43, %s4427_s21 }
 0x509   : > { %2936 = vrot.lane.b32.xlu1 %v6960_v58, %s4427_s21 }
 0x50a   : > { %2938 = vrot.lane.b32.xlu2 %v6966_v30, %s4427_s21  ;;  %v6970_v56 = vpop.permute.xlu0 %2786 }
 0x50b   : > { %8590 = vst [vmem:[#allocation12_spill] sm:$0xff] %v6970_v56  ;;  %v6972_v35 = vpop.permute.xlu1 %2788  ;;  %v7180_v56 = vld [vmem:[#allocation3 + $0x138] sm:$0xff] }
 0x50c   : > { %8591 = vst [vmem:[#allocation38_spill] sm:$0xff] %v6972_v35  ;;  %v6974_v16 = vpop.permute.xlu2 %2808 }
 0x50d   : > { %8592 = vst [vmem:[#allocation4_spill] sm:$0xff] %v6974_v16  ;;  %v7027_v16 = vld [vmem:[#allocation3 + $0x142] sm:$0xff] }
 0x50e   : > { %8606 = vst [vmem:[#allocation23_spill] sm:$0xff] %v7027_v16 }
 0x50f   : > { %8648 = vst [vmem:[#allocation106_spill] sm:$0xff] %v7180_v56 }
 0x510   : > { %2940 = vrot.lane.b32.xlu0 %v6976_v60, %s4427_s21 }
 0x511   : > { %2942 = vrot.lane.b32.xlu1 %v6978_v38, %s4427_s21 }
 0x512   : > { %2944 = vrot.lane.b32.xlu2 %v6984_v48, %s4427_s21  ;;  %v6988_v5 = vpop.permute.xlu0 %2792 }
 0x513   : > { %8593 = vst [vmem:[#allocation50_spill] sm:$0xff] %v6988_v5  ;;  %v6990_v61 = vpop.permute.xlu1 %2794  ;;  %v7093_v5 = vld [vmem:[#allocation3 + $0x68] sm:$0xff] }
 0x514   : > { %8594 = vst [vmem:[#allocation34_spill] sm:$0xff] %v6990_v61  ;;  %v6992_v9 = vpop.permute.xlu2 %2814  ;;  %v7067_v61 = vld [vmem:[#allocation3 + $0x38] sm:$0xff] }
 0x515   : > { %8595 = vst [vmem:[#allocation62_spill] sm:$0xff] %v6992_v9 }
 0x516   : > { %8615 = vst [vmem:[#allocation129_spill] sm:$0xff] %v7067_v61 }
 0x517   : > { %8624 = vst [vmem:[#allocation76_spill] sm:$0xff] %v7093_v5 }
 0x518   : > { %2946 = vrot.lane.b32.xlu0 %v6994_v27, %s4427_s21  ;;  %v2471_v27 = vld [vmem:[#allocation3 + $0x78] sm:$0xff] }
 0x519   : > { %2948 = vrot.lane.b32.xlu1 %v6996_v25, %s4427_s21 }
 0x51a   : > { %2950 = vrot.lane.b32.xlu2 %v2545_v3, %s4427_s21  ;;  %v7003_v44 = vpop.permute.xlu0 %2798 }
 0x51b   : > { %8597 = vst [vmem:[#allocation22_spill] sm:$0xff] %v7003_v44  ;;  %v7005_v62 = vpop.permute.xlu1 %2800  ;;  %v2468_v44 = vld [vmem:[#allocation3 + $0x50] sm:$0xff] }
 0x51c   : > { %8598 = vst [vmem:[#allocation53_spill] sm:$0xff] %v7005_v62  ;;  %v7007_v53 = vpop.permute.xlu2 %2820  ;;  %v2465_v62 = vld [vmem:[#allocation3 + $0x30] sm:$0xff] }
 0x51d   : > { %8599 = vst [vmem:[#allocation64_spill] sm:$0xff] %v7007_v53  ;;  %v2551_v53 = vld [vmem:[#allocation3 + $0x13a] sm:$0xff] }
 0x520   : > { %2952 = vrot.lane.b32.xlu0 %v2546_v51, %s4427_s21 }
 0x521   : > { %2954 = vrot.lane.b32.xlu1 %v2547_v18, %s4427_s21 }
 0x522   : > { %2956 = vrot.lane.b32.xlu2 %v2548_v10, %s4427_s21  ;;  %v7012_v9 = vpop.permute.xlu0 %2804 }
 0x523   : > { %8600 = vst [vmem:[#allocation11_spill] sm:$0xff] %v7012_v9  ;;  %v7014_v19 = vpop.permute.xlu1 %2806 }
 0x524   : > { %8601 = vst [vmem:[#allocation13_spill] sm:$0xff] %v7014_v19  ;;  %v7016_v3 = vpop.permute.xlu2 %2826  ;;  %v7029_v19 = vld [vmem:[#allocation3 + $0x152] sm:$0xff] }
 0x525   : > { %8602 = vst [vmem:[#allocation41_spill] sm:$0xff] %v7016_v3 }
 0x526   : > { %8607 = vst [vmem:[#allocation52_spill] sm:$0xff] %v7029_v19 }
 0x528   : > { %2958 = vrot.lane.b32.xlu0 %v2549_v7, %s4427_s21  ;;  %v7035_v7 = vld [vmem:[#allocation3 + $0x15a] sm:$0xff] }
 0x529   : > { %2960 = vrot.lane.b32.xlu1 %v2550_v13, %s4427_s21  ;;  %8608 = vst [vmem:[#allocation54_spill] sm:$0xff] %v7035_v7 }
 0x52a   : > { %2962 = vrot.lane.b32.xlu2 %v2551_v53, %s4427_s21  ;;  %v7021_v51 = vpop.permute.xlu0 %2810 }
 0x52b   : > { %8603 = vst [vmem:[#allocation68_spill] sm:$0xff] %v7021_v51  ;;  %v7023_v18 = vpop.permute.xlu1 %2812  ;;  %v7047_v51 = vld [vmem:[#allocation3 + $0x172] sm:$0xff] }
 0x52c   : > { %8604 = vst [vmem:[#allocation154_spill] sm:$0xff] %v7023_v18  ;;  %v7025_v10 = vpop.permute.xlu2 %2832  ;;  %v7051_v18 = vld [vmem:[#allocation3 + $0x18] sm:$0xff] }
 0x52d   : > { %8605 = vst [vmem:[#allocation15_spill] sm:$0xff] %v7025_v10  ;;  %v7045_v10 = vld [vmem:[#allocation3 + $0x16a] sm:$0xff] }
 0x52e   : > { %8612 = vst [vmem:[#allocation24_spill] sm:$0xff] %v7051_v18 }
 0x530   : > { %2964 = vrot.lane.b32.xlu0 %v7027_v16, %s4427_s21  ;;  %v7063_v16 = vld [vmem:[#allocation3 + $0x20] sm:$0xff] }
 0x531   : > { %2966 = vrot.lane.b32.xlu1 %v7029_v19, %s4427_s21  ;;  %8614 = vst [vmem:[#allocation55_spill] sm:$0xff] %v7063_v16 }
 0x532   : > { %2968 = vrot.lane.b32.xlu2 %v7035_v7, %s4427_s21  ;;  %v7039_v13 = vpop.permute.xlu0 %2816 }
 0x533   : > { %8609 = vst [vmem:[#allocation81_spill] sm:$0xff] %v7039_v13  ;;  %v7041_v53 = vpop.permute.xlu1 %2818 }
 0x534   : > { %8610 = vst [vmem:[#allocation92_spill] sm:$0xff] %v7041_v53  ;;  %v7043_v3 = vpop.permute.xlu2 %2838 }
 0x535   : > { %8611 = vst [vmem:[#allocation107_spill] sm:$0xff] %v7043_v3 }
 0x538   : > { %2970 = vrot.lane.b32.xlu0 %v7045_v10, %s4427_s21 }
 0x539   : > { %2972 = vrot.lane.b32.xlu1 %v7047_v51, %s4427_s21 }
 0x53a   : > { %3038 = vrot.lane.b32.xlu2 %v7051_v18, %s4429_s23  ;;  %v7057_v13 = vpop.permute.xlu0 %2822  ;;  %v7176_v18 = vld [vmem:[#allocation3 + $0x128] sm:$0xff] }
 0x53b   : > { %v7059_v53 = vpop.permute.xlu1 %2824  ;;  %8647 = vst [vmem:[#allocation98_spill] sm:$0xff] %v7176_v18 }
 0x53c   : > { %v7061_v3 = vpop.permute.xlu2 %2844 }
 0x53d   : > { %8613 = vst [vmem:[#allocation51_spill] sm:$0xff] %v7061_v3  ;;  %v7078_v3 = vld [vmem:[#allocation3 + $0x48] sm:$0xff] }
 0x53e   : > { %8619 = vst [vmem:[#allocation7_spill] sm:$0xff] %v7078_v3 }
 0x540   : > { %3040 = vrot.lane.b32.xlu0 %v7063_v16, %s4429_s23  ;;  %v7082_v16 = vld [vmem:[#allocation3 + $0x60] sm:$0xff] }
 0x541   : > { %3042 = vrot.lane.b32.xlu1 %v2465_v62, %s4429_s23  ;;  %8620 = vst [vmem:[#allocation27_spill] sm:$0xff] %v7082_v16 }
 0x542   : > { %3044 = vrot.lane.b32.xlu2 %v7067_v61, %s4429_s23  ;;  %v7072_v19 = vpop.permute.xlu0 %2828 }
 0x543   : > { %8616 = vst [vmem:[#allocation140_spill] sm:$0xff] %v7072_v19  ;;  %v7074_v35 = vpop.permute.xlu1 %2830  ;;  %v7194_v19 = vld [vmem:[#allocation3 + $0x150] sm:$0xff] }
 0x544   : > { %8617 = vst [vmem:[#allocation156_spill] sm:$0xff] %v7074_v35  ;;  %v7076_v9 = vpop.permute.xlu2 %2914 }
 0x545   : > { %8618 = vst [vmem:[#allocation161_spill] sm:$0xff] %v7076_v9  ;;  %v7163_v9 = vld [vmem:[#allocation3 + $0x110] sm:$0xff] }
 0x546   : > { %8643 = vst [vmem:[#allocation71_spill] sm:$0xff] %v7163_v9 }
 0x547   : > { %8652 = vst [vmem:[#allocation120_spill] sm:$0xff] %v7194_v19 }
 0x548   : > { %3046 = vrot.lane.b32.xlu0 %v7078_v3, %s4429_s23  ;;  %v7097_v3 = vld [vmem:[#allocation3 + $0x80] sm:$0xff] }
 0x549   : > { %3048 = vrot.lane.b32.xlu1 %v2468_v44, %s4429_s23  ;;  %8625 = vst [vmem:[#allocation85_spill] sm:$0xff] %v7097_v3 }
 0x54a   : > { %3050 = vrot.lane.b32.xlu2 %v7082_v16, %s4429_s23  ;;  %v7087_v62 = vpop.permute.xlu0 %2834 }
 0x54b   : > { %8621 = vst [vmem:[#allocation36_spill] sm:$0xff] %v7087_v62  ;;  %v7089_v7 = vpop.permute.xlu1 %2836  ;;  %v7110_v62 = vld [vmem:[#allocation3 + $0x98] sm:$0xff] }
 0x54c   : > { %8622 = vst [vmem:[#allocation58_spill] sm:$0xff] %v7089_v7  ;;  %v7091_v61 = vpop.permute.xlu2 %2920 }
 0x54d   : > { %8623 = vst [vmem:[#allocation69_spill] sm:$0xff] %v7091_v61  ;;  %v7108_v61 = vld [vmem:[#allocation3 + $0x90] sm:$0xff] }
 0x54e   : > { %8629 = vst [vmem:[#allocation25_spill] sm:$0xff] %v7108_v61 }
 0x54f   : > { %8630 = vst [vmem:[#allocation112_spill] sm:$0xff] %v7110_v62 }
 0x550   : > { %3052 = vrot.lane.b32.xlu0 %v7093_v5, %s4429_s23  ;;  %v7114_v5 = vld [vmem:[#allocation3 + $0xa8] sm:$0xff] }
 0x551   : > { %3054 = vrot.lane.b32.xlu1 %v2471_v27, %s4429_s23  ;;  %8631 = vst [vmem:[#allocation60_spill] sm:$0xff] %v7114_v5 }
 0x552   : > { %3056 = vrot.lane.b32.xlu2 %v7097_v3, %s4429_s23  ;;  %v7102_v44 = vpop.permute.xlu0 %2840  ;;  %v7126_v3 = vld [vmem:[#allocation3 + $0xb0] sm:$0xff] }
 0x553   : > { %8626 = vst [vmem:[#allocation86_spill] sm:$0xff] %v7102_v44  ;;  %v7104_v16 = vpop.permute.xlu1 %2842 }
 0x554   : > { %8627 = vst [vmem:[#allocation90_spill] sm:$0xff] %v7104_v16  ;;  %v7106_v7 = vpop.permute.xlu2 %2926 }
 0x555   : > { %8628 = vst [vmem:[#allocation103_spill] sm:$0xff] %v7106_v7  ;;  %v2477_v7 = vld [vmem:[#allocation3 + $0xc0] sm:$0xff] }
 0x556   : > { %8635 = vst [vmem:[#allocation134_spill] sm:$0xff] %v7126_v3 }
 0x558   : > { %3058 = vrot.lane.b32.xlu0 %v7108_v61, %s4429_s23  ;;  %v7130_v61 = vld [vmem:[#allocation3 + $0xc8] sm:$0xff] }
 0x559   : > { %3060 = vrot.lane.b32.xlu1 %v7110_v62, %s4429_s23  ;;  %8636 = vst [vmem:[#allocation138_spill] sm:$0xff] %v7130_v61 }
 0x55a   : > { %3062 = vrot.lane.b32.xlu2 %v7114_v5, %s4429_s23  ;;  %v7120_v27 = vpop.permute.xlu0 %2910  ;;  %v7141_v5 = vld [vmem:[#allocation3 + $0xd8] sm:$0xff] }
 0x55b   : > { %8632 = vst [vmem:[#allocation66_spill] sm:$0xff] %v7120_v27  ;;  %v7122_v44 = vpop.permute.xlu1 %2912 }
 0x55c   : > { %8633 = vst [vmem:[#allocation124_spill] sm:$0xff] %v7122_v44  ;;  %v7124_v16 = vpop.permute.xlu2 %2932 }
 0x55d   : > { %8634 = vst [vmem:[#allocation133_spill] sm:$0xff] %v7124_v16  ;;  %v7143_v16 = vld [vmem:[#allocation3 + $0xe0] sm:$0xff] }
 0x560   : > { %3064 = vrot.lane.b32.xlu0 %v7126_v3, %s4429_s23  ;;  %v7147_v3 = vld [vmem:[#allocation3 + $0xf0] sm:$0xff] }
 0x561   : > { %3066 = vrot.lane.b32.xlu1 %v2477_v7, %s4429_s23 }
 0x562   : > { %3068 = vrot.lane.b32.xlu2 %v7130_v61, %s4429_s23  ;;  %v7135_v62 = vpop.permute.xlu0 %2916  ;;  %v2483_v61 = vld [vmem:[#allocation3 + $0x108] sm:$0xff] }
 0x563   : > { %8637 = vst [vmem:[#allocation151_spill] sm:$0xff] %v7135_v62  ;;  %v7137_v27 = vpop.permute.xlu1 %2918  ;;  %v7159_v62 = vld [vmem:[#allocation3 + $0xf8] sm:$0xff] }
 0x564   : > { %8638 = vst [vmem:[#allocation163_spill] sm:$0xff] %v7137_v27  ;;  %v7139_v44 = vpop.permute.xlu2 %2938 }
 0x565   : > { %8639 = vst [vmem:[#allocation14_spill] sm:$0xff] %v7139_v44 }
 0x568   : > { %3070 = vrot.lane.b32.xlu0 %v7141_v5, %s4429_s23 }
 0x569   : > { %3072 = vrot.lane.b32.xlu1 %v7143_v16, %s4429_s23 }
 0x56a   : > { %3074 = vrot.lane.b32.xlu2 %v7147_v3, %s4429_s23  ;;  %v7153_v7 = vpop.permute.xlu0 %2922 }
 0x56b   : > { %8640 = vst [vmem:[#allocation16_spill] sm:$0xff] %v7153_v7  ;;  %v7155_v27 = vpop.permute.xlu1 %2924 }
 0x56c   : > { %8641 = vst [vmem:[#allocation21_spill] sm:$0xff] %v7155_v27  ;;  %v7157_v44 = vpop.permute.xlu2 %2944 }
 0x56d   : > { %8642 = vst [vmem:[#allocation44_spill] sm:$0xff] %v7157_v44  ;;  %v7174_v44 = vld [vmem:[#allocation3 + $0x120] sm:$0xff] }
 0x56e   : > { %8646 = vst [vmem:[#allocation93_spill] sm:$0xff] %v7174_v44 }
 0x570   : > { %3076 = vrot.lane.b32.xlu0 %v7159_v62, %s4429_s23 }
 0x571   : > { %3078 = vrot.lane.b32.xlu1 %v2483_v61, %s4429_s23 }
 0x572   : > { %3080 = vrot.lane.b32.xlu2 %v7163_v9, %s4429_s23  ;;  %v7168_v35 = vpop.permute.xlu0 %2928  ;;  %v7192_v9 = vld [vmem:[#allocation3 + $0x140] sm:$0xff] }
 0x573   : > { %8644 = vst [vmem:[#allocation77_spill] sm:$0xff] %v7168_v35  ;;  %v7170_v7 = vpop.permute.xlu1 %2930 }
 0x574   : > { %8645 = vst [vmem:[#allocation88_spill] sm:$0xff] %v7170_v7  ;;  %v7172_v27 = vpop.permute.xlu2 %2950 }
 0x578   : > { %3082 = vrot.lane.b32.xlu0 %v7174_v44, %s4429_s23  ;;  %v7198_v44 = vld [vmem:[#allocation3 + $0x158] sm:$0xff] }
 0x579   : > { %3084 = vrot.lane.b32.xlu1 %v7176_v18, %s4429_s23  ;;  %8653 = vst [vmem:[#allocation125_spill] sm:$0xff] %v7198_v44 }
 0x57a   : > { %3086 = vrot.lane.b32.xlu2 %v7180_v56, %s4429_s23  ;;  %v7186_v61 = vpop.permute.xlu0 %2934  ;;  %v7210_v56 = vld [vmem:[#allocation3 + $0x168] sm:$0xff] }
 0x57b   : > { %8649 = vst [vmem:[#allocation108_spill] sm:$0xff] %v7186_v61  ;;  %v7188_v7 = vpop.permute.xlu1 %2936 }
 0x57c   : > { %8650 = vst [vmem:[#allocation20_spill] sm:$0xff] %v7188_v7  ;;  %v7190_v35 = vpop.permute.xlu2 %2956 }
 0x57d   : > { %8651 = vst [vmem:[#allocation47_spill] sm:$0xff] %v7190_v35  ;;  %v7212_v35 = vld [vmem:[#allocation3 + $0x170] sm:$0xff] }
 0x57e   : > { %8657 = vst [vmem:[#allocation155_spill] sm:$0xff] %v7210_v56 }
 0x57f   : > { %8658 = vst [vmem:[#allocation157_spill] sm:$0xff] %v7212_v35 }
 0x580   : > { %3088 = vrot.lane.b32.xlu0 %v7192_v9, %s4429_s23 }
 0x581   : > { %3090 = vrot.lane.b32.xlu1 %v7194_v19, %s4429_s23  ;;  %v7218_v19 = vld [vmem:[#allocation3 + $0x180] sm:$0xff] }
 0x582   : > { %3092 = vrot.lane.b32.xlu2 %v7198_v44, %s4429_s23  ;;  %v7204_v18 = vpop.permute.xlu0 %2940 }
 0x583   : > { %8654 = vst [vmem:[#allocation136_spill] sm:$0xff] %v7204_v18  ;;  %v7206_v7 = vpop.permute.xlu1 %2942 }
 0x584   : > { %8655 = vst [vmem:[#allocation141_spill] sm:$0xff] %v7206_v7  ;;  %v7208_v61 = vpop.permute.xlu2 %2962 }
 0x585   : > { %8656 = vst [vmem:[#allocation146_spill] sm:$0xff] %v7208_v61  ;;  %v7228_v61 = vld [vmem:[#allocation3 + $0x188] sm:$0xff] }
 0x588   : > { %3094 = vrot.lane.b32.xlu0 %v7210_v56, %s4429_s23 }
 0x589   : > { %3096 = vrot.lane.b32.xlu1 %v7212_v35, %s4429_s23 }
 0x58a   : > { %3098 = vrot.lane.b32.xlu2 %v7218_v19, %s4429_s23  ;;  %v7222_v18 = vpop.permute.xlu0 %2946 }
 0x58b   : > { %8659 = vst [vmem:[#allocation160_spill] sm:$0xff] %v7222_v18  ;;  %v7224_v7 = vpop.permute.xlu1 %2948 }
 0x58c   : > { %8660 = vst [vmem:[#allocation18_spill] sm:$0xff] %v7224_v7  ;;  %v7226_v44 = vpop.permute.xlu2 %2968 }
 0x590   : > { %3100 = vrot.lane.b32.xlu0 %v7228_v61, %s4429_s23 }
 0x591   : > { %3166 = vrot.lane.b32.xlu1 %v6733_v40, %s4431_s25 }
 0x592   : > { %3168 = vrot.lane.b32.xlu2 %v6738_v55, %s4431_s25  ;;  %v7236_v56 = vpop.permute.xlu0 %2952 }
 0x593   : > { %v7238_v35 = vpop.permute.xlu1 %2954 }
 0x594   : > { %8661 = vst [vmem:[#allocation28_spill] sm:$0xff] %v7238_v35  ;;  %v7240_v18 = vpop.permute.xlu2 %3038  ;;  %v3794_v35 = vsel %vm1637_vm2, %v7147_v3, %v7057_v13 }
 0x595   : > { %8662 = vst [vmem:[#allocation37_spill] sm:$0xff] %v7240_v18  ;;  %v7350_v18 = vld [vmem:[#allocation3 + $0x181] sm:$0xff] }
 0x598   : > { %3170 = vrot.lane.b32.xlu0 %v6745_v15, %s4431_s25 }
 0x599   : > { %3172 = vrot.lane.b32.xlu1 %v6769_v23, %s4431_s25 }
 0x59a   : > { %3174 = vrot.lane.b32.xlu2 %v6774_v0, %s4431_s25  ;;  %v7248_v7 = vpop.permute.xlu0 %2958 }
 0x59b   : > { %v7250_v40 = vpop.permute.xlu1 %2960 }
 0x59c   : > { %v7252_v55 = vpop.permute.xlu2 %3044 }
 0x5a0   : > { %3176 = vrot.lane.b32.xlu0 %v6781_v41, %s4431_s25 }
 0x5a1   : > { %3178 = vrot.lane.b32.xlu1 %v6803_v59, %s4431_s25 }
 0x5a2   : > { %3180 = vrot.lane.b32.xlu2 %v6806_v57, %s4431_s25  ;;  %v7260_v15 = vpop.permute.xlu0 %2964 }
 0x5a3   : > { %v7262_v23 = vpop.permute.xlu1 %2966 }
 0x5a4   : > { %v7264_v0 = vpop.permute.xlu2 %3050 }
 0x5a8   : > { %3182 = vrot.lane.b32.xlu0 %v6811_v6, %s4431_s25 }
 0x5a9   : > { %3184 = vrot.lane.b32.xlu1 %v6822_v36, %s4431_s25 }
 0x5aa   : > { %3186 = vrot.lane.b32.xlu2 %v6824_v52, %s4431_s25  ;;  %v7272_v41 = vpop.permute.xlu0 %2970 }
 0x5ab   : > { %v7274_v59 = vpop.permute.xlu1 %2972 }
 0x5ac   : > { %v7276_v57 = vpop.permute.xlu2 %3056 }
 0x5b0   : > { %3188 = vrot.lane.b32.xlu0 %v6828_v49, %s4431_s25 }
 0x5b1   : > { %3190 = vrot.lane.b32.xlu1 %v6834_v45, %s4431_s25 }
 0x5b2   : > { %3192 = vrot.lane.b32.xlu2 %v6836_v54, %s4431_s25  ;;  %v7284_v6 = vpop.permute.xlu0 %3040 }
 0x5b3   : > { %8663 = vst [vmem:[#allocation57_spill] sm:$0xff] %v7284_v6  ;;  %v7286_v36 = vpop.permute.xlu1 %3042 }
 0x5b4   : > { %v7288_v52 = vpop.permute.xlu2 %3062 }
 0x5b8   : > { %3194 = vrot.lane.b32.xlu0 %v6840_v11, %s4431_s25 }
 0x5b9   : > { %3196 = vrot.lane.b32.xlu1 %v6846_v33, %s4431_s25 }
 0x5ba   : > { %3198 = vrot.lane.b32.xlu2 %v6848_v42, %s4431_s25  ;;  %v7296_v49 = vpop.permute.xlu0 %3046 }
 0x5bb   : > { %8664 = vst [vmem:[#allocation59_spill] sm:$0xff] %v7296_v49  ;;  %v7298_v45 = vpop.permute.xlu1 %3048 }
 0x5bc   : > { %v7300_v54 = vpop.permute.xlu2 %3068 }
 0x5c0   : > { %3200 = vrot.lane.b32.xlu0 %v6852_v21, %s4431_s25 }
 0x5c1   : > { %3202 = vrot.lane.b32.xlu1 %v6858_v29, %s4431_s25 }
 0x5c2   : > { %3204 = vrot.lane.b32.xlu2 %v6860_v37, %s4431_s25  ;;  %v7308_v11 = vpop.permute.xlu0 %3052 }
 0x5c3   : > { %8665 = vst [vmem:[#allocation67_spill] sm:$0xff] %v7308_v11  ;;  %v7310_v33 = vpop.permute.xlu1 %3054 }
 0x5c4   : > { %v7312_v42 = vpop.permute.xlu2 %3074 }
 0x5c5   : > { %8666 = vst [vmem:[#allocation84_spill] sm:$0xff] %v7312_v42  ;;  %v2652_v42 = vld [vmem:[#allocation3 + $0x18a] sm:$0xff] }
 0x5c8   : > { %3206 = vrot.lane.b32.xlu0 %v6864_v2, %s4431_s25 }
 0x5c9   : > { %3208 = vrot.lane.b32.xlu1 %v6870_v50, %s4431_s25 }
 0x5ca   : > { %3210 = vrot.lane.b32.xlu2 %v6872_v63, %s4431_s25  ;;  %v7320_v21 = vpop.permute.xlu0 %3058 }
 0x5cb   : > { %v7322_v29 = vpop.permute.xlu1 %3060 }
 0x5cc   : > { %v7324_v37 = vpop.permute.xlu2 %3080 }
 0x5d0   : > { %3212 = vrot.lane.b32.xlu0 %v6876_v32, %s4431_s25 }
 0x5d1   : > { %3214 = vrot.lane.b32.xlu1 %v6882_v20, %s4431_s25 }
 0x5d2   : > { %3216 = vrot.lane.b32.xlu2 %v6884_v8, %s4431_s25  ;;  %v7332_v2 = vpop.permute.xlu0 %3064 }
 0x5d3   : > { %v7334_v50 = vpop.permute.xlu1 %3066 }
 0x5d4   : > { %v7336_v63 = vpop.permute.xlu2 %3086 }
 0x5d8   : > { %3218 = vrot.lane.b32.xlu0 %v6888_v12, %s4431_s25  ;;  %v7356_v12 = vld [vmem:[#allocation3 + $0x189] sm:$0xff] }
 0x5d9   : > { %3220 = vrot.lane.b32.xlu1 %v6894_v31, %s4431_s25 }
 0x5da   : > { %3222 = vrot.lane.b32.xlu2 %v6896_v1, %s4431_s25  ;;  %v7344_v32 = vpop.permute.xlu0 %3070 }
 0x5db   : > { %8667 = vst [vmem:[#allocation95_spill] sm:$0xff] %v7344_v32  ;;  %v7346_v20 = vpop.permute.xlu1 %3072 }
 0x5dc   : > { %8668 = vst [vmem:[#allocation99_spill] sm:$0xff] %v7346_v20  ;;  %v7348_v8 = vpop.permute.xlu2 %3092 }
 0x5e0   : > { %3224 = vrot.lane.b32.xlu0 %v6900_v28, %s4431_s25 }
 0x5e1   : > { %3226 = vrot.lane.b32.xlu1 %v7350_v18, %s4431_s25 }
 0x5e2   : > { %3228 = vrot.lane.b32.xlu2 %v7356_v12, %s4431_s25  ;;  %v7360_v31 = vpop.permute.xlu0 %3076 }
 0x5e3   : > { %8669 = vst [vmem:[#allocation110_spill] sm:$0xff] %v7360_v31  ;;  %v7362_v1 = vpop.permute.xlu1 %3078 }
 0x5e4   : > { %v7364_v6 = vpop.permute.xlu2 %3098 }
 0x5e8   : > { %3294 = vrot.lane.b32.xlu0 %v6908_v17, %s4433_s9 }
 0x5e9   : > { %3296 = vrot.lane.b32.xlu1 %v6914_v26, %s4433_s9 }
 0x5ea   : > { %3298 = vrot.lane.b32.xlu2 %v6916_v39, %s4433_s9  ;;  %v7372_v28 = vpop.permute.xlu0 %3082 }
 0x5eb   : > { %8670 = vst [vmem:[#allocation29_spill] sm:$0xff] %v7372_v28  ;;  %v7374_v32 = vpop.permute.xlu1 %3084  ;;  %v2748_v28 = vld [vmem:[#allocation3 + $0x19a] sm:$0xff] }
 0x5ec   : > { %v7376_v20 = vpop.permute.xlu2 %3168 }
 0x5ed   : > { %8671 = vst [vmem:[#allocation113_spill] sm:$0xff] %v7376_v20  ;;  %v2685_v20 = vld [vmem:[#allocation3 + $0x1a0] sm:$0xff] }
 0x5f0   : > { %3300 = vrot.lane.b32.xlu0 %v6922_v34, %s4433_s9 }
 0x5f1   : > { %3302 = vrot.lane.b32.xlu1 %v6928_v4, %s4433_s9 }
 0x5f2   : > { %3304 = vrot.lane.b32.xlu2 %v6930_v24, %s4433_s9  ;;  %v7384_v17 = vpop.permute.xlu0 %3088 }
 0x5f3   : > { %v7386_v26 = vpop.permute.xlu1 %3090 }
 0x5f4   : > { %v7388_v39 = vpop.permute.xlu2 %3174 }
 0x5f5   : > { %8672 = vst [vmem:[#allocation56_spill] sm:$0xff] %v7388_v39  ;;  %v2749_v39 = vld [vmem:[#allocation3 + $0x1a2] sm:$0xff] }
 0x5f8   : > { %3306 = vrot.lane.b32.xlu0 %v6936_v22, %s4433_s9 }
 0x5f9   : > { %3308 = vrot.lane.b32.xlu1 %v6942_v47, %s4433_s9 }
 0x5fa   : > { %3310 = vrot.lane.b32.xlu2 %v6944_v46, %s4433_s9  ;;  %v7396_v34 = vpop.permute.xlu0 %3094 }
 0x5fb   : > { %v7398_v4 = vpop.permute.xlu1 %3096 }
 0x5fc   : > { %v7400_v24 = vpop.permute.xlu2 %3180 }
 0x5fd   : > { %8673 = vst [vmem:[#allocation119_spill] sm:$0xff] %v7400_v24  ;;  %v2716_v24 = vld [vmem:[#allocation3 + $0x199] sm:$0xff] }
 0x600   : > { %3312 = vrot.lane.b32.xlu0 %v6950_v14, %s4433_s9 }
 0x601   : > { %3314 = vrot.lane.b32.xlu1 %v6958_v43, %s4433_s9 }
 0x602   : > { %3316 = vrot.lane.b32.xlu2 %v6960_v58, %s4433_s9  ;;  %v7408_v22 = vpop.permute.xlu0 %3100 }
 0x603   : > { %v7410_v47 = vpop.permute.xlu1 %3166 }
 0x604   : > { %8674 = vst [vmem:[#allocation65_spill] sm:$0xff] %v7410_v47  ;;  %v7412_v46 = vpop.permute.xlu2 %3186  ;;  %v2717_v47 = vld [vmem:[#allocation3 + $0x1a1] sm:$0xff] }
 0x608   : > { %3318 = vrot.lane.b32.xlu0 %v6966_v30, %s4433_s9 }
 0x609   : > { %3320 = vrot.lane.b32.xlu1 %v6976_v60, %s4433_s9 }
 0x60a   : > { %3322 = vrot.lane.b32.xlu2 %v6978_v38, %s4433_s9  ;;  %v7420_v14 = vpop.permute.xlu0 %3170 }
 0x60b   : > { %v7422_v43 = vpop.permute.xlu1 %3172 }
 0x60c   : > { %v7424_v58 = vpop.permute.xlu2 %3192 }
 0x610   : > { %3324 = vrot.lane.b32.xlu0 %v6984_v48, %s4433_s9  ;;  %v7438_v48 = vld [vmem:[#allocation3 + $0x182] sm:$0xff] }
 0x611   : > { %3356 = vrot.lane.b32.xlu1 %v2652_v42, %s4433_s9 }
 0x612   : > { %3484 = vrot.lane.b32.xlu2 %v2685_v20, %s4434_s10  ;;  %v7430_v30 = vpop.permute.xlu0 %3176 }
 0x613   : > { %v7432_v60 = vpop.permute.xlu1 %3178 }
 0x614   : > { %v7434_v38 = vpop.permute.xlu2 %3198 }
 0x615   : > { %8675 = vst [vmem:[#allocation132_spill] sm:$0xff] %v7434_v38  ;;  %v2684_v38 = vld [vmem:[#allocation3 + $0x198] sm:$0xff] }
 0x618   : > { %3612 = vrot.lane.b32.xlu0 %v2717_v47, %s4435_s11 }
 0x619   : > { %3740 = vrot.lane.b32.xlu1 %v2749_v39, %s4436_s14 }
 0x61a   : > { %3354 = vrot.lane.b32.xlu2 %v7438_v48, %s4433_s9  ;;  %v7442_v20 = vpop.permute.xlu0 %3182 }
 0x61b   : > { %v7444_v49 = vpop.permute.xlu1 %3184 }
 0x61c   : > { %v7446_v31 = vpop.permute.xlu2 %3204 }
 0x61d   : > { %8676 = vst [vmem:[#allocation143_spill] sm:$0xff] %v7446_v31  ;;  %v2701_v31 = vld [vmem:[#allocation3 + $0xe1] sm:$0xff] }
 0x620   : > { %3482 = vrot.lane.b32.xlu0 %v2684_v38, %s4434_s10 }
 0x621   : > { %3610 = vrot.lane.b32.xlu1 %v2716_v24, %s4435_s11 }
 0x622   : > { %3452 = vrot.lane.b32.xlu2 %v7143_v16, %s4434_s10  ;;  %v7452_v39 = vpop.permute.xlu0 %3188 }
 0x623   : > { %v7454_v47 = vpop.permute.xlu1 %3190 }
 0x624   : > { %v7456_v11 = vpop.permute.xlu2 %3210 }
 0x625   : > { %8677 = vst [vmem:[#allocation147_spill] sm:$0xff] %v7456_v11 }
 0x628   : > { %3738 = vrot.lane.b32.xlu0 %v2748_v28, %s4436_s14 }
 0x629   : > { %3352 = vrot.lane.b32.xlu1 %v7047_v51, %s4433_s9 }
 0x62a   : > { %3580 = vrot.lane.b32.xlu2 %v2701_v31, %s4435_s11  ;;  %v7462_v38 = vpop.permute.xlu0 %3194 }
 0x62b   : > { %v7464_v24 = vpop.permute.xlu1 %3196 }
 0x62c   : > { %v7466_v16 = vpop.permute.xlu2 %3216 }
 0x630   : > { %3480 = vrot.lane.b32.xlu0 %v7228_v61, %s4434_s10  ;;  %v3826_v61 = vsel %vm1703_vm6, %v3794_v35, %v7172_v27  ;;  %v8681_v27 = vld [vmem:[#allocation140_spill] sm:$0xff] }
 0x631   : > { %3708 = vrot.lane.b32.xlu1 %v6996_v25, %s4436_s14  ;;  %v3795_v25 = vsel %vm1637_vm2, %v7159_v62, %v7059_v53 }
 0x632   : > { %3608 = vrot.lane.b32.xlu2 %v7356_v12, %s4435_s11  ;;  %v7474_v28 = vpop.permute.xlu0 %3200  ;;  %v3827_v12 = vsel %vm1703_vm6, %v3795_v25, %v7236_v56  ;;  %v2700_v56 = vld [vmem:[#allocation3 + $0xd9] sm:$0xff]  ;;  %v8683_v25 = vld [vmem:[#allocation12_spill] sm:$0xff] }
 0x633   : > { %8678 = vst [vmem:[#allocation159_spill] sm:$0xff] %v7474_v28  ;;  %v7476_v11 = vpop.permute.xlu1 %3202  ;;  %v3858_v28 = vsel %vm1769_vm7, %v3826_v61, %v7362_v1  ;;  %v8684_v61 = vld [vmem:[#allocation24_spill] sm:$0xff] }
 0x634   : > { %8679 = vst [vmem:[#allocation164_spill] sm:$0xff] %v7476_v11  ;;  %v7478_v31 = vpop.permute.xlu2 %3222  ;;  %v8686_v11 = vld [vmem:[#allocation93_spill] sm:$0xff] }
 0x638   : > { %3450 = vrot.lane.b32.xlu0 %v7141_v5, %s4434_s10  ;;  %v3859_v5 = vsel %vm1769_vm7, %v3827_v12, %v7324_v37  ;;  %v3776_v37 = vsel %vm1637_vm2, %v8684_v61, %v8683_v25  ;;  %v8685_v12 = vld [vmem:[#allocation156_spill] sm:$0xff] }
 0x639   : > { %3736 = vrot.lane.b32.xlu1 %v2652_v42, %s4436_s14  ;;  %v8682_v42 = vld [vmem:[#allocation71_spill] sm:$0xff] }
 0x63a   : > { %3350 = vrot.lane.b32.xlu2 %v7045_v10, %s4433_s9  ;;  %v3207_v3 = vpop.permute.xlu0 %3206  ;;  %v3797_v1 = vsel %vm1637_vm2, %v8682_v42, %v8681_v27  ;;  %v8689_v42 = vld [vmem:[#allocation5_spill] sm:$0xff] }
 0x63b   : > { %v3209_v13 = vpop.permute.xlu1 %3208  ;;  %v7500_v53 = vsel %vm1835_vm8, %v3858_v28, %v3207_v3  ;;  %v3798_v28 = vsel %vm1637_vm2, %v8686_v11, %v8685_v12  ;;  %v8687_v3 = vld [vmem:[#allocation47_spill] sm:$0xff] }
 0x63c   : > { %8680 = vst [vmem:[#allocation6_spill] sm:$0xff] %v7500_v53  ;;  %v7503_v35 = vsel %vm1835_vm8, %v3859_v5, %v3209_v13  ;;  %v7505_v62 = vpop.permute.xlu2 %3228  ;;  %v3829_v5 = vsel %vm1703_vm6, %v3797_v1, %v8687_v3  ;;  %v8688_v13 = vld [vmem:[#allocation161_spill] sm:$0xff]  ;;  %v8691_v3 = vld [vmem:[#allocation106_spill] sm:$0xff] }
 0x63d   : > { %v3808_v53 = vsel %vm1703_vm6, %v3776_v37, %v8688_v13  ;;  %v3861_v27 = vsel %vm1769_vm7, %v3829_v5, %v7374_v32  ;;  %v8694_v13 = vld [vmem:[#allocation58_spill] sm:$0xff] }
 0x63e   : > { %v3840_v1 = vsel %vm1769_vm7, %v3808_v53, %v7286_v36  ;;  %v8693_v53 = vld [vmem:[#allocation129_spill] sm:$0xff] }
 0x640   : > { %3578 = vrot.lane.b32.xlu0 %v2700_v56, %s4435_s11  ;;  %v3830_v56 = vsel %vm1703_vm6, %v3798_v28, %v7248_v7  ;;  %v3872_v7 = vsel %vm1835_vm8, %v3840_v1, %v7420_v14  ;;  %v8690_v28 = vld [vmem:[#allocation36_spill] sm:$0xff]  ;;  %v3801_v14 = vsel %vm1637_vm2, %v7192_v9, %v8694_v13  ;;  %v8702_v13 = vld [vmem:[#allocation157_spill] sm:$0xff] }
 0x641   : > { %3478 = vrot.lane.b32.xlu1 %v7218_v19, %s4434_s10  ;;  %v3862_v19 = vsel %vm1769_vm7, %v3830_v56, %v7336_v63  ;;  %v3800_v36 = vsel %vm1637_vm2, %v8691_v3, %v8690_v28  ;;  %v8692_v63 = vld [vmem:[#allocation50_spill] sm:$0xff] }
 0x642   : > { %3706 = vrot.lane.b32.xlu2 %v8689_v42, %s4436_s14  ;;  %v3213_v11 = vpop.permute.xlu0 %3212  ;;  %v3779_v5 = vsel %vm1637_vm2, %v8693_v53, %v8692_v63  ;;  %v8695_v56 = vld [vmem:[#allocation146_spill] sm:$0xff] }
 0x643   : > { %v3215_v25 = vpop.permute.xlu1 %3214  ;;  %v7534_v61 = vsel %vm1835_vm8, %v3861_v27, %v3213_v11  ;;  %v3832_v27 = vsel %vm1703_vm6, %v3800_v36, %v8695_v56  ;;  %v8696_v42 = vld [vmem:[#allocation138_spill] sm:$0xff]  ;;  %v8697_v11 = vld [vmem:[#allocation69_spill] sm:$0xff]  ;;  %v2699_v36 = vld [vmem:[#allocation3 + $0xc9] sm:$0xff] }
 0x644   : > { %v7539_v32 = vsel %vm1835_vm8, %v3862_v19, %v3215_v25  ;;  %v3299_v37 = vpop.permute.xlu2 %3298  ;;  %v3811_v1 = vsel %vm1703_vm6, %v3779_v5, %v8697_v11  ;;  %v3864_v19 = vsel %vm1769_vm7, %v3832_v27, %v7386_v26  ;;  %v8699_v63 = vld [vmem:[#allocation22_spill] sm:$0xff]  ;;  %v8701_v5 = vld [vmem:[#allocation103_spill] sm:$0xff] }
 0x645   : > { %v7542_v12 = vsel %vm3902_vm0, %v3872_v7, %v3299_v37  ;;  %v3843_v9 = vsel %vm1769_vm7, %v3811_v1, %v7298_v45  ;;  %v8698_v45 = vld [vmem:[#allocation54_spill] sm:$0xff] }
 0x648   : > { %3606 = vrot.lane.b32.xlu0 %v7350_v18, %s4435_s11  ;;  %v3833_v18 = vsel %vm1703_vm6, %v3801_v14, %v7260_v15  ;;  %v3875_v15 = vsel %vm1835_vm8, %v3843_v9, %v7430_v30  ;;  %v8704_v9 = vld [vmem:[#allocation85_spill] sm:$0xff] }
 0x649   : > { %3448 = vrot.lane.b32.xlu1 %v8696_v42, %s4434_s10  ;;  %v3865_v7 = vsel %vm1769_vm7, %v3833_v18, %v7348_v8  ;;  %v8700_v8 = vld [vmem:[#allocation27_spill] sm:$0xff] }
 0x64a   : > { %3734 = vrot.lane.b32.xlu2 %v7438_v48, %s4436_s14  ;;  %v3219_v25 = vpop.permute.xlu0 %3218  ;;  %v3782_v53 = vsel %vm1637_vm2, %v8700_v8, %v8699_v63  ;;  %v2731_v18 = vld [vmem:[#allocation3 + $0xca] sm:$0xff] }
 0x64b   : > { %v3221_v37 = vpop.permute.xlu1 %3220  ;;  %v7572_v28 = vsel %vm1835_vm8, %v3864_v19, %v3219_v25  ;;  %v3814_v30 = vsel %vm1703_vm6, %v3782_v53, %v8701_v5  ;;  %v2713_v19 = vld [vmem:[#allocation3 + $0x171] sm:$0xff]  ;;  %v8703_v25 = vld [vmem:[#allocation11_spill] sm:$0xff]  ;;  %v8706_v53 = vld [vmem:[#allocation38_spill] sm:$0xff] }
 0x64c   : > { %v7577_v3 = vsel %vm1835_vm8, %v3865_v7, %v3221_v37  ;;  %v3305_v26 = vpop.permute.xlu2 %3304  ;;  %v3846_v56 = vsel %vm1769_vm7, %v3814_v30, %v7310_v33  ;;  %v3785_v7 = vsel %vm1637_vm2, %v8704_v9, %v8703_v25  ;;  %v2666_v33 = vld [vmem:[#allocation3 + $0xc0] sm:$0xff]  ;;  %v8705_v37 = vld [vmem:[#allocation133_spill] sm:$0xff]  ;;  %v8707_v5 = vld [vmem:[#allocation55_spill] sm:$0xff] }
 0x64d   : > { %v7580_v48 = vsel %vm3902_vm0, %v3875_v15, %v3305_v26  ;;  %v3878_v42 = vsel %vm1835_vm8, %v3846_v56, %v7442_v20  ;;  %v3817_v15 = vsel %vm1703_vm6, %v3785_v7, %v8705_v37  ;;  %v3777_v30 = vsel %vm1637_vm2, %v8707_v5, %v8706_v53  ;;  %v8708_v56 = vld [vmem:[#allocation151_spill] sm:$0xff]  ;;  %v8712_v37 = vld [vmem:[#allocation16_spill] sm:$0xff] }
 0x64e   : > { %v3849_v26 = vsel %vm1769_vm7, %v3817_v15, %v7322_v29 }
 0x650   : > { %3348 = vrot.lane.b32.xlu0 %v8698_v45, %s4433_s9  ;;  %v3881_v45 = vsel %vm1835_vm8, %v3849_v26, %v7452_v39  ;;  %v2698_v39 = vld [vmem:[#allocation3 + $0xc1] sm:$0xff] }
 0x651   : > { %3576 = vrot.lane.b32.xlu1 %v2699_v36, %s4435_s11  ;;  %v2730_v26 = vld [vmem:[#allocation3 + $0xc2] sm:$0xff] }
 0x652   : > { %3476 = vrot.lane.b32.xlu2 %v8702_v13, %s4434_s10  ;;  %v7592_v14 = vpop.permute.xlu0 %3224 }
 0x653   : > { %v7596_v27 = vpop.permute.xlu1 %3226 }
 0x654   : > { %v3311_v11 = vpop.permute.xlu2 %3310 }
 0x655   : > { %v7601_v1 = vsel %vm3902_vm0, %v3878_v42, %v3311_v11  ;;  %v3809_v42 = vsel %vm1703_vm6, %v3777_v30, %v8708_v56  ;;  %v8709_v11 = vld [vmem:[#allocation52_spill] sm:$0xff] }
 0x656   : > { %v3841_v29 = vsel %vm1769_vm7, %v3809_v42, %v7252_v55 }
 0x658   : > { %3704 = vrot.lane.b32.xlu0 %v2731_v18, %s4436_s14  ;;  %v3873_v18 = vsel %vm1835_vm8, %v3841_v29, %v7422_v43  ;;  %v8713_v43 = vld [vmem:[#allocation155_spill] sm:$0xff]  ;;  %v8714_v29 = vld [vmem:[#allocation53_spill] sm:$0xff] }
 0x659   : > { %3604 = vrot.lane.b32.xlu1 %v2713_v19, %s4435_s11 }
 0x65a   : > { %3446 = vrot.lane.b32.xlu2 %v2666_v33, %s4434_s10  ;;  %v7611_v20 = vpop.permute.xlu0 %3294  ;;  %v8711_v33 = vld [vmem:[#allocation7_spill] sm:$0xff] }
 0x65b   : > { %v7615_v36 = vpop.permute.xlu1 %3296 }
 0x65c   : > { %v3317_v63 = vpop.permute.xlu2 %3316 }
 0x65d   : > { %v7620_v8 = vsel %vm3902_vm0, %v3881_v45, %v3317_v63  ;;  %v2712_v63 = vld [vmem:[#allocation3 + $0x169] sm:$0xff] }
 0x660   : > { %3732 = vrot.lane.b32.xlu0 %v7047_v51, %s4436_s14  ;;  %v8710_v51 = vld [vmem:[#allocation34_spill] sm:$0xff] }
 0x661   : > { %3346 = vrot.lane.b32.xlu1 %v8709_v11, %s4433_s9  ;;  %v3780_v55 = vsel %vm1637_vm2, %v8711_v33, %v8710_v51  ;;  %v8715_v11 = vld [vmem:[#allocation76_spill] sm:$0xff]  ;;  %v8718_v33 = vld [vmem:[#allocation23_spill] sm:$0xff] }
 0x662   : > { %3574 = vrot.lane.b32.xlu2 %v2698_v39, %s4435_s11  ;;  %v3301_v19 = vpop.permute.xlu0 %3300  ;;  %v3812_v15 = vsel %vm1703_vm6, %v3780_v55, %v8712_v37  ;;  %v3783_v39 = vsel %vm1637_vm2, %v8715_v11, %v8714_v29  ;;  %v8722_v29 = vld [vmem:[#allocation125_spill] sm:$0xff] }
 0x663   : > { %v7636_v25 = vpop.permute.xlu1 %3302  ;;  %v7639_v9 = vsel %vm3902_vm0, %v3873_v18, %v3301_v19  ;;  %v3844_v45 = vsel %vm1769_vm7, %v3812_v15, %v7264_v0  ;;  %v8716_v0 = vld [vmem:[#allocation77_spill] sm:$0xff]  ;;  %v8717_v19 = vld [vmem:[#allocation134_spill] sm:$0xff] }
 0x664   : > { %v7641_v7 = vpop.permute.xlu2 %3322  ;;  %v3876_v53 = vsel %vm1835_vm8, %v3844_v45, %v7432_v60  ;;  %v3815_v18 = vsel %vm1703_vm6, %v3783_v39, %v8716_v0  ;;  %v8719_v45 = vld [vmem:[#allocation13_spill] sm:$0xff] }
 0x665   : > { %v3847_v60 = vsel %vm1769_vm7, %v3815_v18, %v7276_v57  ;;  %v2729_v11 = vld [vmem:[#allocation3 + $0xb2] sm:$0xff] }
 0x666   : > { %v3879_v51 = vsel %vm1835_vm8, %v3847_v60, %v7444_v49 }
 0x668   : > { %3474 = vrot.lane.b32.xlu0 %v8713_v43, %s4434_s10 }
 0x669   : > { %3702 = vrot.lane.b32.xlu1 %v2730_v26, %s4436_s14 }
 0x66a   : > { %3602 = vrot.lane.b32.xlu2 %v2712_v63, %s4435_s11  ;;  %v3307_v5 = vpop.permute.xlu0 %3306  ;;  %v8720_v63 = vld [vmem:[#allocation25_spill] sm:$0xff] }
 0x66b   : > { %v7656_v30 = vpop.permute.xlu1 %3308  ;;  %v7659_v56 = vsel %vm3902_vm0, %v3876_v53, %v3307_v5  ;;  %v3786_v57 = vsel %vm1637_vm2, %v8720_v63, %v8719_v45  ;;  %v2697_v53 = vld [vmem:[#allocation3 + $0xb1] sm:$0xff]  ;;  %v8723_v45 = vld [vmem:[#allocation51_spill] sm:$0xff] }
 0x66c   : > { %v3485_v42 = vpop.permute.xlu2 %3484  ;;  %v8721_v5 = vld [vmem:[#allocation108_spill] sm:$0xff]  ;;  %v3805_v63 = vsel %vm1637_vm2, %v8702_v13, %v8723_v45 }
 0x66d   : > { %v2728_v45 = vld [vmem:[#allocation3 + $0xaa] sm:$0xff] }
 0x670   : > { %3444 = vrot.lane.b32.xlu0 %v8717_v19, %s4434_s10 }
 0x671   : > { %3730 = vrot.lane.b32.xlu1 %v7045_v10, %s4436_s14  ;;  %v3818_v10 = vsel %vm1703_vm6, %v3786_v57, %v8721_v5 }
 0x672   : > { %3344 = vrot.lane.b32.xlu2 %v8718_v33, %s4433_s9  ;;  %v3313_v55 = vpop.permute.xlu0 %3312  ;;  %v3850_v49 = vsel %vm1769_vm7, %v3818_v10, %v7288_v52  ;;  %v2711_v33 = vld [vmem:[#allocation3 + $0x159] sm:$0xff] }
 0x673   : > { %v7676_v37 = vpop.permute.xlu1 %3314  ;;  %v7679_v15 = vsel %vm3902_vm0, %v3879_v51, %v3313_v55  ;;  %v3882_v39 = vsel %vm1835_vm8, %v3850_v49, %v7454_v47  ;;  %v2664_v55 = vld [vmem:[#allocation3 + $0xa8] sm:$0xff]  ;;  %v2743_v52 = vld [vmem:[#allocation3 + $0x15a] sm:$0xff] }
 0x674   : > { %v3355_v26 = vpop.permute.xlu2 %3354 }
 0x678   : > { %3572 = vrot.lane.b32.xlu0 %v2697_v53, %s4435_s11  ;;  %v3837_v53 = vsel %vm1703_vm6, %v3805_v63, %v7274_v59  ;;  %v2678_v59 = vld [vmem:[#allocation3 + $0x150] sm:$0xff] }
 0x679   : > { %3472 = vrot.lane.b32.xlu1 %v8722_v29, %s4434_s10  ;;  %v3869_v10 = vsel %vm1769_vm7, %v3837_v53, %v7408_v22  ;;  %v2710_v63 = vld [vmem:[#allocation3 + $0x151] sm:$0xff] }
 0x67a   : > { %3700 = vrot.lane.b32.xlu2 %v2729_v11, %s4436_s14  ;;  %v3319_v0 = vpop.permute.xlu0 %3318  ;;  %v3901_v49 = vsel %vm1835_vm8, %v3869_v10, %v7505_v62 }
 0x67b   : > { %v7694_v18 = vpop.permute.xlu1 %3320  ;;  %v7697_v60 = vsel %vm3902_vm0, %v3882_v39, %v3319_v0  ;;  %v7716_v39 = vld [vmem:[#allocation3 + $0x13a] sm:$0xff]  ;;  %v2696_v0 = vld [vmem:[#allocation3 + $0xa9] sm:$0xff] }
 0x67c   : > { %v7699_v51 = vpop.permute.xlu2 %3452 }
 0x680   : > { %3600 = vrot.lane.b32.xlu0 %v2711_v33, %s4435_s11 }
 0x681   : > { %3442 = vrot.lane.b32.xlu1 %v2664_v55, %s4434_s10 }
 0x682   : > { %3728 = vrot.lane.b32.xlu2 %v2743_v52, %s4436_s14  ;;  %v3325_v47 = vpop.permute.xlu0 %3324 }
 0x683   : > { %v3357_v57 = vpop.permute.xlu1 %3356 }
 0x684   : > { %v7709_v5 = vpop.permute.xlu2 %3580  ;;  %v3934_v11 = vsel %vm3902_vm0, %v3901_v49, %v3357_v57  ;;  %v2663_v57 = vld [vmem:[#allocation3 + $0x98] sm:$0xff] }
 0x685   : > { %v3967_v22 = vsel %vm3935_vm1, %v3934_v11, %v3485_v42  ;;  %v8724_v42 = vld [vmem:[#allocation90_spill] sm:$0xff] }
 0x686   : > { %v3804_v53 = vsel %vm1637_vm2, %v8713_v43, %v8724_v42  ;;  %v2742_v43 = vld [vmem:[#allocation3 + $0x152] sm:$0xff] }
 0x687   : > { %v3836_v49 = vsel %vm1703_vm6, %v3804_v53, %v7272_v41 }
 0x688   : > { %3342 = vrot.lane.b32.xlu0 %v7716_v39, %s4433_s9 }
 0x689   : > { %3570 = vrot.lane.b32.xlu1 %v2696_v0, %s4435_s11  ;;  %v3868_v0 = vsel %vm1769_vm7, %v3836_v49, %v7364_v6  ;;  %v2695_v6 = vld [vmem:[#allocation3 + $0x99] sm:$0xff] }
 0x68a   : > { %3470 = vrot.lane.b32.xlu2 %v2678_v59, %s4434_s10  ;;  %v3613_v13 = vpop.permute.xlu0 %3612 }
 0x68b   : > { %v3741_v62 = vpop.permute.xlu1 %3740  ;;  %v4000_v33 = vsel %vm3968_vm4, %v3967_v22, %v3613_v13  ;;  %v3900_v22 = vsel %vm1835_vm8, %v3868_v0, %v7596_v27  ;;  %v2677_v0 = vld [vmem:[#allocation3 + $0x140] sm:$0xff] }
 0x68c   : > { %v7724_v55 = vpop.permute.xlu2 %3608  ;;  %v4033_v52 = vsel %vm4001_vm3, %v4000_v33, %v3741_v62  ;;  %v3933_v13 = vsel %vm3902_vm0, %v3900_v22, %v3355_v26  ;;  %v7744_v33 = vld [vmem:[#allocation3 + $0x12a] sm:$0xff] }
 0x68d   : > { %4318 = vmatpush.xpose.msk.msra.mxu2 %vm4035_vm5, %v4033_v52  ;;  %v8725_v52 = vld [vmem:[#allocation154_spill] sm:$0xff] }
 0x68e   : > { %v3789_v41 = vsel %vm1637_vm2, %v8717_v19, %v8725_v52 }
 0x690   : > { %3698 = vrot.lane.b32.xlu0 %v2728_v45, %s4436_s14  ;;  %v8726_v45 = vld [vmem:[#allocation136_spill] sm:$0xff] }
 0x691   : > { %3598 = vrot.lane.b32.xlu1 %v2710_v63, %s4435_s11  ;;  %v3821_v27 = vsel %vm1703_vm6, %v3789_v41, %v8726_v45 }
 0x692   : > { %3440 = vrot.lane.b32.xlu2 %v2663_v57, %s4434_s10  ;;  %v3483_v10 = vpop.permute.xlu0 %3482  ;;  %v3853_v57 = vsel %vm1769_vm7, %v3821_v27, %v7300_v54  ;;  %v2709_v54 = vld [vmem:[#allocation3 + $0x141] sm:$0xff]  ;;  %v2662_v27 = vld [vmem:[#allocation3 + $0x90] sm:$0xff] }
 0x693   : > { %v3611_v11 = vpop.permute.xlu1 %3610  ;;  %v3966_v62 = vsel %vm3935_vm1, %v3933_v13, %v3483_v10  ;;  %v3885_v19 = vsel %vm1835_vm8, %v3853_v57, %v7464_v24  ;;  %v2727_v13 = vld [vmem:[#allocation3 + $0x9a] sm:$0xff] }
 0x694   : > { %v7738_v59 = vpop.permute.xlu2 %3350  ;;  %v3999_v63 = vsel %vm3968_vm4, %v3966_v62, %v3611_v11  ;;  %v3918_v49 = vsel %vm3902_vm0, %v3885_v19, %v3325_v47  ;;  %v8727_v62 = vld [vmem:[#allocation86_spill] sm:$0xff]  ;;  %v8729_v19 = vld [vmem:[#allocation60_spill] sm:$0xff] }
 0x695   : > { %v3951_v22 = vsel %vm3935_vm1, %v3918_v49, %v7699_v51  ;;  %v3803_v24 = vsel %vm1637_vm2, %v8722_v29, %v8727_v62 }
 0x696   : > { %v3984_v47 = vsel %vm3968_vm4, %v3951_v22, %v7709_v5  ;;  %v3835_v51 = vsel %vm1703_vm6, %v3803_v24, %v7226_v44  ;;  %v2741_v5 = vld [vmem:[#allocation3 + $0x142] sm:$0xff]  ;;  %v2726_v24 = vld [vmem:[#allocation3 + $0x92] sm:$0xff] }
 0x697   : > { %v7785_v44 = vld [vmem:[#allocation3 + $0x122] sm:$0xff] }
 0x698   : > { %3726 = vrot.lane.b32.xlu0 %v2742_v43, %s4436_s14 }
 0x699   : > { %3340 = vrot.lane.b32.xlu1 %v7744_v33, %s4433_s9 }
 0x69a   : > { %3568 = vrot.lane.b32.xlu2 %v2695_v6, %s4435_s11  ;;  %v3739_v26 = vpop.permute.xlu0 %3738  ;;  %v3867_v6 = vsel %vm1769_vm7, %v3835_v51, %v7398_v4 }
 0x69b   : > { %v3353_v42 = vpop.permute.xlu1 %3352  ;;  %v4032_v53 = vsel %vm4001_vm3, %v3999_v63, %v3739_v26  ;;  %v3899_v45 = vsel %vm1835_vm8, %v3867_v6, %v7592_v14  ;;  %v8731_v6 = vld [vmem:[#allocation107_spill] sm:$0xff] }
 0x69c   : > { %v3707_v10 = vpop.permute.xlu2 %3706  ;;  %4319 = vmatpush.xpose.msk.msra.mxu2 %vm4035_vm5, %v4032_v53  ;;  %v3932_v29 = vsel %vm3902_vm0, %v3899_v45, %v3353_v42  ;;  %v8728_v53 = vld [vmem:[#allocation68_spill] sm:$0xff] }
 0x69d   : > { %v3788_v49 = vsel %vm1637_vm2, %v8729_v19, %v8728_v53  ;;  %v8732_v45 = vld [vmem:[#allocation120_spill] sm:$0xff]  ;;  %v2693_v19 = vld [vmem:[#allocation3 + $0x81] sm:$0xff] }
 0x69e   : > { %v7834_v53 = vld [vmem:[#allocation3 + $0x112] sm:$0xff] }
 0x6a0   : > { %3468 = vrot.lane.b32.xlu0 %v2677_v0, %s4434_s10  ;;  %v8730_v0 = vld [vmem:[#allocation14_spill] sm:$0xff] }
 0x6a1   : > { %3696 = vrot.lane.b32.xlu1 %v2727_v13, %s4436_s14  ;;  %v3820_v22 = vsel %vm1703_vm6, %v3788_v49, %v8730_v0  ;;  %v8733_v0 = vld [vmem:[#allocation4_spill] sm:$0xff] }
 0x6a2   : > { %3596 = vrot.lane.b32.xlu2 %v2709_v54, %s4435_s11  ;;  %v3481_v11 = vpop.permute.xlu0 %3480  ;;  %v3852_v13 = vsel %vm1769_vm7, %v3820_v22, %v7334_v50  ;;  %v2694_v54 = vld [vmem:[#allocation3 + $0x91] sm:$0xff] }
 0x6a3   : > { %v3709_v43 = vpop.permute.xlu1 %3708  ;;  %v3965_v26 = vsel %vm3935_vm1, %v3932_v29, %v3481_v11  ;;  %v2676_v11 = vld [vmem:[#allocation3 + $0x138] sm:$0xff]  ;;  %v3802_v29 = vsel %vm1637_vm2, %v8732_v45, %v8731_v6  ;;  %v8734_v22 = vld [vmem:[#allocation112_spill] sm:$0xff] }
 0x6a4   : > { %v3735_v52 = vpop.permute.xlu2 %3734  ;;  %v4017_v41 = vsel %vm4001_vm3, %v3984_v47, %v3709_v43  ;;  %v3998_v14 = vsel %vm3968_vm4, %v3965_v26, %v7724_v55  ;;  %v3884_v55 = vsel %vm1835_vm8, %v3852_v13, %v7462_v38  ;;  %v2708_v26 = vld [vmem:[#allocation3 + $0x139] sm:$0xff]  ;;  %v3787_v13 = vsel %vm1637_vm2, %v8734_v22, %v8733_v0 }
 0x6a5   : > { %4301 = vmatpush.xpose.msk.msrb.mxu1 %vm4035_vm5, %v4017_v41  ;;  %v3917_v62 = vsel %vm3902_vm0, %v3884_v55, %v7641_v7  ;;  %v3834_v7 = vsel %vm1703_vm6, %v3802_v29, %v7262_v23  ;;  %v7860_v29 = vld [vmem:[#allocation3 + $0x10a] sm:$0xff] }
 0x6a8   : > { %3438 = vrot.lane.b32.xlu0 %v2662_v27, %s4434_s10  ;;  %v3866_v27 = vsel %vm1769_vm7, %v3834_v7, %v7396_v34 }
 0x6a9   : > { %3724 = vrot.lane.b32.xlu1 %v2741_v5, %s4436_s14  ;;  %v3898_v5 = vsel %vm1835_vm8, %v3866_v27, %v7478_v31  ;;  %v2692_v27 = vld [vmem:[#allocation3 + $0x79] sm:$0xff] }
 0x6aa   : > { %3338 = vrot.lane.b32.xlu2 %v7785_v44, %s4433_s9  ;;  %v3451_v4 = vpop.permute.xlu0 %3450 }
 0x6ab   : > { %v3737_v63 = vpop.permute.xlu1 %3736  ;;  %v3950_v43 = vsel %vm3935_vm1, %v3917_v62, %v3451_v4  ;;  %v2661_v4 = vld [vmem:[#allocation3 + $0x80] sm:$0xff] }
 0x6ac   : > { %v7791_v57 = vpop.permute.xlu2 %3476  ;;  %v4031_v42 = vsel %vm4001_vm3, %v3998_v14, %v3737_v63 }
 0x6ad   : > { %4320 = vmatpush.xpose.msk.msra.mxu2 %vm4035_vm5, %v4031_v42 }
 0x6b0   : > { %3566 = vrot.lane.b32.xlu0 %v2694_v54, %s4435_s11  ;;  %v8735_v54 = vld [vmem:[#allocation20_spill] sm:$0xff] }
 0x6b1   : > { %3466 = vrot.lane.b32.xlu1 %v2676_v11, %s4434_s10  ;;  %v3819_v55 = vsel %vm1703_vm6, %v3787_v13, %v8735_v54  ;;  %v2691_v54 = vld [vmem:[#allocation3 + $0x69] sm:$0xff] }
 0x6b2   : > { %3694 = vrot.lane.b32.xlu2 %v2726_v24, %s4436_s14  ;;  %v3579_v47 = vpop.permute.xlu0 %3578  ;;  %v3851_v11 = vsel %vm1769_vm7, %v3819_v55, %v7332_v2  ;;  %v2725_v24 = vld [vmem:[#allocation3 + $0x82] sm:$0xff]  ;;  %v2673_v55 = vld [vmem:[#allocation3 + $0x110] sm:$0xff] }
 0x6b3   : > { %v3479_v51 = vpop.permute.xlu1 %3478  ;;  %v3983_v50 = vsel %vm3968_vm4, %v3950_v43, %v3579_v47  ;;  %v3883_v62 = vsel %vm1835_vm8, %v3851_v11, %v7424_v58  ;;  %v2707_v47 = vld [vmem:[#allocation3 + $0x129] sm:$0xff] }
 0x6b4   : > { %v7811_v41 = vpop.permute.xlu2 %3446  ;;  %v4016_v38 = vsel %vm4001_vm3, %v3983_v50, %v3707_v10  ;;  %v3931_v10 = vsel %vm3902_vm0, %v3898_v5, %v7738_v59  ;;  %v2675_v59 = vld [vmem:[#allocation3 + $0x128] sm:$0xff]  ;;  %v3916_v43 = vsel %vm3902_vm0, %v3883_v62, %v7694_v18  ;;  %v2660_v50 = vld [vmem:[#allocation3 + $0x78] sm:$0xff] }
 0x6b5   : > { %4302 = vmatpush.xpose.msk.msrb.mxu1 %vm4035_vm5, %v4016_v38  ;;  %v3964_v63 = vsel %vm3935_vm1, %v3931_v10, %v3479_v51 }
 0x6b8   : > { %3594 = vrot.lane.b32.xlu0 %v2708_v26, %s4435_s11 }
 0x6b9   : > { %3436 = vrot.lane.b32.xlu1 %v2661_v4, %s4434_s10 }
 0x6ba   : > { %3722 = vrot.lane.b32.xlu2 %v7716_v39, %s4436_s14  ;;  %v3607_v23 = vpop.permute.xlu0 %3606 }
 0x6bb   : > { %v3449_v14 = vpop.permute.xlu1 %3448  ;;  %v3997_v34 = vsel %vm3968_vm4, %v3964_v63, %v3607_v23  ;;  %v2674_v63 = vld [vmem:[#allocation3 + $0x120] sm:$0xff]  ;;  %v3948_v23 = vsel %vm3935_vm1, %v7697_v60, %v7811_v41 }
 0x6bc   : > { %v3575_v42 = vpop.permute.xlu2 %3574  ;;  %v4030_v31 = vsel %vm4001_vm3, %v3997_v34, %v3735_v52  ;;  %v3949_v51 = vsel %vm3935_vm1, %v3916_v43, %v3449_v14  ;;  %v7887_v60 = vld [vmem:[#allocation3 + $0xfa] sm:$0xff] }
 0x6bd   : > { %4321 = vmatpush.xpose.msk.msra.mxu2 %vm4035_vm5, %v4030_v31  ;;  %v3981_v34 = vsel %vm3968_vm4, %v3948_v23, %v3575_v42 }
 0x6c0   : > { %3336 = vrot.lane.b32.xlu0 %v7834_v53, %s4433_s9 }
 0x6c1   : > { %3564 = vrot.lane.b32.xlu1 %v2693_v19, %s4435_s11 }
 0x6c2   : > { %3464 = vrot.lane.b32.xlu2 %v2675_v59, %s4434_s10  ;;  %v3349_v39 = vpop.permute.xlu0 %3348 }
 0x6c3   : > { %v3577_v49 = vpop.permute.xlu1 %3576  ;;  %v3930_v18 = vsel %vm3902_vm0, %v7577_v3, %v3349_v39 }
 0x6c4   : > { %v3603_v52 = vpop.permute.xlu2 %3602  ;;  %v3982_v38 = vsel %vm3968_vm4, %v3949_v51, %v3577_v49  ;;  %v3963_v7 = vsel %vm3935_vm1, %v3930_v18, %v7791_v57  ;;  %v2706_v57 = vld [vmem:[#allocation3 + $0x121] sm:$0xff] }
 0x6c5   : > { %v2659_v49 = vld [vmem:[#allocation3 + $0x68] sm:$0xff]  ;;  %v2658_v18 = vld [vmem:[#allocation3 + $0x60] sm:$0xff] }
 0x6c6   : > { %v8736_v51 = vld [vmem:[#allocation15_spill] sm:$0xff] }
 0x6c8   : > { %3692 = vrot.lane.b32.xlu0 %v2725_v24, %s4436_s14 }
 0x6c9   : > { %3592 = vrot.lane.b32.xlu1 %v2707_v47, %s4435_s11 }
 0x6ca   : > { %3434 = vrot.lane.b32.xlu2 %v2660_v50, %s4434_s10  ;;  %v3705_v2 = vpop.permute.xlu0 %3704  ;;  %v8737_v50 = vld [vmem:[#allocation98_spill] sm:$0xff] }
 0x6cb   : > { %v3605_v6 = vpop.permute.xlu1 %3604  ;;  %v4015_v58 = vsel %vm4001_vm3, %v3982_v38, %v3705_v2  ;;  %v3799_v38 = vsel %vm1637_vm2, %v8737_v50, %v8736_v51  ;;  %v2721_v51 = vld [vmem:[#allocation3 + $0x52] sm:$0xff] }
 0x6cc   : > { %v3345_v45 = vpop.permute.xlu2 %3344  ;;  %4303 = vmatpush.xpose.msk.msrb.mxu1 %vm4035_vm5, %v4015_v58  ;;  %v3996_v26 = vsel %vm3968_vm4, %v3963_v7, %v3605_v6  ;;  %v3831_v2 = vsel %vm1703_vm6, %v3799_v38, %v7250_v40  ;;  %v2705_v6 = vld [vmem:[#allocation3 + $0x111] sm:$0xff] }
 0x6d0   : > { %3720 = vrot.lane.b32.xlu0 %v7744_v33, %s4436_s14  ;;  %v2724_v33 = vld [vmem:[#allocation3 + $0x7a] sm:$0xff] }
 0x6d1   : > { %3334 = vrot.lane.b32.xlu1 %v7860_v29, %s4433_s9 }
 0x6d2   : > { %3562 = vrot.lane.b32.xlu2 %v2692_v27, %s4435_s11  ;;  %v3733_v5 = vpop.permute.xlu0 %3732 }
 0x6d3   : > { %v3347_v4 = vpop.permute.xlu1 %3346  ;;  %v4029_v3 = vsel %vm4001_vm3, %v3996_v26, %v3733_v5 }
 0x6d4   : > { %v3701_v10 = vpop.permute.xlu2 %3700  ;;  %4322 = vmatpush.xpose.msk.msra.mxu2 %vm4035_vm5, %v4029_v3  ;;  %v3929_v39 = vsel %vm3902_vm0, %v7572_v28, %v3347_v4  ;;  %v2690_v3 = vld [vmem:[#allocation3 + $0x61] sm:$0xff] }
 0x6d8   : > { %3462 = vrot.lane.b32.xlu0 %v2674_v63, %s4434_s10  ;;  %v4407_v63 = vld [vmem:[#allocation3 + $0x78] sm:$0xff] }
 0x6d9   : > { %3690 = vrot.lane.b32.xlu1 %v2724_v33, %s4436_s14  ;;  %v8738_v33 = vld [vmem:[#allocation49_spill] sm:$0xff] }
 0x6da   : > { %3590 = vrot.lane.b32.xlu2 %v2706_v57, %s4435_s11  ;;  %v3475_v14 = vpop.permute.xlu0 %3474  ;;  %v3784_v57 = vsel %vm1637_vm2, %v4407_v63, %v8738_v33  ;;  %v4408_v33 = vld [vmem:[#allocation3 + $0x108] sm:$0xff] }
 0x6db   : > { %v3703_v31 = vpop.permute.xlu1 %3702  ;;  %v3962_v0 = vsel %vm3935_vm1, %v3929_v39, %v3475_v14  ;;  %v8739_v14 = vld [vmem:[#allocation88_spill] sm:$0xff] }
 0x6dc   : > { %v3729_v19 = vpop.permute.xlu2 %3728  ;;  %v4014_v59 = vsel %vm4001_vm3, %v3981_v34, %v3703_v31  ;;  %v3995_v22 = vsel %vm3968_vm4, %v3962_v0, %v3603_v52  ;;  %v3816_v34 = vsel %vm1703_vm6, %v3784_v57, %v8739_v14  ;;  %v8740_v57 = vld [vmem:[#allocation41_spill] sm:$0xff]  ;;  %v8741_v14 = vld [vmem:[#allocation28_spill] sm:$0xff] }
 0x6dd   : > { %4304 = vmatpush.xpose.msk.msrb.mxu1 %vm4035_vm5, %v4014_v59  ;;  %v3848_v31 = vsel %vm1769_vm7, %v3816_v34, %v7320_v21  ;;  %v2722_v59 = vld [vmem:[#allocation3 + $0x62] sm:$0xff] }
 0x6e0   : > { %3432 = vrot.lane.b32.xlu0 %v2659_v49, %s4434_s10  ;;  %v2704_v49 = vld [vmem:[#allocation3 + $0x109] sm:$0xff] }
 0x6e1   : > { %3718 = vrot.lane.b32.xlu1 %v7785_v44, %s4436_s14  ;;  %v2723_v44 = vld [vmem:[#allocation3 + $0x6a] sm:$0xff] }
 0x6e2   : > { %3332 = vrot.lane.b32.xlu2 %v7887_v60, %s4433_s9  ;;  %v3445_v41 = vpop.permute.xlu0 %3444 }
 0x6e3   : > { %v3731_v42 = vpop.permute.xlu1 %3730  ;;  %v3947_v11 = vsel %vm3935_vm1, %v7620_v8, %v3445_v41  ;;  %v3863_v8 = vsel %vm1769_vm7, %v3831_v2, %v7384_v17  ;;  %v2657_v41 = vld [vmem:[#allocation3 + $0x50] sm:$0xff] }
 0x6e4   : > { %v7892_v13 = vpop.permute.xlu2 %3470  ;;  %v4028_v28 = vsel %vm4001_vm3, %v3995_v22, %v3731_v42  ;;  %v3895_v58 = vsel %vm1835_vm8, %v3863_v8, %v7466_v16  ;;  %v7924_v16 = vld [vmem:[#allocation3 + $0xf2] sm:$0xff] }
 0x6e5   : > { %4323 = vmatpush.xpose.msk.msra.mxu2 %vm4035_vm5, %v4028_v28  ;;  %v3928_v7 = vsel %vm3902_vm0, %v3895_v58, %v3345_v45  ;;  %v2672_v45 = vld [vmem:[#allocation3 + $0x108] sm:$0xff] }
 0x6e8   : > { %3560 = vrot.lane.b32.xlu0 %v2691_v54, %s4435_s11  ;;  %v2638_v54 = vld [vmem:[#allocation3 + $0xe2] sm:$0xff] }
 0x6e9   : > { %3460 = vrot.lane.b32.xlu1 %v2673_v55, %s4434_s10 }
 0x6ea   : > { %3688 = vrot.lane.b32.xlu2 %v2723_v44, %s4436_s14  ;;  %v3573_v62 = vpop.permute.xlu0 %3572  ;;  %v2689_v44 = vld [vmem:[#allocation3 + $0x51] sm:$0xff] }
 0x6eb   : > { %v3473_v52 = vpop.permute.xlu1 %3472  ;;  %v3980_v24 = vsel %vm3968_vm4, %v3947_v11, %v3573_v62 }
 0x6ec   : > { %v7902_v43 = vpop.permute.xlu2 %3440  ;;  %v4013_v47 = vsel %vm4001_vm3, %v3980_v24, %v3701_v10  ;;  %v3961_v27 = vsel %vm3935_vm1, %v3928_v7, %v3473_v52 }
 0x6ed   : > { %4305 = vmatpush.xpose.msk.msrb.mxu1 %vm4035_vm5, %v4013_v47 }
 0x6f0   : > { %3588 = vrot.lane.b32.xlu0 %v2705_v6, %s4435_s11 }
 0x6f1   : > { %3430 = vrot.lane.b32.xlu1 %v2658_v18, %s4434_s10  ;;  %v2656_v18 = vld [vmem:[#allocation3 + $0x48] sm:$0xff] }
 0x6f2   : > { %3716 = vrot.lane.b32.xlu2 %v7834_v53, %s4436_s14  ;;  %v3601_v40 = vpop.permute.xlu0 %3600 }
 0x6f3   : > { %v3443_v26 = vpop.permute.xlu1 %3442  ;;  %v3994_v17 = vsel %vm3968_vm4, %v3961_v27, %v3601_v40 }
 0x6f4   : > { %v3569_v5 = vpop.permute.xlu2 %3568  ;;  %v4027_v4 = vsel %vm4001_vm3, %v3994_v17, %v3729_v19  ;;  %v3880_v19 = vsel %vm1835_vm8, %v3848_v31, %v7412_v46  ;;  %v8742_v31 = vld [vmem:[#allocation29_spill] sm:$0xff] }
 0x6f5   : > { %4324 = vmatpush.xpose.msk.msra.mxu2 %vm4035_vm5, %v4027_v4  ;;  %v3913_v39 = vsel %vm3902_vm0, %v3880_v19, %v7676_v37  ;;  %v2720_v4 = vld [vmem:[#allocation3 + $0x4a] sm:$0xff] }
 0x6f6   : > { %v3946_v0 = vsel %vm3935_vm1, %v3913_v39, %v3443_v26  ;;  %v2702_v19 = vld [vmem:[#allocation3 + $0xf1] sm:$0xff] }
 0x6f8   : > { %3330 = vrot.lane.b32.xlu0 %v7924_v16, %s4433_s9 }
 0x6f9   : > { %3558 = vrot.lane.b32.xlu1 %v2690_v3, %s4435_s11 }
 0x6fa   : > { %3458 = vrot.lane.b32.xlu2 %v2672_v45, %s4434_s10  ;;  %v3343_v53 = vpop.permute.xlu0 %3342 }
 0x6fb   : > { %v3571_v10 = vpop.permute.xlu1 %3570  ;;  %v3927_v37 = vsel %vm3902_vm0, %v7539_v32, %v3343_v53  ;;  %v2671_v32 = vld [vmem:[#allocation3 + $0xf8] sm:$0xff] }
 0x6fc   : > { %v3597_v23 = vpop.permute.xlu2 %3596  ;;  %v3979_v42 = vsel %vm3968_vm4, %v3946_v0, %v3571_v10  ;;  %v3960_v55 = vsel %vm3935_vm1, %v3927_v37, %v7892_v13  ;;  %v3945_v13 = vsel %vm3935_vm1, %v7679_v15, %v7902_v43  ;;  %v2637_v15 = vld [vmem:[#allocation3 + $0xda] sm:$0xff] }
 0x6fd   : > { %v3978_v38 = vsel %vm3968_vm4, %v3945_v13, %v3569_v5  ;;  %v2670_v5 = vld [vmem:[#allocation3 + $0xf0] sm:$0xff] }
 0x700   : > { %3686 = vrot.lane.b32.xlu0 %v2722_v59, %s4436_s14  ;;  %v8743_v59 = vld [vmem:[#allocation147_spill] sm:$0xff] }
 0x701   : > { %3586 = vrot.lane.b32.xlu1 %v2704_v49, %s4435_s11  ;;  %v2655_v49 = vld [vmem:[#allocation3 + $0x38] sm:$0xff] }
 0x702   : > { %3428 = vrot.lane.b32.xlu2 %v2657_v41, %s4434_s10  ;;  %v3699_v21 = vpop.permute.xlu0 %3698 }
 0x703   : > { %v3599_v22 = vpop.permute.xlu1 %3598  ;;  %v4012_v46 = vsel %vm4001_vm3, %v3979_v42, %v3699_v21 }
 0x704   : > { %v7946_v28 = vpop.permute.xlu2 %3338  ;;  %4306 = vmatpush.xpose.msk.msrb.mxu1 %vm4035_vm5, %v4012_v46  ;;  %v3993_v11 = vsel %vm3968_vm4, %v3960_v55, %v3599_v22  ;;  %v2719_v55 = vld [vmem:[#allocation3 + $0x3a] sm:$0xff] }
 0x708   : > { %3714 = vrot.lane.b32.xlu0 %v7860_v29, %s4436_s14  ;;  %v2703_v29 = vld [vmem:[#allocation3 + $0xf9] sm:$0xff] }
 0x709   : > { %3328 = vrot.lane.b32.xlu1 %v2638_v54, %s4433_s9  ;;  %v2687_v54 = vld [vmem:[#allocation3 + $0x39] sm:$0xff] }
 0x70a   : > { %3556 = vrot.lane.b32.xlu2 %v2689_v44, %s4435_s11  ;;  %v3727_v62 = vpop.permute.xlu0 %3726 }
 0x70b   : > { %v3341_v52 = vpop.permute.xlu1 %3340  ;;  %v4026_v24 = vsel %vm4001_vm3, %v3993_v11, %v3727_v62  ;;  %v4409_v11 = vld [vmem:[#allocation3 + $0x50] sm:$0xff] }
 0x70c   : > { %v3695_v47 = vpop.permute.xlu2 %3694  ;;  %4325 = vmatpush.xpose.msk.msra.mxu2 %vm4035_vm5, %v4026_v24  ;;  %v3926_v58 = vsel %vm3902_vm0, %v7534_v61, %v3341_v52  ;;  %v2688_v61 = vld [vmem:[#allocation3 + $0x49] sm:$0xff]  ;;  %v8745_v24 = vld [vmem:[#allocation21_spill] sm:$0xff] }
 0x70d   : > { %v8744_v62 = vld [vmem:[#allocation48_spill] sm:$0xff] }
 0x70e   : > { %v3781_v52 = vsel %vm1637_vm2, %v4409_v11, %v8744_v62 }
 0x710   : > { %3456 = vrot.lane.b32.xlu0 %v2671_v32, %s4434_s10  ;;  %v8746_v32 = vld [vmem:[#allocation67_spill] sm:$0xff] }
 0x711   : > { %3684 = vrot.lane.b32.xlu1 %v2721_v51, %s4436_s14 }
 0x712   : > { %3584 = vrot.lane.b32.xlu2 %v2703_v29, %s4435_s11  ;;  %v3469_v50 = vpop.permute.xlu0 %3468  ;;  %v8747_v29 = vld [vmem:[#allocation119_spill] sm:$0xff] }
 0x713   : > { %v3697_v2 = vpop.permute.xlu1 %3696  ;;  %v3959_v7 = vsel %vm3935_vm1, %v3926_v58, %v3469_v50 }
 0x714   : > { %v3723_v8 = vpop.permute.xlu2 %3722  ;;  %v4011_v6 = vsel %vm4001_vm3, %v3978_v38, %v3697_v2  ;;  %v3992_v40 = vsel %vm3968_vm4, %v3959_v7, %v3597_v23  ;;  %v3796_v23 = vsel %vm1637_vm2, %v4408_v33, %v8740_v57  ;;  %v2686_v38 = vld [vmem:[#allocation3 + $0x31] sm:$0xff] }
 0x715   : > { %4307 = vmatpush.xpose.msk.msrb.mxu1 %vm4035_vm5, %v4011_v6  ;;  %v3828_v34 = vsel %vm1703_vm6, %v3796_v23, %v8741_v14 }
 0x718   : > { %3426 = vrot.lane.b32.xlu0 %v2656_v18, %s4434_s10 }
 0x719   : > { %3712 = vrot.lane.b32.xlu1 %v7887_v60, %s4436_s14 }
 0x71a   : > { %3326 = vrot.lane.b32.xlu2 %v2637_v15, %s4433_s9  ;;  %v3439_v43 = vpop.permute.xlu0 %3438 }
 0x71b   : > { %v3725_v27 = vpop.permute.xlu1 %3724  ;;  %v3944_v60 = vsel %vm3935_vm1, %v7601_v1, %v3439_v43  ;;  %v3860_v1 = vsel %vm1769_vm7, %v3828_v34, %v8742_v31 }
 0x71c   : > { %v3465_v26 = vpop.permute.xlu2 %3464  ;;  %v4025_v17 = vsel %vm4001_vm3, %v3992_v40, %v3725_v27  ;;  %v3892_v39 = vsel %vm1835_vm8, %v3860_v1, %v8743_v59 }
 0x71d   : > { %4326 = vmatpush.xpose.msk.msra.mxu2 %vm4035_vm5, %v4025_v17  ;;  %v3925_v0 = vsel %vm3902_vm0, %v3892_v39, %v7946_v28  ;;  %v2654_v28 = vld [vmem:[#allocation3 + $0x30] sm:$0xff]  ;;  %v4410_v39 = vld [vmem:[#allocation3 + $0xe0] sm:$0xff] }
 0x720   : > { %3554 = vrot.lane.b32.xlu0 %v2688_v61, %s4435_s11 }
 0x721   : > { %3454 = vrot.lane.b32.xlu1 %v2670_v5, %s4434_s10 }
 0x722   : > { %3682 = vrot.lane.b32.xlu2 %v2720_v4, %s4436_s14  ;;  %v3567_v3 = vpop.permute.xlu0 %3566 }
 0x723   : > { %v3467_v45 = vpop.permute.xlu1 %3466  ;;  %v3977_v53 = vsel %vm3968_vm4, %v3944_v60, %v3567_v3 }
 0x724   : > { %v3435_v10 = vpop.permute.xlu2 %3434  ;;  %v4010_v63 = vsel %vm4001_vm3, %v3977_v53, %v3695_v47  ;;  %v3958_v41 = vsel %vm3935_vm1, %v3925_v0, %v3467_v45  ;;  %v3813_v47 = vsel %vm1703_vm6, %v3781_v52, %v8745_v24 }
 0x725   : > { %4308 = vmatpush.xpose.msk.msrb.mxu1 %vm4035_vm5, %v4010_v63  ;;  %v3845_v51 = vsel %vm1769_vm7, %v3813_v47, %v8746_v32  ;;  %v3942_v4 = vsel %vm3935_vm1, %v7659_v56, %v3435_v10  ;;  %v4411_v47 = vld [vmem:[#allocation3 + $0x30] sm:$0xff]  ;;  %v8753_v32 = vld [vmem:[#allocation19_spill] sm:$0xff] }
 0x726   : > { %v3877_v13 = vsel %vm1835_vm8, %v3845_v51, %v8747_v29  ;;  %v3778_v51 = vsel %vm1637_vm2, %v4411_v47, %v8753_v32  ;;  %v8754_v29 = vld [vmem:[#allocation163_spill] sm:$0xff]  ;;  %v8766_v32 = vld [vmem:[#allocation141_spill] sm:$0xff] }
 0x727   : > { %v3910_v2 = vsel %vm3902_vm0, %v3877_v13, %v7656_v30  ;;  %v3810_v13 = vsel %vm1703_vm6, %v3778_v51, %v8754_v29  ;;  %v8767_v29 = vld [vmem:[#allocation95_spill] sm:$0xff] }
 0x728   : > { %3582 = vrot.lane.b32.xlu0 %v2702_v19, %s4435_s11 }
 0x729   : > { %3424 = vrot.lane.b32.xlu1 %v2655_v49, %s4434_s10  ;;  %v8749_v49 = vld [vmem:[#allocation64_spill] sm:$0xff] }
 0x72a   : > { %3710 = vrot.lane.b32.xlu2 %v7924_v16, %s4436_s14  ;;  %v3595_v42 = vpop.permute.xlu0 %3594  ;;  %v3793_v0 = vsel %vm1637_vm2, %v4410_v39, %v8749_v49  ;;  %v8763_v49 = vld [vmem:[#allocation99_spill] sm:$0xff] }
 0x72b   : > { %v3437_v21 = vpop.permute.xlu1 %3436  ;;  %v3991_v22 = vsel %vm3968_vm4, %v3958_v41, %v3595_v42  ;;  %v8750_v41 = vld [vmem:[#allocation18_spill] sm:$0xff] }
 0x72c   : > { %v4024_v46 = vsel %vm4001_vm3, %v3991_v22, %v3723_v8  ;;  %v3563_v37 = vpop.permute.xlu2 %3562  ;;  %v2718_v8 = vld [vmem:[#allocation3 + $0x32] sm:$0xff]  ;;  %v3943_v6 = vsel %vm3935_vm1, %v3910_v2, %v3437_v21  ;;  %v3825_v42 = vsel %vm1703_vm6, %v3793_v0, %v8750_v41  ;;  %v8751_v21 = vld [vmem:[#allocation110_spill] sm:$0xff]  ;;  %v8764_v41 = vld [vmem:[#allocation159_spill] sm:$0xff] }
 0x72d   : > { %4327 = vmatpush.xpose.msk.msra.mxu2 %vm4035_vm5, %v4024_v46  ;;  %v3975_v3 = vsel %vm3968_vm4, %v3942_v4, %v3563_v37  ;;  %v3857_v22 = vsel %vm1769_vm7, %v3825_v42, %v8751_v21  ;;  %v8756_v2 = vld [vmem:[#allocation56_spill] sm:$0xff] }
 0x72e   : > { %v8759_v4 = vld [vmem:[#allocation84_spill] sm:$0xff] }
 0x730   : > { %3552 = vrot.lane.b32.xlu0 %v2687_v54, %s4435_s11 }
 0x731   : > { %3680 = vrot.lane.b32.xlu1 %v2719_v55, %s4436_s14 }
 0x732   : > { %3422 = vrot.lane.b32.xlu2 %v2654_v28, %s4434_s10  ;;  %v3337_v44 = vpop.permute.xlu0 %3336 }
 0x733   : > { %v3565_v16 = vpop.permute.xlu1 %3564  ;;  %v3924_v43 = vsel %vm3902_vm0, %v7503_v35, %v3337_v44 }
 0x734   : > { %v3591_v50 = vpop.permute.xlu2 %3590  ;;  %v3976_v58 = vsel %vm3968_vm4, %v3943_v6, %v3565_v16  ;;  %v3957_v30 = vsel %vm3935_vm1, %v3924_v43, %v3465_v26  ;;  %v8748_v26 = vld [vmem:[#allocation6_spill] sm:$0xff] }
 0x738   : > { %3550 = vrot.lane.b32.xlu0 %v2686_v38, %s4435_s11 }
 0x739   : > { %3678 = vrot.lane.b32.xlu1 %v2718_v8, %s4436_s14 }
 0x73a   : > { %v3693_v18 = vpop.permute.xlu0 %3692 }
 0x73b   : > { %v3593_v7 = vpop.permute.xlu1 %3592  ;;  %v4009_v15 = vsel %vm4001_vm3, %v3976_v58, %v3693_v18  ;;  %v4412_v18 = vld [vmem:[#allocation3 + $0xd8] sm:$0xff] }
 0x73c   : > { %4309 = vmatpush.xpose.msk.msrb.mxu1 %vm4035_vm5, %v4009_v15  ;;  %v3333_v27 = vpop.permute.xlu2 %3332  ;;  %v3990_v40 = vsel %vm3968_vm4, %v3957_v30, %v3593_v7  ;;  %v8757_v7 = vld [vmem:[#allocation92_spill] sm:$0xff] }
 0x73d   : > { %v3792_v15 = vsel %vm1637_vm2, %v4412_v18, %v8757_v7 }
 0x742   : > { %v3721_v17 = vpop.permute.xlu0 %3720 }
 0x743   : > { %v3335_v61 = vpop.permute.xlu1 %3334  ;;  %v4023_v5 = vsel %vm4001_vm3, %v3990_v40, %v3721_v17 }
 0x744   : > { %4328 = vmatpush.xpose.msk.msra.mxu2 %vm4035_vm5, %v4023_v5  ;;  %v3689_v45 = vpop.permute.xlu2 %3688  ;;  %v3923_v63 = vsel %vm3902_vm0, %v8748_v26, %v3335_v61 }
 0x74a   : > { %v3463_v60 = vpop.permute.xlu0 %3462 }
 0x74b   : > { %v3691_v53 = vpop.permute.xlu1 %3690  ;;  %v3956_v33 = vsel %vm3935_vm1, %v3923_v63, %v3463_v60 }
 0x74c   : > { %v4008_v35 = vsel %vm4001_vm3, %v3975_v3, %v3691_v53  ;;  %v3989_v14 = vsel %vm3968_vm4, %v3956_v33, %v3591_v50  ;;  %v3717_v10 = vpop.permute.xlu2 %3716  ;;  %v8755_v50 = vld [vmem:[#allocation59_spill] sm:$0xff] }
 0x74d   : > { %4310 = vmatpush.xpose.msk.msrb.mxu1 %vm4035_vm5, %v4008_v35  ;;  %v3842_v38 = vsel %vm1769_vm7, %v3810_v13, %v8755_v50  ;;  %v8768_v50 = vld [vmem:[#allocation132_spill] sm:$0xff] }
 0x74e   : > { %v3874_v8 = vsel %vm1835_vm8, %v3842_v38, %v8756_v2  ;;  %v2462_v2 = vld [vmem:[#allocation3 + $0x8] sm:$0xff] }
 0x74f   : > { %v3907_v6 = vsel %vm3902_vm0, %v3874_v8, %v7636_v25  ;;  %v8760_v25 = vld [vmem:[#allocation164_spill] sm:$0xff] }
 0x752   : > { %v3433_v57 = vpop.permute.xlu0 %3432 }
 0x753   : > { %v3719_v23 = vpop.permute.xlu1 %3718  ;;  %v3941_v34 = vsel %vm3935_vm1, %v7580_v48, %v3433_v57  ;;  %v8752_v48 = vld [vmem:[#allocation143_spill] sm:$0xff] }
 0x754   : > { %v4022_v56 = vsel %vm4001_vm3, %v3989_v14, %v3719_v23  ;;  %v3459_v46 = vpop.permute.xlu2 %3458  ;;  %v3889_v37 = vsel %vm1835_vm8, %v3857_v22, %v8752_v48 }
 0x755   : > { %4329 = vmatpush.xpose.msk.msra.mxu2 %vm4035_vm5, %v4022_v56  ;;  %v3922_v54 = vsel %vm3902_vm0, %v3889_v37, %v3333_v27  ;;  %v8758_v27 = vld [vmem:[#allocation160_spill] sm:$0xff]  ;;  %v4413_v56 = vld [vmem:[#allocation3 + $0xc8] sm:$0xff] }
 0x756   : > { %v3824_v40 = vsel %vm1703_vm6, %v3792_v15, %v8758_v27  ;;  %v4034_v27 = vld [vmem:[%s8166_s2] sm:$0xff] }
 0x757   : > { %v3856_v60 = vsel %vm1769_vm7, %v3824_v40, %v8759_v4  ;;  %v8770_v40 = vld [vmem:[#allocation124_spill] sm:$0xff]  ;;  %v8772_v4 = vld [vmem:[#allocation113_spill] sm:$0xff] }
 0x758   : > { %v3888_v3 = vsel %vm1835_vm8, %v3856_v60, %v8760_v25 }
 0x75a   : > { %v3561_v31 = vpop.permute.xlu0 %3560 }
 0x75b   : > { %v3461_v1 = vpop.permute.xlu1 %3460  ;;  %v3974_v19 = vsel %vm3968_vm4, %v3941_v34, %v3561_v31 }
 0x75c   : > { %v4007_v59 = vsel %vm4001_vm3, %v3974_v19, %v3689_v45  ;;  %v3955_v55 = vsel %vm3935_vm1, %v3922_v54, %v3461_v1  ;;  %v3429_v62 = vpop.permute.xlu2 %3428  ;;  %v8762_v19 = vld [vmem:[#allocation44_spill] sm:$0xff] }
 0x75d   : > { %4311 = vmatpush.xpose.msk.msrb.mxu1 %vm4035_vm5, %v4007_v59  ;;  %v3939_v23 = vsel %vm3935_vm1, %v7639_v9, %v3429_v62 }
 0x762   : > { %v3589_v28 = vpop.permute.xlu0 %3588 }
 0x763   : > { %v3431_v44 = vpop.permute.xlu1 %3430  ;;  %v3988_v16 = vsel %vm3968_vm4, %v3955_v55, %v3589_v28 }
 0x764   : > { %v4021_v11 = vsel %vm4001_vm3, %v3988_v16, %v3717_v10  ;;  %v3940_v58 = vsel %vm3935_vm1, %v3907_v6, %v3431_v44  ;;  %v3557_v17 = vpop.permute.xlu2 %3556  ;;  %v8761_v10 = vld [vmem:[#allocation81_spill] sm:$0xff] }
 0x765   : > { %4330 = vmatpush.xpose.msk.msra.mxu2 %vm4035_vm5, %v4021_v11  ;;  %v3791_v34 = vsel %vm1637_vm2, %v4413_v56, %v8761_v10  ;;  %v3972_v31 = vsel %vm3968_vm4, %v3939_v23, %v3557_v17  ;;  %v8774_v23 = vld [vmem:[#allocation66_spill] sm:$0xff]  ;;  %v8775_v56 = vld [vmem:[#allocation37_spill] sm:$0xff] }
 0x766   : > { %v3823_v59 = vsel %vm1703_vm6, %v3791_v34, %v8762_v19  ;;  %v8776_v34 = vld [vmem:[#allocation65_spill] sm:$0xff] }
 0x767   : > { %v3855_v0 = vsel %vm1769_vm7, %v3823_v59, %v8763_v49 }
 0x768   : > { %v3887_v9 = vsel %vm1835_vm8, %v3855_v0, %v8764_v41 }
 0x76a   : > { %v3331_v52 = vpop.permute.xlu0 %3330 }
 0x76b   : > { %v3559_v24 = vpop.permute.xlu1 %3558  ;;  %v3921_v45 = vsel %vm3902_vm0, %v3888_v3, %v3331_v52  ;;  %v4414_v52 = vld [vmem:[#allocation3 + $0xc0] sm:$0xff] }
 0x76c   : > { %v3973_v43 = vsel %vm3968_vm4, %v3940_v58, %v3559_v24  ;;  %v3954_v53 = vsel %vm3935_vm1, %v3921_v45, %v3459_v46  ;;  %v3585_v57 = vpop.permute.xlu2 %3584  ;;  %v8765_v24 = vld [vmem:[#allocation62_spill] sm:$0xff] }
 0x76d   : > { %v3790_v47 = vsel %vm1637_vm2, %v4414_v52, %v8765_v24  ;;  %v2461_v3 = vld [vmem:[#allocation3] sm:$0xff] }
 0x76e   : > { %v3822_v51 = vsel %vm1703_vm6, %v3790_v47, %v8766_v32 }
 0x76f   : > { %v3854_v13 = vsel %vm1769_vm7, %v3822_v51, %v8767_v29 }
 0x772   : > { %v3687_v30 = vpop.permute.xlu0 %3686 }
 0x773   : > { %v3587_v61 = vpop.permute.xlu1 %3586  ;;  %v4006_v5 = vsel %vm4001_vm3, %v3973_v43, %v3687_v30  ;;  %v8769_v43 = vld [vmem:[#allocation46_spill] sm:$0xff] }
 0x774   : > { %4312 = vmatpush.xpose.msk.msrb.mxu1 %vm4035_vm5, %v4006_v5  ;;  %v3987_v35 = vsel %vm3968_vm4, %v3954_v53, %v3587_v61  ;;  %v3327_v42 = vpop.permute.xlu2 %3326  ;;  %v3775_v30 = vsel %vm1637_vm2, %v2462_v2, %v8769_v43  ;;  %v8771_v61 = vld [vmem:[#allocation57_spill] sm:$0xff] }
 0x775   : > { %v3807_v17 = vsel %vm1703_vm6, %v3775_v30, %v8770_v40 }
 0x776   : > { %v3839_v5 = vsel %vm1769_vm7, %v3807_v17, %v8771_v61 }
 0x777   : > { %v3871_v60 = vsel %vm1835_vm8, %v3839_v5, %v8772_v4 }
 0x778   : > { %v3904_v25 = vsel %vm3902_vm0, %v3871_v60, %v7615_v36 }
 0x77a   : > { %v3715_v26 = vpop.permute.xlu0 %3714 }
 0x77b   : > { %v3329_v63 = vpop.permute.xlu1 %3328  ;;  %v4020_v33 = vsel %vm4001_vm3, %v3987_v35, %v3715_v26 }
 0x77c   : > { %4331 = vmatpush.xpose.msk.msra.mxu2 %vm4035_vm5, %v4020_v33  ;;  %v3920_v21 = vsel %vm3902_vm0, %v3887_v9, %v3329_v63  ;;  %v3683_v55 = vpop.permute.xlu2 %3682  ;;  %v8773_v33 = vld [vmem:[#allocation8_spill] sm:$0xff] }
 0x782   : > { %v3457_v14 = vpop.permute.xlu0 %3456 }
 0x783   : > { %v3685_v1 = vpop.permute.xlu1 %3684  ;;  %v3953_v22 = vsel %vm3935_vm1, %v3920_v21, %v3457_v14 }
 0x784   : > { %v4005_v39 = vsel %vm4001_vm3, %v3972_v31, %v3685_v1  ;;  %v3986_v37 = vsel %vm3968_vm4, %v3953_v22, %v3585_v57  ;;  %v3711_v58 = vpop.permute.xlu2 %3710  ;;  %v3774_v57 = vsel %vm1637_vm2, %v2461_v3, %v8773_v33  ;;  %v8777_v22 = vld [vmem:[#allocation10_spill] sm:$0xff] }
 0x785   : > { %4313 = vmatpush.xpose.msk.msrb.mxu1 %vm4035_vm5, %v4005_v39  ;;  %v3806_v14 = vsel %vm1703_vm6, %v3774_v57, %v8774_v23 }
 0x786   : > { %v3838_v36 = vsel %vm1769_vm7, %v3806_v14, %v8775_v56 }
 0x787   : > { %v3870_v31 = vsel %vm1835_vm8, %v3838_v36, %v8776_v34 }
 0x788   : > { %v3903_v1 = vsel %vm3902_vm0, %v3870_v31, %v7611_v20 }
 0x78a   : > { %v3427_v46 = vpop.permute.xlu0 %3426 }
 0x78b   : > { %v3713_v48 = vpop.permute.xlu1 %3712  ;;  %v3938_v28 = vsel %vm3935_vm1, %v7542_v12, %v3427_v46  ;;  %v3886_v12 = vsel %vm1835_vm8, %v3854_v13, %v8768_v50 }
 0x78c   : > { %v4019_v54 = vsel %vm4001_vm3, %v3986_v37, %v3713_v48  ;;  %v3919_v38 = vsel %vm3902_vm0, %v3886_v12, %v3327_v42  ;;  %v3423_v10 = vpop.permute.xlu2 %3422 }
 0x78d   : > { %4332 = vmatpush.xpose.msk.msra.mxu2 %vm4035_vm5, %v4019_v54  ;;  %v3936_v19 = vsel %vm3935_vm1, %v3903_v1, %v3423_v10 }
 0x792   : > { %v3555_v44 = vpop.permute.xlu0 %3554 }
 0x793   : > { %v3455_v16 = vpop.permute.xlu1 %3454  ;;  %v3971_v11 = vsel %vm3968_vm4, %v3938_v28, %v3555_v44 }
 0x794   : > { %v4004_v62 = vsel %vm4001_vm3, %v3971_v11, %v3683_v55  ;;  %v3952_v8 = vsel %vm3935_vm1, %v3919_v38, %v3455_v16 }
 0x795   : > { %4314 = vmatpush.xpose.msk.msrb.mxu1 %vm4035_vm5, %v4004_v62 }
 0x79a   : > { %v3583_v6 = vpop.permute.xlu0 %3582 }
 0x79b   : > { %v3425_v18 = vpop.permute.xlu1 %3424  ;;  %v3985_v7 = vsel %vm3968_vm4, %v3952_v8, %v3583_v6 }
 0x79c   : > { %v4018_v15 = vsel %vm4001_vm3, %v3985_v7, %v3711_v58  ;;  %v3937_v45 = vsel %vm3935_vm1, %v3904_v25, %v3425_v18 }
 0x79d   : > { %4333 = vmatpush.xpose.msk.msra.mxu2 %vm4035_vm5, %v4018_v15 }
 0x7a0   : > { %4334 = vmatmul.msk.f32.vlgmr.msra.gmra.mxu2 %vm4035_vm5, %v4034_v27 }
 0x7a2   : > { %v3553_v53 = vpop.permute.xlu0 %3552 }
 0x7a3   : > { %v3681_v35 = vpop.permute.xlu1 %3680  ;;  %v3970_v26 = vsel %vm3968_vm4, %v3937_v45, %v3553_v53 }
 0x7a4   : > { %v4003_v63 = vsel %vm4001_vm3, %v3970_v26, %v3681_v35 }
 0x7a5   : > { %4315 = vmatpush.xpose.msk.msrb.mxu1 %vm4035_vm5, %v4003_v63 }
 0x7aa   : > { %v3551_v59 = vpop.permute.xlu0 %3550 }
 0x7ab   : > { %v3679_v39 = vpop.permute.xlu1 %3678  ;;  %v3969_v49 = vsel %vm3968_vm4, %v3936_v19, %v3551_v59 }
 0x7ac   : > { %v4002_v0 = vsel %vm4001_vm3, %v3969_v49, %v3679_v39 }
 0x7ad   : > { %4316 = vmatpush.xpose.msk.msrb.mxu1 %vm4035_vm5, %v4002_v0 }
 0x7b0   : > { %4317 = vmatmul.msk.f32.vlgmr.msrb.gmra.mxu1 %vm4035_vm5, %v4034_v27 }
 0x823   : > { %v4172_v41 = vpop.f32.mrf.mxu2 }
 0x82d   : > { %v4152_v9 = vpop.f32.mrf.mxu1 }
 0x82e   : > { %v4175_v42 = vadd.f32 %v4172_v41, %v4152_v9 }
 0x830   : > { %4176 = vadd.xlane.f32.xlu2 %v4175_v42 }
 0x8a3   : > { %v4177_v21 = vpop.xlane.xlu2 %4176 }
 0x8a4   : > { %v4178_v46 = vmul.f32 %v4177_v21, %v8777_v22 }
 0x8a6   : > { %v4179_v20 = vsub.f32 %v4152_v9, %v4178_v46  ;;  %v4180_v48 = vsub.f32 %v4172_v41, %v4178_v46 }
 0x8a8   : > { %v4181_v37 = vmul.f32 %v4179_v20, %v4179_v20  ;;  %v4182_v54 = vmul.f32 %v4180_v48, %v4180_v48 }
 0x8aa   : > { %v4183_v55 = vadd.f32 %v4182_v54, %v4181_v37 }
 0x8ac   : > { %4184 = vadd.xlane.f32.xlu0 %v4183_v55 }
 0x91f   : > { %v4185_v28 = vpop.xlane.xlu0 %4184 }
 0x920   : > { %v4186_v44 = vmul.f32 %v4185_v28, %v8777_v22 }
 0x922   : > { %v4187_v16 = vadd.f32 1e-05, %v4186_v44 }
 0x924   : > { %4375 = vrsqrt.f32 %v4187_v16  ;;  %vm4194_vm6 = vweird.f32 %v4187_v16 }
 0x92a   : > { %v4376_v11 = vpop.eup %4375 }
 0x92b   : > { %v4189_v62 = vmul.f32 %v4376_v11, %v4187_v16  ;;  %vm4195_vm2 = vweird.f32 %v4376_v11 }
 0x92c   : > { %vm4196_vm7 = vmor %vm4194_vm6, %vm4195_vm2 }
 0x92d   : > { %v4190_v52 = vmul.f32 %v4376_v11, %v4189_v62 }
 0x92f   : > { %v4191_v24 = vmul.f32 0.5, %v4190_v52 }
 0x931   : > { %v4192_v47 = vsub.f32 1.5, %v4191_v24 }
 0x933   : > { %v4193_v32 = vmul.f32 %v4376_v11, %v4192_v47 }
 0x935   : > { %v4197_v51 = vsel %vm4196_vm7, %v4376_v11, %v4193_v32 }
 0x936   : > { %v4198_v29 = vmul.f32 %v4197_v51, %v4179_v20  ;;  %v4199_v13 = vmul.f32 %v4197_v51, %v4180_v48 }
 0x938   : > { %v4200_v50 = vmax.f32 %v4198_v29, 0.0  ;;  %v4201_v12 = vmax.f32 %v4199_v13, 0.0 }
 0x93a   : > { %4202 = vst [vmem:[%s170_s20] sm:$0xff] %v4200_v50 }
 0x93b   : > { %4203 = vst [vmem:[%s170_s20 + $0x8] sm:$0xff] %v4201_v12 }
 0x93c PF: > { %s13_s12 = sadd.s32 1, %s4421_s12  }
 0x93d   : > { %p10_p4 = scmp.ge.s32.totalorder %s13_s12, 4  }
 0x93f   :  { %12 = sbr.rel (!%p10_p4) target bundleno = 1 (0x1), region = 66 }

</bundles_post_ra>
